<compile_context>
chip_gen: v7x
topology: tpu7x:2x2x1
jax: 0.10.0
libtpu: 0.0.40
codegen_flags: <defaults>
</compile_context>

<pallas_src>
import functools
from collections import namedtuple

import numpy as np
import jax
import jax.numpy as jnp
from jax.experimental import pallas as pl
from jax.experimental.pallas import tpu as pltpu

# ----------------------------------------------------------------------------
# Genotype (reference did not supply one; skip_connect-only, no second layers,
# no attention bottleneck).
# ----------------------------------------------------------------------------
Genotype = namedtuple(
    "Genotype",
    ["normal", "normal_concat", "normal_bottleneck",
     "reduce", "reduce_concat", "reduce_bottleneck"])

GENOTYPE = Genotype(
    normal=[("skip_connect", 0, None), ("skip_connect", 1, None),
            ("skip_connect", 0, None), ("skip_connect", 2, None),
            ("skip_connect", 1, None), ("skip_connect", 3, None),
            ("skip_connect", 2, None), ("skip_connect", 4, None)],
    normal_concat=[2, 3, 4, 5],
    normal_bottleneck=None,
    reduce=[("skip_connect", 0, None), ("skip_connect", 1, None),
            ("skip_connect", 2, None), ("skip_connect", 0, None),
            ("skip_connect", 2, None), ("skip_connect", 3, None),
            ("skip_connect", 3, None), ("skip_connect", 4, None)],
    reduce_concat=[2, 3, 4, 5],
    reduce_bottleneck=None,
)

BN_EPS = 1e-5


# ----------------------------------------------------------------------------
# The single fused Pallas kernel
# ----------------------------------------------------------------------------
def _network_kernel(cols_ref, wpack_ref, bpack_ref, see8_ref, soo8_ref,
                    see4_ref, soo4_ref, pool_ref, out_ref, *, plan):
    """Whole NetworkDEAP forward on VMEM-resident activations.

    Activations are stored transposed as (C, M) with M = N*H*W on the lane axis.
    `plan` is a static Python structure of slice descriptors into the packed
    weight/bias slabs, so every op below is a plain 2-D matmul / relu / add.
    """
    f32, bf16 = jnp.float32, jnp.bfloat16

    def getw(d):                       # -> (Cout, Cin) bf16 weight block
        off, co, ci = d
        return wpack_ref[off:off + co, 0:ci].astype(bf16)

    bp = bpack_ref[...]                # (C_MAX, n_bias) f32, tiny, kept live

    def getb(d):                       # -> (C, 1) f32 bias column
        j, c = d
        return bp[0:c, j:j + 1]

    def mm(w_bf16, act):               # (Cout, Cin) @ (Cin, M) -> (Cout, M) f32
        return jnp.dot(w_bf16, act.astype(bf16), preferred_element_type=f32)

    def relu(x):
        return jnp.maximum(x, 0.0)

    # Transposed 0/1 selection operators: (M_in, M_out) for 8x8->4x4 / 4x4->2x2.
    sels = {8: (see8_ref[...], soo8_ref[...]),
            4: (see4_ref[...], soo4_ref[...])}

    def apply_rcb(chunks, p):
        # ReLU -> 1x1 conv -> BN (scale folded into W, bias added here).
        acc = None
        for ch, wd in zip(chunks, p["wds"]):
            t = mm(getw(wd), relu(ch))
            acc = t if acc is None else acc + t
        return acc + getb(p["bd"])

    def apply_fr(chunks, p):
        # FactorizedReduce: ReLU -> stride-2 even/even and odd/odd 1x1 convs
        # (weights zero-padded to full width so no channel concat is needed)
        # -> BN (scale folded, bias added once).
        see_t, soo_t = sels[p["res"]]
        acc = None
        for ch, w1d, w2d in zip(chunks, p["w1ds"], p["w2ds"]):
            r = relu(ch).astype(bf16)                              # (c, M_in)
            ee = jnp.dot(r, see_t, preferred_element_type=f32)     # (c, M_out)
            oo = jnp.dot(r, soo_t, preferred_element_type=f32)
            t = mm(getw(w1d), ee) + mm(getw(w2d), oo)
            acc = t if acc is None else acc + t
        return acc + getb(p["bd"])

    def apply_pre(chunks, p):
        return apply_fr(chunks, p) if p["kind"] == "fr" else apply_rcb(chunks, p)

    # Stem: 3x3 conv (im2col done by the JAX wrapper) + folded BN, no ReLU.
    stem = jnp.dot(getw(plan["stem"]["wd"]), cols_ref[...],
                   preferred_element_type=f32) + getb(plan["stem"]["bd"])

    s0_chunks, s1_chunks = (stem,), (stem,)
    for cell in plan["cells"]:
        t0 = apply_pre(s0_chunks, cell["pre0"])
        t1 = apply_pre(s1_chunks, cell["pre1"])
        states = [t0, t1]
        for i in range(cell["steps"]):
            hs = []
            for slot in (2 * i, 2 * i + 1):
                h = states[cell["indices"][slot]]
                op = cell["ops"][slot]
                if op is not None:     # skip_connect, stride 2 => FactorizedReduce
                    h = apply_fr((h,), op)
                hs.append(h)
            states.append(hs[0] + hs[1])
        # Cell output = channel-concat of `concat` states; kept chunked (the
        # consumers use row-split weight blocks instead of an in-kernel concat).
        s0_chunks, s1_chunks = s1_chunks, tuple(states[j] for j in cell["concat"])

    # Global average pool (matmul with the pooling matrix) fused with classifier.
    pool_t = pool_ref[...]                                         # (M_final, N)
    logits = None
    for ch, wd in zip(s1_chunks, plan["cls_wds"]):
        pooled = jnp.dot(ch, pool_t, preferred_element_type=f32)   # (Cj, N) f32
        t = mm(getw(wd), pooled)
        logits = t if logits is None else logits + t
    out_ref[...] = logits + getb(plan["cls_bd"])                   # (ncls, N)


# ----------------------------------------------------------------------------
# Deterministic parameter construction + packing (shapes follow NetworkDEAP)
# ----------------------------------------------------------------------------
class _KeyGen:
    def __init__(self, key):
        self._key = key

    def __call__(self):
        self._key, sub = jax.random.split(self._key)
        return sub


def _bn_affine(kg, C):
    # Eval-mode BatchNorm (running_mean=0, running_var=1) folded into an affine.
    gamma = 1.0 + 0.1 * jax.random.normal(kg(), (C,), jnp.float32)
    beta = 0.1 * jax.random.normal(kg(), (C,), jnp.float32)
    scale = gamma / jnp.sqrt(1.0 + BN_EPS)
    return np.asarray(scale), np.asarray(beta)


def _conv_w(kg, cin, cout):
    return np.asarray(jax.random.normal(kg(), (cin, cout), jnp.float32)) / np.sqrt(cin)


class _Packer:
    """Packs transposed, scale-folded weight blocks row-wise into one f32 slab
    (8-sublane-aligned starts, lane offset always 0) and biases column-wise into
    a second slab.  Returns static slice descriptors used inside the kernel."""

    def __init__(self):
        self._wblocks, self._wrows, self._kmax, self._biases = [], 0, 0, []

    def add_w(self, w):                 # w given in math orientation (Cin, Cout)
        wt = np.asarray(w, np.float32).T          # stored as (Cout, Cin)
        co, ci = wt.shape
        off = self._wrows
        self._wblocks.append((off, wt))
        self._wrows = -(-(off + co) // 8) * 8     # next block starts 8-aligned
        self._kmax = max(self._kmax, ci)
        return (off, co, ci)

    def add_b(self, b):
        b = np.asarray(b, np.float32).reshape(-1)
        j = len(self._biases)
        self._biases.append(b)
        return (j, b.shape[0])

    def finalize(self):
        wpack = np.zeros((max(self._wrows, 8), self._kmax), np.float32)
        for off, wt in self._wblocks:
            wpack[off:off + wt.shape[0], :wt.shape[1]] = wt
        cmax = max(b.shape[0] for b in self._biases)
        bpack = np.zeros((cmax, len(self._biases)), np.float32)
        for j, b in enumerate(self._biases):
            bpack[:b.shape[0], j] = b
        return jnp.asarray(wpack), jnp.asarray(bpack)


def _rcb_plan(kg, pk, chunk_cs, cout):
    """ReLUConvBN(C_in=sum(chunk_cs), C_out=cout, 1x1, stride 1)."""
    cin = sum(chunk_cs)
    w = _conv_w(kg, cin, cout)
    scale, beta = _bn_affine(kg, cout)
    wf = w * scale[None, :]
    wds, r = [], 0
    for c in chunk_cs:
        wds.append(pk.add_w(wf[r:r + c]))
        r += c
    return {"kind": "rcb", "wds": tuple(wds), "bd": pk.add_b(beta)}


def _fr_plan(kg, pk, chunk_cs, cout, res):
    """FactorizedReduce(C_in=sum(chunk_cs), C_out=cout) acting at spatial `res`."""
    cin, half = sum(chunk_cs), cout // 2
    w1 = _conv_w(kg, cin, half)
    w2 = _conv_w(kg, cin, half)
    scale, beta = _bn_affine(kg, cout)
    w1p = np.zeros((cin, cout), np.float32)
    w2p = np.zeros((cin, cout), np.float32)
    w1p[:, :half] = w1 * scale[None, :half]       # zero-padded -> no concat needed
    w2p[:, half:] = w2 * scale[None, half:]
    w1ds, w2ds, r = [], [], 0
    for c in chunk_cs:
        w1ds.append(pk.add_w(w1p[r:r + c]))
        w2ds.append(pk.add_w(w2p[r:r + c]))
        r += c
    return {"kind": "fr", "w1ds": tuple(w1ds), "w2ds": tuple(w2ds),
            "bd": pk.add_b(beta), "res": res}


def _downsample_mats(N, H, W):
    """Transposed 0/1 selection matrices for even/even and odd/odd stride-2."""
    Ho, Wo = H // 2, W // 2
    ee = np.zeros((N * H * W, N * Ho * Wo), np.float32)
    oo = np.zeros_like(ee)
    for n in range(N):
        for h in range(Ho):
            for w in range(Wo):
                o = (n * Ho + h) * Wo + w
                ee[(n * H + 2 * h) * W + 2 * w, o] = 1.0
                oo[(n * H + 2 * h + 1) * W + 2 * w + 1, o] = 1.0
    return jnp.asarray(ee, jnp.bfloat16), jnp.asarray(oo, jnp.bfloat16)


def _pool_mat_t(N, HW):
    p = np.zeros((N * HW, N), np.float32)
    for n in range(N):
        p[n * HW:(n + 1) * HW, n] = 1.0 / HW
    return jnp.asarray(p)


def build_network(key, *, C=4, num_classes=10, layers=4, N=2, in_ch=8, H=8, W=8):
    kg = _KeyGen(key)
    pk = _Packer()

    stem_mult = 3
    C_curr = stem_mult * C
    scale, beta = _bn_affine(kg, C_curr)
    w_stem = _conv_w(kg, 9 * in_ch, C_curr) * scale[None, :]   # BN scale folded
    stem = {"wd": pk.add_w(w_stem), "bd": pk.add_b(beta)}

    cells = []
    chunks_pp, chunks_p = (C_curr,), (C_curr,)   # channel chunking of s0 / s1
    res_pp, res_p = H, H                         # spatial side of s0 / s1
    C_curr = C
    reduction_prev = False
    for i in range(layers):
        reduction = i in (layers // 3, 2 * layers // 3)
        if reduction:
            C_curr *= 2
        geno = GENOTYPE.reduce if reduction else GENOTYPE.normal
        concat = GENOTYPE.reduce_concat if reduction else GENOTYPE.normal_concat
        names, indices, _second = zip(*geno)
        steps = len(names) // 2
        if reduction_prev:
            pre0 = _fr_plan(kg, pk, chunks_pp, C_curr, res=res_pp)
        else:
            pre0 = _rcb_plan(kg, pk, chunks_pp, C_curr)
        pre1 = _rcb_plan(kg, pk, chunks_p, C_curr)
        ops = []
        for _name, idx in zip(names, indices):
            stride = 2 if (reduction and idx < 2) else 1
            # 'skip_connect': Identity (stride 1) or FactorizedReduce (stride 2).
            ops.append(_fr_plan(kg, pk, (C_curr,), C_curr, res=res_p)
                       if stride == 2 else None)
        cells.append({"pre0": pre0, "pre1": pre1, "ops": tuple(ops),
                      "indices": tuple(indices), "concat": tuple(concat),
                      "steps": steps})
        reduction_prev = reduction
        multiplier = len(concat)
        chunks_pp, chunks_p = chunks_p, (C_curr,) * multiplier
        res_pp, res_p = res_p, (res_p // 2 if reduction else res_p)

    # NOTE: the reference also builds self.skip_connect (Conv1d) and computes
    # `state = max(relu(skip))`, but that value never reaches the logits ->
    # dead code, dropped here (it would be DCE'd under jit anyway).

    C_prev = sum(chunks_p)
    w_cls = _conv_w(kg, C_prev, num_classes)
    cls_wds, r = [], 0
    for c in chunks_p:
        cls_wds.append(pk.add_w(w_cls[r:r + c]))
        r += c
    cls_bd = pk.add_b(np.asarray(
        0.1 * jax.random.normal(kg(), (num_classes,), jnp.float32)))

    wpack, bpack = pk.finalize()
    see8, soo8 = _downsample_mats(N, H, W)
    see4, soo4 = _downsample_mats(N, H // 2, W // 2)
    pool_t = _pool_mat_t(N, res_p * res_p)

    plan = {"stem": stem, "cells": cells,
            "cls_wds": tuple(cls_wds), "cls_bd": cls_bd}
    arrays = {"wpack": wpack, "bpack": bpack,
              "seeT8": see8, "sooT8": soo8, "seeT4": see4, "sooT4": soo4,
              "poolT": pool_t}
    return plan, arrays


# ----------------------------------------------------------------------------
# Forward wrapper (jitted): im2col glue + one pallas_call
# ----------------------------------------------------------------------------
def _im2col_3x3(x):
    """x: (N, H, W, C) -> transposed patches (9*C, N*H*W), 'same' zero padding."""
    n, h, w, c = x.shape
    xp = jnp.pad(x, ((0, 0), (1, 1), (1, 1), (0, 0)))
    cols = jnp.concatenate([xp[:, dy:dy + h, dx:dx + w, :]
                            for dy in range(3) for dx in range(3)], axis=-1)
    return cols.reshape(n * h * w, 9 * c).T


def make_forward(plan, arrays, *, N, H, W, in_ch, num_classes):
    kernel = functools.partial(_network_kernel, plan=plan)

    @jax.jit
    def forward(x_nchw):
        # PyTorch-style NCHW input -> channels-last, then im2col for the stem.
        x = jnp.transpose(x_nchw, (0, 2, 3, 1)).astype(jnp.float32)
        cols_t = _im2col_3x3(x).astype(jnp.bfloat16)      # (9*in_ch, N*H*W)
        operands = (cols_t, arrays["wpack"], arrays["bpack"],
                    arrays["seeT8"], arrays["sooT8"],
                    arrays["seeT4"], arrays["sooT4"], arrays["poolT"])
        in_specs = [pl.BlockSpec(op.shape, lambda i: (0, 0)) for op in operands]
        logits_t = pl.pallas_call(
            kernel,
            out_shape=jax.ShapeDtypeStruct((num_classes, N), jnp.float32),
            grid=(1,),
            in_specs=in_specs,
            out_specs=pl.BlockSpec((num_classes, N), lambda i: (0, 0)),
            compiler_params=pltpu.CompilerParams(
                dimension_semantics=("arbitrary",)),
        )(*operands)
        return logits_t.T                                  # (N, num_classes)

    return forward


if __name__ == "__main__":
    key = jax.random.PRNGKey(0)
    pkey, xkey = jax.random.split(key)
    C, num_classes, layers = 4, 10, 4
    N, in_ch, H, W = 2, 8, 8, 8            # module implies 8 input chans, 8x8

    plan, arrays = build_network(pkey, C=C, num_classes=num_classes,
                                 layers=layers, N=N, in_ch=in_ch, H=H, W=W)
    forward = make_forward(plan, arrays, N=N, H=H, W=W, in_ch=in_ch,
                           num_classes=num_classes)

    x = jax.random.normal(xkey, (N, in_ch, H, W), jnp.float32)   # NCHW
    logits = jax.block_until_ready(forward(x))
    assert logits.shape == (N, num_classes), logits.shape
    assert bool(jnp.all(jnp.isfinite(logits)))
    print("KERNEL_OK")
</pallas_src>

<mosaic_0001>
module attributes {stable_mosaic.version = 11 : i64} {
  func.func @_network_kernel(%arg0: i32, %arg1: memref<72x128xbf16, #tpu.memory_space<vmem>>, %arg2: memref<664x72xf32, #tpu.memory_space<vmem>>, %arg3: memref<16x16xf32, #tpu.memory_space<vmem>>, %arg4: memref<128x32xbf16, #tpu.memory_space<vmem>>, %arg5: memref<128x32xbf16, #tpu.memory_space<vmem>>, %arg6: memref<32x8xbf16, #tpu.memory_space<vmem>>, %arg7: memref<32x8xbf16, #tpu.memory_space<vmem>>, %arg8: memref<8x2xf32, #tpu.memory_space<vmem>>, %arg9: memref<10x2xf32, #tpu.memory_space<vmem>>) attributes {dimension_semantics = [#tpu.dimension_semantics<arbitrary>], iteration_bounds = array<i64: 1>, scalar_prefetch = 0 : i64, scratch_operands = 0 : i64, tpu.core_type = #tpu.core_type<tc>, window_params = [{pipeline_mode = #tpu.pipeline_mode<synchronous>, transform_indices = @transform_0, window_bounds = array<i64: 72, 128>}, {pipeline_mode = #tpu.pipeline_mode<synchronous>, transform_indices = @transform_1, window_bounds = array<i64: 664, 72>}, {pipeline_mode = #tpu.pipeline_mode<synchronous>, transform_indices = @transform_2, window_bounds = array<i64: 16, 16>}, {pipeline_mode = #tpu.pipeline_mode<synchronous>, transform_indices = @transform_3, window_bounds = array<i64: 128, 32>}, {pipeline_mode = #tpu.pipeline_mode<synchronous>, transform_indices = @transform_4, window_bounds = array<i64: 128, 32>}, {pipeline_mode = #tpu.pipeline_mode<synchronous>, transform_indices = @transform_5, window_bounds = array<i64: 32, 8>}, {pipeline_mode = #tpu.pipeline_mode<synchronous>, transform_indices = @transform_6, window_bounds = array<i64: 32, 8>}, {pipeline_mode = #tpu.pipeline_mode<synchronous>, transform_indices = @transform_7, window_bounds = array<i64: 8, 2>}, {pipeline_mode = #tpu.pipeline_mode<synchronous>, transform_indices = @transform_8, window_bounds = array<i64: 10, 2>}]} {
    %c0 = arith.constant 0 : index
    %c0_0 = arith.constant 0 : index
    %0 = vector.load %arg3[%c0, %c0_0] : memref<16x16xf32, #tpu.memory_space<vmem>>, vector<16x16xf32>
    %c0_1 = arith.constant 0 : index
    %c0_2 = arith.constant 0 : index
    %1 = vector.load %arg4[%c0_1, %c0_2] : memref<128x32xbf16, #tpu.memory_space<vmem>>, vector<128x32xbf16>
    %c0_3 = arith.constant 0 : index
    %c0_4 = arith.constant 0 : index
    %2 = vector.load %arg5[%c0_3, %c0_4] : memref<128x32xbf16, #tpu.memory_space<vmem>>, vector<128x32xbf16>
    %c0_5 = arith.constant 0 : index
    %c0_6 = arith.constant 0 : index
    %3 = vector.load %arg6[%c0_5, %c0_6] : memref<32x8xbf16, #tpu.memory_space<vmem>>, vector<32x8xbf16>
    %c0_7 = arith.constant 0 : index
    %c0_8 = arith.constant 0 : index
    %4 = vector.load %arg7[%c0_7, %c0_8] : memref<32x8xbf16, #tpu.memory_space<vmem>>, vector<32x8xbf16>
    %c0_9 = arith.constant 0 : index
    %c0_10 = arith.constant 0 : index
    %5 = vector.load %arg2[%c0_9, %c0_10] : memref<664x72xf32, #tpu.memory_space<vmem>>, vector<12x72xf32>
    %6 = arith.truncf %5 : vector<12x72xf32> to vector<12x72xbf16>
    %c0_11 = arith.constant 0 : index
    %c0_12 = arith.constant 0 : index
    %7 = vector.load %arg1[%c0_11, %c0_12] : memref<72x128xbf16, #tpu.memory_space<vmem>>, vector<72x128xbf16>
    %cst = arith.constant dense<0.000000e+00> : vector<12x128xf32>
    %8 = tpu.matmul %6, %7, %cst {dimension_numbers = #tpu.dot_dimension_numbers<[1], [0], [0], [1], [0, 0, 1, 1], [], []>} : vector<12x72xbf16>, vector<72x128xbf16>, vector<12x128xf32> -> vector<12x128xf32>
    %9 = vector.extract_strided_slice %0 {offsets = [0, 0], sizes = [12, 1], strides = [1, 1]} : vector<16x16xf32> to vector<12x1xf32>
    %10 = vector.broadcast %9 : vector<12x1xf32> to vector<12x128xf32>
    %11 = arith.addf %8, %10 : vector<12x128xf32>
    %c16 = arith.constant 16 : index
    %c0_13 = arith.constant 0 : index
    %12 = vector.load %arg2[%c16, %c0_13] : memref<664x72xf32, #tpu.memory_space<vmem>>, vector<4x12xf32>
    %13 = arith.truncf %12 : vector<4x12xf32> to vector<4x12xbf16>
    %cst_14 = arith.constant 0.000000e+00 : f32
    %14 = vector.broadcast %cst_14 : f32 to vector<12x128xf32>
    %15 = arith.maximumf %11, %14 : vector<12x128xf32>
    %16 = arith.truncf %15 : vector<12x128xf32> to vector<12x128xbf16>
    %cst_15 = arith.constant dense<0.000000e+00> : vector<4x128xf32>
    %17 = tpu.matmul %13, %16, %cst_15 {dimension_numbers = #tpu.dot_dimension_numbers<[1], [0], [0], [1], [0, 0, 1, 1], [], []>} : vector<4x12xbf16>, vector<12x128xbf16>, vector<4x128xf32> -> vector<4x128xf32>
    %18 = vector.extract_strided_slice %0 {offsets = [0, 1], sizes = [4, 1], strides = [1, 1]} : vector<16x16xf32> to vector<4x1xf32>
    %19 = vector.broadcast %18 : vector<4x1xf32> to vector<4x128xf32>
    %20 = arith.addf %17, %19 : vector<4x128xf32>
    %c24 = arith.constant 24 : index
    %c0_16 = arith.constant 0 : index
    %21 = vector.load %arg2[%c24, %c0_16] : memref<664x72xf32, #tpu.memory_space<vmem>>, vector<4x12xf32>
    %22 = arith.truncf %21 : vector<4x12xf32> to vector<4x12xbf16>
    %cst_17 = arith.constant 0.000000e+00 : f32
    %23 = vector.broadcast %cst_17 : f32 to vector<12x128xf32>
    %24 = arith.maximumf %11, %23 : vector<12x128xf32>
    %25 = arith.truncf %24 : vector<12x128xf32> to vector<12x128xbf16>
    %cst_18 = arith.constant dense<0.000000e+00> : vector<4x128xf32>
    %26 = tpu.matmul %22, %25, %cst_18 {dimension_numbers = #tpu.dot_dimension_numbers<[1], [0], [0], [1], [0, 0, 1, 1], [], []>} : vector<4x12xbf16>, vector<12x128xbf16>, vector<4x128xf32> -> vector<4x128xf32>
    %27 = vector.extract_strided_slice %0 {offsets = [0, 2], sizes = [4, 1], strides = [1, 1]} : vector<16x16xf32> to vector<4x1xf32>
    %28 = vector.broadcast %27 : vector<4x1xf32> to vector<4x128xf32>
    %29 = arith.addf %26, %28 : vector<4x128xf32>
    %30 = arith.addf %20, %29 : vector<4x128xf32>
    %31 = arith.addf %20, %30 : vector<4x128xf32>
    %32 = arith.addf %29, %31 : vector<4x128xf32>
    %33 = arith.addf %30, %32 : vector<4x128xf32>
    %c32 = arith.constant 32 : index
    %c0_19 = arith.constant 0 : index
    %34 = vector.load %arg2[%c32, %c0_19] : memref<664x72xf32, #tpu.memory_space<vmem>>, vector<8x12xf32>
    %35 = arith.truncf %34 : vector<8x12xf32> to vector<8x12xbf16>
    %cst_20 = arith.constant 0.000000e+00 : f32
    %36 = vector.broadcast %cst_20 : f32 to vector<12x128xf32>
    %37 = arith.maximumf %11, %36 : vector<12x128xf32>
    %38 = arith.truncf %37 : vector<12x128xf32> to vector<12x128xbf16>
    %cst_21 = arith.constant dense<0.000000e+00> : vector<8x128xf32>
    %39 = tpu.matmul %35, %38, %cst_21 {dimension_numbers = #tpu.dot_dimension_numbers<[1], [0], [0], [1], [0, 0, 1, 1], [], []>} : vector<8x12xbf16>, vector<12x128xbf16>, vector<8x128xf32> -> vector<8x128xf32>
    %40 = vector.extract_strided_slice %0 {offsets = [0, 3], sizes = [8, 1], strides = [1, 1]} : vector<16x16xf32> to vector<8x1xf32>
    %41 = vector.broadcast %40 : vector<8x1xf32> to vector<8x128xf32>
    %42 = arith.addf %39, %41 : vector<8x128xf32>
    %c40 = arith.constant 40 : index
    %c0_22 = arith.constant 0 : index
    %43 = vector.load %arg2[%c40, %c0_22] : memref<664x72xf32, #tpu.memory_space<vmem>>, vector<8x4xf32>
    %44 = arith.truncf %43 : vector<8x4xf32> to vector<8x4xbf16>
    %cst_23 = arith.constant 0.000000e+00 : f32
    %45 = vector.broadcast %cst_23 : f32 to vector<4x128xf32>
    %46 = arith.maximumf %30, %45 : vector<4x128xf32>
    %47 = arith.truncf %46 : vector<4x128xf32> to vector<4x128xbf16>
    %cst_24 = arith.constant dense<0.000000e+00> : vector<8x128xf32>
    %48 = tpu.matmul %44, %47, %cst_24 {dimension_numbers = #tpu.dot_dimension_numbers<[1], [0], [0], [1], [0, 0, 1, 1], [], []>} : vector<8x4xbf16>, vector<4x128xbf16>, vector<8x128xf32> -> vector<8x128xf32>
    %c48 = arith.constant 48 : index
    %c0_25 = arith.constant 0 : index
    %49 = vector.load %arg2[%c48, %c0_25] : memref<664x72xf32, #tpu.memory_space<vmem>>, vector<8x4xf32>
    %50 = arith.truncf %49 : vector<8x4xf32> to vector<8x4xbf16>
    %cst_26 = arith.constant 0.000000e+00 : f32
    %51 = vector.broadcast %cst_26 : f32 to vector<4x128xf32>
    %52 = arith.maximumf %31, %51 : vector<4x128xf32>
    %53 = arith.truncf %52 : vector<4x128xf32> to vector<4x128xbf16>
    %cst_27 = arith.constant dense<0.000000e+00> : vector<8x128xf32>
    %54 = tpu.matmul %50, %53, %cst_27 {dimension_numbers = #tpu.dot_dimension_numbers<[1], [0], [0], [1], [0, 0, 1, 1], [], []>} : vector<8x4xbf16>, vector<4x128xbf16>, vector<8x128xf32> -> vector<8x128xf32>
    %55 = arith.addf %48, %54 : vector<8x128xf32>
    %c56 = arith.constant 56 : index
    %c0_28 = arith.constant 0 : index
    %56 = vector.load %arg2[%c56, %c0_28] : memref<664x72xf32, #tpu.memory_space<vmem>>, vector<8x4xf32>
    %57 = arith.truncf %56 : vector<8x4xf32> to vector<8x4xbf16>
    %cst_29 = arith.constant 0.000000e+00 : f32
    %58 = vector.broadcast %cst_29 : f32 to vector<4x128xf32>
    %59 = arith.maximumf %32, %58 : vector<4x128xf32>
    %60 = arith.truncf %59 : vector<4x128xf32> to vector<4x128xbf16>
    %cst_30 = arith.constant dense<0.000000e+00> : vector<8x128xf32>
    %61 = tpu.matmul %57, %60, %cst_30 {dimension_numbers = #tpu.dot_dimension_numbers<[1], [0], [0], [1], [0, 0, 1, 1], [], []>} : vector<8x4xbf16>, vector<4x128xbf16>, vector<8x128xf32> -> vector<8x128xf32>
    %62 = arith.addf %55, %61 : vector<8x128xf32>
    %c64 = arith.constant 64 : index
    %c0_31 = arith.constant 0 : index
    %63 = vector.load %arg2[%c64, %c0_31] : memref<664x72xf32, #tpu.memory_space<vmem>>, vector<8x4xf32>
    %64 = arith.truncf %63 : vector<8x4xf32> to vector<8x4xbf16>
    %cst_32 = arith.constant 0.000000e+00 : f32
    %65 = vector.broadcast %cst_32 : f32 to vector<4x128xf32>
    %66 = arith.maximumf %33, %65 : vector<4x128xf32>
    %67 = arith.truncf %66 : vector<4x128xf32> to vector<4x128xbf16>
    %cst_33 = arith.constant dense<0.000000e+00> : vector<8x128xf32>
    %68 = tpu.matmul %64, %67, %cst_33 {dimension_numbers = #tpu.dot_dimension_numbers<[1], [0], [0], [1], [0, 0, 1, 1], [], []>} : vector<8x4xbf16>, vector<4x128xbf16>, vector<8x128xf32> -> vector<8x128xf32>
    %69 = arith.addf %62, %68 : vector<8x128xf32>
    %70 = vector.extract_strided_slice %0 {offsets = [0, 4], sizes = [8, 1], strides = [1, 1]} : vector<16x16xf32> to vector<8x1xf32>
    %71 = vector.broadcast %70 : vector<8x1xf32> to vector<8x128xf32>
    %72 = arith.addf %69, %71 : vector<8x128xf32>
    %cst_34 = arith.constant 0.000000e+00 : f32
    %73 = vector.broadcast %cst_34 : f32 to vector<8x128xf32>
    %74 = arith.maximumf %42, %73 : vector<8x128xf32>
    %75 = arith.truncf %74 : vector<8x128xf32> to vector<8x128xbf16>
    %cst_35 = arith.constant dense<0.000000e+00> : vector<8x32xf32>
    %76 = tpu.matmul %75, %1, %cst_35 {dimension_numbers = #tpu.dot_dimension_numbers<[1], [0], [0], [1], [0, 0, 1, 1], [], []>} : vector<8x128xbf16>, vector<128x32xbf16>, vector<8x32xf32> -> vector<8x32xf32>
    %cst_36 = arith.constant dense<0.000000e+00> : vector<8x32xf32>
    %77 = tpu.matmul %75, %2, %cst_36 {dimension_numbers = #tpu.dot_dimension_numbers<[1], [0], [0], [1], [0, 0, 1, 1], [], []>} : vector<8x128xbf16>, vector<128x32xbf16>, vector<8x32xf32> -> vector<8x32xf32>
    %c72 = arith.constant 72 : index
    %c0_37 = arith.constant 0 : index
    %78 = vector.load %arg2[%c72, %c0_37] : memref<664x72xf32, #tpu.memory_space<vmem>>, vector<8x8xf32>
    %79 = arith.truncf %78 : vector<8x8xf32> to vector<8x8xbf16>
    %80 = arith.truncf %76 : vector<8x32xf32> to vector<8x32xbf16>
    %cst_38 = arith.constant dense<0.000000e+00> : vector<8x32xf32>
    %81 = tpu.matmul %79, %80, %cst_38 {dimension_numbers = #tpu.dot_dimension_numbers<[1], [0], [0], [1], [0, 0, 1, 1], [], []>} : vector<8x8xbf16>, vector<8x32xbf16>, vector<8x32xf32> -> vector<8x32xf32>
    %c80 = arith.constant 80 : index
    %c0_39 = arith.constant 0 : index
    %82 = vector.load %arg2[%c80, %c0_39] : memref<664x72xf32, #tpu.memory_space<vmem>>, vector<8x8xf32>
    %83 = arith.truncf %82 : vector<8x8xf32> to vector<8x8xbf16>
    %84 = arith.truncf %77 : vector<8x32xf32> to vector<8x32xbf16>
    %cst_40 = arith.constant dense<0.000000e+00> : vector<8x32xf32>
    %85 = tpu.matmul %83, %84, %cst_40 {dimension_numbers = #tpu.dot_dimension_numbers<[1], [0], [0], [1], [0, 0, 1, 1], [], []>} : vector<8x8xbf16>, vector<8x32xbf16>, vector<8x32xf32> -> vector<8x32xf32>
    %86 = arith.addf %81, %85 : vector<8x32xf32>
    %87 = vector.extract_strided_slice %0 {offsets = [0, 5], sizes = [8, 1], strides = [1, 1]} : vector<16x16xf32> to vector<8x1xf32>
    %88 = vector.broadcast %87 : vector<8x1xf32> to vector<8x32xf32>
    %89 = arith.addf %86, %88 : vector<8x32xf32>
    %cst_41 = arith.constant 0.000000e+00 : f32
    %90 = vector.broadcast %cst_41 : f32 to vector<8x128xf32>
    %91 = arith.maximumf %72, %90 : vector<8x128xf32>
    %92 = arith.truncf %91 : vector<8x128xf32> to vector<8x128xbf16>
    %cst_42 = arith.constant dense<0.000000e+00> : vector<8x32xf32>
    %93 = tpu.matmul %92, %1, %cst_42 {dimension_numbers = #tpu.dot_dimension_numbers<[1], [0], [0], [1], [0, 0, 1, 1], [], []>} : vector<8x128xbf16>, vector<128x32xbf16>, vector<8x32xf32> -> vector<8x32xf32>
    %cst_43 = arith.constant dense<0.000000e+00> : vector<8x32xf32>
    %94 = tpu.matmul %92, %2, %cst_43 {dimension_numbers = #tpu.dot_dimension_numbers<[1], [0], [0], [1], [0, 0, 1, 1], [], []>} : vector<8x128xbf16>, vector<128x32xbf16>, vector<8x32xf32> -> vector<8x32xf32>
    %c88 = arith.constant 88 : index
    %c0_44 = arith.constant 0 : index
    %95 = vector.load %arg2[%c88, %c0_44] : memref<664x72xf32, #tpu.memory_space<vmem>>, vector<8x8xf32>
    %96 = arith.truncf %95 : vector<8x8xf32> to vector<8x8xbf16>
    %97 = arith.truncf %93 : vector<8x32xf32> to vector<8x32xbf16>
    %cst_45 = arith.constant dense<0.000000e+00> : vector<8x32xf32>
    %98 = tpu.matmul %96, %97, %cst_45 {dimension_numbers = #tpu.dot_dimension_numbers<[1], [0], [0], [1], [0, 0, 1, 1], [], []>} : vector<8x8xbf16>, vector<8x32xbf16>, vector<8x32xf32> -> vector<8x32xf32>
    %c96 = arith.constant 96 : index
    %c0_46 = arith.constant 0 : index
    %99 = vector.load %arg2[%c96, %c0_46] : memref<664x72xf32, #tpu.memory_space<vmem>>, vector<8x8xf32>
    %100 = arith.truncf %99 : vector<8x8xf32> to vector<8x8xbf16>
    %101 = arith.truncf %94 : vector<8x32xf32> to vector<8x32xbf16>
    %cst_47 = arith.constant dense<0.000000e+00> : vector<8x32xf32>
    %102 = tpu.matmul %100, %101, %cst_47 {dimension_numbers = #tpu.dot_dimension_numbers<[1], [0], [0], [1], [0, 0, 1, 1], [], []>} : vector<8x8xbf16>, vector<8x32xbf16>, vector<8x32xf32> -> vector<8x32xf32>
    %103 = arith.addf %98, %102 : vector<8x32xf32>
    %104 = vector.extract_strided_slice %0 {offsets = [0, 6], sizes = [8, 1], strides = [1, 1]} : vector<16x16xf32> to vector<8x1xf32>
    %105 = vector.broadcast %104 : vector<8x1xf32> to vector<8x32xf32>
    %106 = arith.addf %103, %105 : vector<8x32xf32>
    %107 = arith.addf %89, %106 : vector<8x32xf32>
    %cst_48 = arith.constant 0.000000e+00 : f32
    %108 = vector.broadcast %cst_48 : f32 to vector<8x128xf32>
    %109 = arith.maximumf %42, %108 : vector<8x128xf32>
    %110 = arith.truncf %109 : vector<8x128xf32> to vector<8x128xbf16>
    %cst_49 = arith.constant dense<0.000000e+00> : vector<8x32xf32>
    %111 = tpu.matmul %110, %1, %cst_49 {dimension_numbers = #tpu.dot_dimension_numbers<[1], [0], [0], [1], [0, 0, 1, 1], [], []>} : vector<8x128xbf16>, vector<128x32xbf16>, vector<8x32xf32> -> vector<8x32xf32>
    %cst_50 = arith.constant dense<0.000000e+00> : vector<8x32xf32>
    %112 = tpu.matmul %110, %2, %cst_50 {dimension_numbers = #tpu.dot_dimension_numbers<[1], [0], [0], [1], [0, 0, 1, 1], [], []>} : vector<8x128xbf16>, vector<128x32xbf16>, vector<8x32xf32> -> vector<8x32xf32>
    %c104 = arith.constant 104 : index
    %c0_51 = arith.constant 0 : index
    %113 = vector.load %arg2[%c104, %c0_51] : memref<664x72xf32, #tpu.memory_space<vmem>>, vector<8x8xf32>
    %114 = arith.truncf %113 : vector<8x8xf32> to vector<8x8xbf16>
    %115 = arith.truncf %111 : vector<8x32xf32> to vector<8x32xbf16>
    %cst_52 = arith.constant dense<0.000000e+00> : vector<8x32xf32>
    %116 = tpu.matmul %114, %115, %cst_52 {dimension_numbers = #tpu.dot_dimension_numbers<[1], [0], [0], [1], [0, 0, 1, 1], [], []>} : vector<8x8xbf16>, vector<8x32xbf16>, vector<8x32xf32> -> vector<8x32xf32>
    %c112 = arith.constant 112 : index
    %c0_53 = arith.constant 0 : index
    %117 = vector.load %arg2[%c112, %c0_53] : memref<664x72xf32, #tpu.memory_space<vmem>>, vector<8x8xf32>
    %118 = arith.truncf %117 : vector<8x8xf32> to vector<8x8xbf16>
    %119 = arith.truncf %112 : vector<8x32xf32> to vector<8x32xbf16>
    %cst_54 = arith.constant dense<0.000000e+00> : vector<8x32xf32>
    %120 = tpu.matmul %118, %119, %cst_54 {dimension_numbers = #tpu.dot_dimension_numbers<[1], [0], [0], [1], [0, 0, 1, 1], [], []>} : vector<8x8xbf16>, vector<8x32xbf16>, vector<8x32xf32> -> vector<8x32xf32>
    %121 = arith.addf %116, %120 : vector<8x32xf32>
    %122 = vector.extract_strided_slice %0 {offsets = [0, 7], sizes = [8, 1], strides = [1, 1]} : vector<16x16xf32> to vector<8x1xf32>
    %123 = vector.broadcast %122 : vector<8x1xf32> to vector<8x32xf32>
    %124 = arith.addf %121, %123 : vector<8x32xf32>
    %125 = arith.addf %107, %124 : vector<8x32xf32>
    %126 = arith.addf %107, %125 : vector<8x32xf32>
    %127 = arith.addf %125, %126 : vector<8x32xf32>
    %cst_55 = arith.constant 0.000000e+00 : f32
    %128 = vector.broadcast %cst_55 : f32 to vector<4x128xf32>
    %129 = arith.maximumf %30, %128 : vector<4x128xf32>
    %130 = arith.truncf %129 : vector<4x128xf32> to vector<4x128xbf16>
    %cst_56 = arith.constant dense<0.000000e+00> : vector<4x32xf32>
    %131 = tpu.matmul %130, %1, %cst_56 {dimension_numbers = #tpu.dot_dimension_numbers<[1], [0], [0], [1], [0, 0, 1, 1], [], []>} : vector<4x128xbf16>, vector<128x32xbf16>, vector<4x32xf32> -> vector<4x32xf32>
    %cst_57 = arith.constant dense<0.000000e+00> : vector<4x32xf32>
    %132 = tpu.matmul %130, %2, %cst_57 {dimension_numbers = #tpu.dot_dimension_numbers<[1], [0], [0], [1], [0, 0, 1, 1], [], []>} : vector<4x128xbf16>, vector<128x32xbf16>, vector<4x32xf32> -> vector<4x32xf32>
    %c120 = arith.constant 120 : index
    %c0_58 = arith.constant 0 : index
    %133 = vector.load %arg2[%c120, %c0_58] : memref<664x72xf32, #tpu.memory_space<vmem>>, vector<16x4xf32>
    %134 = arith.truncf %133 : vector<16x4xf32> to vector<16x4xbf16>
    %135 = arith.truncf %131 : vector<4x32xf32> to vector<4x32xbf16>
    %cst_59 = arith.constant dense<0.000000e+00> : vector<16x32xf32>
    %136 = tpu.matmul %134, %135, %cst_59 {dimension_numbers = #tpu.dot_dimension_numbers<[1], [0], [0], [1], [0, 0, 1, 1], [], []>} : vector<16x4xbf16>, vector<4x32xbf16>, vector<16x32xf32> -> vector<16x32xf32>
    %c136 = arith.constant 136 : index
    %c0_60 = arith.constant 0 : index
    %137 = vector.load %arg2[%c136, %c0_60] : memref<664x72xf32, #tpu.memory_space<vmem>>, vector<16x4xf32>
    %138 = arith.truncf %137 : vector<16x4xf32> to vector<16x4xbf16>
    %139 = arith.truncf %132 : vector<4x32xf32> to vector<4x32xbf16>
    %cst_61 = arith.constant dense<0.000000e+00> : vector<16x32xf32>
    %140 = tpu.matmul %138, %139, %cst_61 {dimension_numbers = #tpu.dot_dimension_numbers<[1], [0], [0], [1], [0, 0, 1, 1], [], []>} : vector<16x4xbf16>, vector<4x32xbf16>, vector<16x32xf32> -> vector<16x32xf32>
    %141 = arith.addf %136, %140 : vector<16x32xf32>
    %cst_62 = arith.constant 0.000000e+00 : f32
    %142 = vector.broadcast %cst_62 : f32 to vector<4x128xf32>
    %143 = arith.maximumf %31, %142 : vector<4x128xf32>
    %144 = arith.truncf %143 : vector<4x128xf32> to vector<4x128xbf16>
    %cst_63 = arith.constant dense<0.000000e+00> : vector<4x32xf32>
    %145 = tpu.matmul %144, %1, %cst_63 {dimension_numbers = #tpu.dot_dimension_numbers<[1], [0], [0], [1], [0, 0, 1, 1], [], []>} : vector<4x128xbf16>, vector<128x32xbf16>, vector<4x32xf32> -> vector<4x32xf32>
    %cst_64 = arith.constant dense<0.000000e+00> : vector<4x32xf32>
    %146 = tpu.matmul %144, %2, %cst_64 {dimension_numbers = #tpu.dot_dimension_numbers<[1], [0], [0], [1], [0, 0, 1, 1], [], []>} : vector<4x128xbf16>, vector<128x32xbf16>, vector<4x32xf32> -> vector<4x32xf32>
    %c152 = arith.constant 152 : index
    %c0_65 = arith.constant 0 : index
    %147 = vector.load %arg2[%c152, %c0_65] : memref<664x72xf32, #tpu.memory_space<vmem>>, vector<16x4xf32>
    %148 = arith.truncf %147 : vector<16x4xf32> to vector<16x4xbf16>
    %149 = arith.truncf %145 : vector<4x32xf32> to vector<4x32xbf16>
    %cst_66 = arith.constant dense<0.000000e+00> : vector<16x32xf32>
    %150 = tpu.matmul %148, %149, %cst_66 {dimension_numbers = #tpu.dot_dimension_numbers<[1], [0], [0], [1], [0, 0, 1, 1], [], []>} : vector<16x4xbf16>, vector<4x32xbf16>, vector<16x32xf32> -> vector<16x32xf32>
    %c168 = arith.constant 168 : index
    %c0_67 = arith.constant 0 : index
    %151 = vector.load %arg2[%c168, %c0_67] : memref<664x72xf32, #tpu.memory_space<vmem>>, vector<16x4xf32>
    %152 = arith.truncf %151 : vector<16x4xf32> to vector<16x4xbf16>
    %153 = arith.truncf %146 : vector<4x32xf32> to vector<4x32xbf16>
    %cst_68 = arith.constant dense<0.000000e+00> : vector<16x32xf32>
    %154 = tpu.matmul %152, %153, %cst_68 {dimension_numbers = #tpu.dot_dimension_numbers<[1], [0], [0], [1], [0, 0, 1, 1], [], []>} : vector<16x4xbf16>, vector<4x32xbf16>, vector<16x32xf32> -> vector<16x32xf32>
    %155 = arith.addf %150, %154 : vector<16x32xf32>
    %156 = arith.addf %141, %155 : vector<16x32xf32>
    %cst_69 = arith.constant 0.000000e+00 : f32
    %157 = vector.broadcast %cst_69 : f32 to vector<4x128xf32>
    %158 = arith.maximumf %32, %157 : vector<4x128xf32>
    %159 = arith.truncf %158 : vector<4x128xf32> to vector<4x128xbf16>
    %cst_70 = arith.constant dense<0.000000e+00> : vector<4x32xf32>
    %160 = tpu.matmul %159, %1, %cst_70 {dimension_numbers = #tpu.dot_dimension_numbers<[1], [0], [0], [1], [0, 0, 1, 1], [], []>} : vector<4x128xbf16>, vector<128x32xbf16>, vector<4x32xf32> -> vector<4x32xf32>
    %cst_71 = arith.constant dense<0.000000e+00> : vector<4x32xf32>
    %161 = tpu.matmul %159, %2, %cst_71 {dimension_numbers = #tpu.dot_dimension_numbers<[1], [0], [0], [1], [0, 0, 1, 1], [], []>} : vector<4x128xbf16>, vector<128x32xbf16>, vector<4x32xf32> -> vector<4x32xf32>
    %c184 = arith.constant 184 : index
    %c0_72 = arith.constant 0 : index
    %162 = vector.load %arg2[%c184, %c0_72] : memref<664x72xf32, #tpu.memory_space<vmem>>, vector<16x4xf32>
    %163 = arith.truncf %162 : vector<16x4xf32> to vector<16x4xbf16>
    %164 = arith.truncf %160 : vector<4x32xf32> to vector<4x32xbf16>
    %cst_73 = arith.constant dense<0.000000e+00> : vector<16x32xf32>
    %165 = tpu.matmul %163, %164, %cst_73 {dimension_numbers = #tpu.dot_dimension_numbers<[1], [0], [0], [1], [0, 0, 1, 1], [], []>} : vector<16x4xbf16>, vector<4x32xbf16>, vector<16x32xf32> -> vector<16x32xf32>
    %c200 = arith.constant 200 : index
    %c0_74 = arith.constant 0 : index
    %166 = vector.load %arg2[%c200, %c0_74] : memref<664x72xf32, #tpu.memory_space<vmem>>, vector<16x4xf32>
    %167 = arith.truncf %166 : vector<16x4xf32> to vector<16x4xbf16>
    %168 = arith.truncf %161 : vector<4x32xf32> to vector<4x32xbf16>
    %cst_75 = arith.constant dense<0.000000e+00> : vector<16x32xf32>
    %169 = tpu.matmul %167, %168, %cst_75 {dimension_numbers = #tpu.dot_dimension_numbers<[1], [0], [0], [1], [0, 0, 1, 1], [], []>} : vector<16x4xbf16>, vector<4x32xbf16>, vector<16x32xf32> -> vector<16x32xf32>
    %170 = arith.addf %165, %169 : vector<16x32xf32>
    %171 = arith.addf %156, %170 : vector<16x32xf32>
    %cst_76 = arith.constant 0.000000e+00 : f32
    %172 = vector.broadcast %cst_76 : f32 to vector<4x128xf32>
    %173 = arith.maximumf %33, %172 : vector<4x128xf32>
    %174 = arith.truncf %173 : vector<4x128xf32> to vector<4x128xbf16>
    %cst_77 = arith.constant dense<0.000000e+00> : vector<4x32xf32>
    %175 = tpu.matmul %174, %1, %cst_77 {dimension_numbers = #tpu.dot_dimension_numbers<[1], [0], [0], [1], [0, 0, 1, 1], [], []>} : vector<4x128xbf16>, vector<128x32xbf16>, vector<4x32xf32> -> vector<4x32xf32>
    %cst_78 = arith.constant dense<0.000000e+00> : vector<4x32xf32>
    %176 = tpu.matmul %174, %2, %cst_78 {dimension_numbers = #tpu.dot_dimension_numbers<[1], [0], [0], [1], [0, 0, 1, 1], [], []>} : vector<4x128xbf16>, vector<128x32xbf16>, vector<4x32xf32> -> vector<4x32xf32>
    %c216 = arith.constant 216 : index
    %c0_79 = arith.constant 0 : index
    %177 = vector.load %arg2[%c216, %c0_79] : memref<664x72xf32, #tpu.memory_space<vmem>>, vector<16x4xf32>
    %178 = arith.truncf %177 : vector<16x4xf32> to vector<16x4xbf16>
    %179 = arith.truncf %175 : vector<4x32xf32> to vector<4x32xbf16>
    %cst_80 = arith.constant dense<0.000000e+00> : vector<16x32xf32>
    %180 = tpu.matmul %178, %179, %cst_80 {dimension_numbers = #tpu.dot_dimension_numbers<[1], [0], [0], [1], [0, 0, 1, 1], [], []>} : vector<16x4xbf16>, vector<4x32xbf16>, vector<16x32xf32> -> vector<16x32xf32>
    %c232 = arith.constant 232 : index
    %c0_81 = arith.constant 0 : index
    %181 = vector.load %arg2[%c232, %c0_81] : memref<664x72xf32, #tpu.memory_space<vmem>>, vector<16x4xf32>
    %182 = arith.truncf %181 : vector<16x4xf32> to vector<16x4xbf16>
    %183 = arith.truncf %176 : vector<4x32xf32> to vector<4x32xbf16>
    %cst_82 = arith.constant dense<0.000000e+00> : vector<16x32xf32>
    %184 = tpu.matmul %182, %183, %cst_82 {dimension_numbers = #tpu.dot_dimension_numbers<[1], [0], [0], [1], [0, 0, 1, 1], [], []>} : vector<16x4xbf16>, vector<4x32xbf16>, vector<16x32xf32> -> vector<16x32xf32>
    %185 = arith.addf %180, %184 : vector<16x32xf32>
    %186 = arith.addf %171, %185 : vector<16x32xf32>
    %187 = vector.extract_strided_slice %0 {offsets = [0, 8], sizes = [16, 1], strides = [1, 1]} : vector<16x16xf32> to vector<16x1xf32>
    %188 = vector.broadcast %187 : vector<16x1xf32> to vector<16x32xf32>
    %189 = arith.addf %186, %188 : vector<16x32xf32>
    %c248 = arith.constant 248 : index
    %c0_83 = arith.constant 0 : index
    %190 = vector.load %arg2[%c248, %c0_83] : memref<664x72xf32, #tpu.memory_space<vmem>>, vector<16x8xf32>
    %191 = arith.truncf %190 : vector<16x8xf32> to vector<16x8xbf16>
    %cst_84 = arith.constant 0.000000e+00 : f32
    %192 = vector.broadcast %cst_84 : f32 to vector<8x32xf32>
    %193 = arith.maximumf %107, %192 : vector<8x32xf32>
    %194 = arith.truncf %193 : vector<8x32xf32> to vector<8x32xbf16>
    %cst_85 = arith.constant dense<0.000000e+00> : vector<16x32xf32>
    %195 = tpu.matmul %191, %194, %cst_85 {dimension_numbers = #tpu.dot_dimension_numbers<[1], [0], [0], [1], [0, 0, 1, 1], [], []>} : vector<16x8xbf16>, vector<8x32xbf16>, vector<16x32xf32> -> vector<16x32xf32>
    %c264 = arith.constant 264 : index
    %c0_86 = arith.constant 0 : index
    %196 = vector.load %arg2[%c264, %c0_86] : memref<664x72xf32, #tpu.memory_space<vmem>>, vector<16x8xf32>
    %197 = arith.truncf %196 : vector<16x8xf32> to vector<16x8xbf16>
    %cst_87 = arith.constant 0.000000e+00 : f32
    %198 = vector.broadcast %cst_87 : f32 to vector<8x32xf32>
    %199 = arith.maximumf %125, %198 : vector<8x32xf32>
    %200 = arith.truncf %199 : vector<8x32xf32> to vector<8x32xbf16>
    %cst_88 = arith.constant dense<0.000000e+00> : vector<16x32xf32>
    %201 = tpu.matmul %197, %200, %cst_88 {dimension_numbers = #tpu.dot_dimension_numbers<[1], [0], [0], [1], [0, 0, 1, 1], [], []>} : vector<16x8xbf16>, vector<8x32xbf16>, vector<16x32xf32> -> vector<16x32xf32>
    %202 = arith.addf %195, %201 : vector<16x32xf32>
    %c280 = arith.constant 280 : index
    %c0_89 = arith.constant 0 : index
    %203 = vector.load %arg2[%c280, %c0_89] : memref<664x72xf32, #tpu.memory_space<vmem>>, vector<16x8xf32>
    %204 = arith.truncf %203 : vector<16x8xf32> to vector<16x8xbf16>
    %cst_90 = arith.constant 0.000000e+00 : f32
    %205 = vector.broadcast %cst_90 : f32 to vector<8x32xf32>
    %206 = arith.maximumf %126, %205 : vector<8x32xf32>
    %207 = arith.truncf %206 : vector<8x32xf32> to vector<8x32xbf16>
    %cst_91 = arith.constant dense<0.000000e+00> : vector<16x32xf32>
    %208 = tpu.matmul %204, %207, %cst_91 {dimension_numbers = #tpu.dot_dimension_numbers<[1], [0], [0], [1], [0, 0, 1, 1], [], []>} : vector<16x8xbf16>, vector<8x32xbf16>, vector<16x32xf32> -> vector<16x32xf32>
    %209 = arith.addf %202, %208 : vector<16x32xf32>
    %c296 = arith.constant 296 : index
    %c0_92 = arith.constant 0 : index
    %210 = vector.load %arg2[%c296, %c0_92] : memref<664x72xf32, #tpu.memory_space<vmem>>, vector<16x8xf32>
    %211 = arith.truncf %210 : vector<16x8xf32> to vector<16x8xbf16>
    %cst_93 = arith.constant 0.000000e+00 : f32
    %212 = vector.broadcast %cst_93 : f32 to vector<8x32xf32>
    %213 = arith.maximumf %127, %212 : vector<8x32xf32>
    %214 = arith.truncf %213 : vector<8x32xf32> to vector<8x32xbf16>
    %cst_94 = arith.constant dense<0.000000e+00> : vector<16x32xf32>
    %215 = tpu.matmul %211, %214, %cst_94 {dimension_numbers = #tpu.dot_dimension_numbers<[1], [0], [0], [1], [0, 0, 1, 1], [], []>} : vector<16x8xbf16>, vector<8x32xbf16>, vector<16x32xf32> -> vector<16x32xf32>
    %216 = arith.addf %209, %215 : vector<16x32xf32>
    %217 = vector.extract_strided_slice %0 {offsets = [0, 9], sizes = [16, 1], strides = [1, 1]} : vector<16x16xf32> to vector<16x1xf32>
    %218 = vector.broadcast %217 : vector<16x1xf32> to vector<16x32xf32>
    %219 = arith.addf %216, %218 : vector<16x32xf32>
    %cst_95 = arith.constant 0.000000e+00 : f32
    %220 = vector.broadcast %cst_95 : f32 to vector<16x32xf32>
    %221 = arith.maximumf %189, %220 : vector<16x32xf32>
    %222 = arith.truncf %221 : vector<16x32xf32> to vector<16x32xbf16>
    %cst_96 = arith.constant dense<0.000000e+00> : vector<16x8xf32>
    %223 = tpu.matmul %222, %3, %cst_96 {dimension_numbers = #tpu.dot_dimension_numbers<[1], [0], [0], [1], [0, 0, 1, 1], [], []>} : vector<16x32xbf16>, vector<32x8xbf16>, vector<16x8xf32> -> vector<16x8xf32>
    %cst_97 = arith.constant dense<0.000000e+00> : vector<16x8xf32>
    %224 = tpu.matmul %222, %4, %cst_97 {dimension_numbers = #tpu.dot_dimension_numbers<[1], [0], [0], [1], [0, 0, 1, 1], [], []>} : vector<16x32xbf16>, vector<32x8xbf16>, vector<16x8xf32> -> vector<16x8xf32>
    %c312 = arith.constant 312 : index
    %c0_98 = arith.constant 0 : index
    %225 = vector.load %arg2[%c312, %c0_98] : memref<664x72xf32, #tpu.memory_space<vmem>>, vector<16x16xf32>
    %226 = arith.truncf %225 : vector<16x16xf32> to vector<16x16xbf16>
    %227 = arith.truncf %223 : vector<16x8xf32> to vector<16x8xbf16>
    %cst_99 = arith.constant dense<0.000000e+00> : vector<16x8xf32>
    %228 = tpu.matmul %226, %227, %cst_99 {dimension_numbers = #tpu.dot_dimension_numbers<[1], [0], [0], [1], [0, 0, 1, 1], [], []>} : vector<16x16xbf16>, vector<16x8xbf16>, vector<16x8xf32> -> vector<16x8xf32>
    %c328 = arith.constant 328 : index
    %c0_100 = arith.constant 0 : index
    %229 = vector.load %arg2[%c328, %c0_100] : memref<664x72xf32, #tpu.memory_space<vmem>>, vector<16x16xf32>
    %230 = arith.truncf %229 : vector<16x16xf32> to vector<16x16xbf16>
    %231 = arith.truncf %224 : vector<16x8xf32> to vector<16x8xbf16>
    %cst_101 = arith.constant dense<0.000000e+00> : vector<16x8xf32>
    %232 = tpu.matmul %230, %231, %cst_101 {dimension_numbers = #tpu.dot_dimension_numbers<[1], [0], [0], [1], [0, 0, 1, 1], [], []>} : vector<16x16xbf16>, vector<16x8xbf16>, vector<16x8xf32> -> vector<16x8xf32>
    %233 = arith.addf %228, %232 : vector<16x8xf32>
    %234 = vector.extract_strided_slice %0 {offsets = [0, 10], sizes = [16, 1], strides = [1, 1]} : vector<16x16xf32> to vector<16x1xf32>
    %235 = vector.broadcast %234 : vector<16x1xf32> to vector<16x8xf32>
    %236 = arith.addf %233, %235 : vector<16x8xf32>
    %cst_102 = arith.constant 0.000000e+00 : f32
    %237 = vector.broadcast %cst_102 : f32 to vector<16x32xf32>
    %238 = arith.maximumf %219, %237 : vector<16x32xf32>
    %239 = arith.truncf %238 : vector<16x32xf32> to vector<16x32xbf16>
    %cst_103 = arith.constant dense<0.000000e+00> : vector<16x8xf32>
    %240 = tpu.matmul %239, %3, %cst_103 {dimension_numbers = #tpu.dot_dimension_numbers<[1], [0], [0], [1], [0, 0, 1, 1], [], []>} : vector<16x32xbf16>, vector<32x8xbf16>, vector<16x8xf32> -> vector<16x8xf32>
    %cst_104 = arith.constant dense<0.000000e+00> : vector<16x8xf32>
    %241 = tpu.matmul %239, %4, %cst_104 {dimension_numbers = #tpu.dot_dimension_numbers<[1], [0], [0], [1], [0, 0, 1, 1], [], []>} : vector<16x32xbf16>, vector<32x8xbf16>, vector<16x8xf32> -> vector<16x8xf32>
    %c344 = arith.constant 344 : index
    %c0_105 = arith.constant 0 : index
    %242 = vector.load %arg2[%c344, %c0_105] : memref<664x72xf32, #tpu.memory_space<vmem>>, vector<16x16xf32>
    %243 = arith.truncf %242 : vector<16x16xf32> to vector<16x16xbf16>
    %244 = arith.truncf %240 : vector<16x8xf32> to vector<16x8xbf16>
    %cst_106 = arith.constant dense<0.000000e+00> : vector<16x8xf32>
    %245 = tpu.matmul %243, %244, %cst_106 {dimension_numbers = #tpu.dot_dimension_numbers<[1], [0], [0], [1], [0, 0, 1, 1], [], []>} : vector<16x16xbf16>, vector<16x8xbf16>, vector<16x8xf32> -> vector<16x8xf32>
    %c360 = arith.constant 360 : index
    %c0_107 = arith.constant 0 : index
    %246 = vector.load %arg2[%c360, %c0_107] : memref<664x72xf32, #tpu.memory_space<vmem>>, vector<16x16xf32>
    %247 = arith.truncf %246 : vector<16x16xf32> to vector<16x16xbf16>
    %248 = arith.truncf %241 : vector<16x8xf32> to vector<16x8xbf16>
    %cst_108 = arith.constant dense<0.000000e+00> : vector<16x8xf32>
    %249 = tpu.matmul %247, %248, %cst_108 {dimension_numbers = #tpu.dot_dimension_numbers<[1], [0], [0], [1], [0, 0, 1, 1], [], []>} : vector<16x16xbf16>, vector<16x8xbf16>, vector<16x8xf32> -> vector<16x8xf32>
    %250 = arith.addf %245, %249 : vector<16x8xf32>
    %251 = vector.extract_strided_slice %0 {offsets = [0, 11], sizes = [16, 1], strides = [1, 1]} : vector<16x16xf32> to vector<16x1xf32>
    %252 = vector.broadcast %251 : vector<16x1xf32> to vector<16x8xf32>
    %253 = arith.addf %250, %252 : vector<16x8xf32>
    %254 = arith.addf %236, %253 : vector<16x8xf32>
    %cst_109 = arith.constant 0.000000e+00 : f32
    %255 = vector.broadcast %cst_109 : f32 to vector<16x32xf32>
    %256 = arith.maximumf %189, %255 : vector<16x32xf32>
    %257 = arith.truncf %256 : vector<16x32xf32> to vector<16x32xbf16>
    %cst_110 = arith.constant dense<0.000000e+00> : vector<16x8xf32>
    %258 = tpu.matmul %257, %3, %cst_110 {dimension_numbers = #tpu.dot_dimension_numbers<[1], [0], [0], [1], [0, 0, 1, 1], [], []>} : vector<16x32xbf16>, vector<32x8xbf16>, vector<16x8xf32> -> vector<16x8xf32>
    %cst_111 = arith.constant dense<0.000000e+00> : vector<16x8xf32>
    %259 = tpu.matmul %257, %4, %cst_111 {dimension_numbers = #tpu.dot_dimension_numbers<[1], [0], [0], [1], [0, 0, 1, 1], [], []>} : vector<16x32xbf16>, vector<32x8xbf16>, vector<16x8xf32> -> vector<16x8xf32>
    %c376 = arith.constant 376 : index
    %c0_112 = arith.constant 0 : index
    %260 = vector.load %arg2[%c376, %c0_112] : memref<664x72xf32, #tpu.memory_space<vmem>>, vector<16x16xf32>
    %261 = arith.truncf %260 : vector<16x16xf32> to vector<16x16xbf16>
    %262 = arith.truncf %258 : vector<16x8xf32> to vector<16x8xbf16>
    %cst_113 = arith.constant dense<0.000000e+00> : vector<16x8xf32>
    %263 = tpu.matmul %261, %262, %cst_113 {dimension_numbers = #tpu.dot_dimension_numbers<[1], [0], [0], [1], [0, 0, 1, 1], [], []>} : vector<16x16xbf16>, vector<16x8xbf16>, vector<16x8xf32> -> vector<16x8xf32>
    %c392 = arith.constant 392 : index
    %c0_114 = arith.constant 0 : index
    %264 = vector.load %arg2[%c392, %c0_114] : memref<664x72xf32, #tpu.memory_space<vmem>>, vector<16x16xf32>
    %265 = arith.truncf %264 : vector<16x16xf32> to vector<16x16xbf16>
    %266 = arith.truncf %259 : vector<16x8xf32> to vector<16x8xbf16>
    %cst_115 = arith.constant dense<0.000000e+00> : vector<16x8xf32>
    %267 = tpu.matmul %265, %266, %cst_115 {dimension_numbers = #tpu.dot_dimension_numbers<[1], [0], [0], [1], [0, 0, 1, 1], [], []>} : vector<16x16xbf16>, vector<16x8xbf16>, vector<16x8xf32> -> vector<16x8xf32>
    %268 = arith.addf %263, %267 : vector<16x8xf32>
    %269 = vector.extract_strided_slice %0 {offsets = [0, 12], sizes = [16, 1], strides = [1, 1]} : vector<16x16xf32> to vector<16x1xf32>
    %270 = vector.broadcast %269 : vector<16x1xf32> to vector<16x8xf32>
    %271 = arith.addf %268, %270 : vector<16x8xf32>
    %272 = arith.addf %254, %271 : vector<16x8xf32>
    %273 = arith.addf %254, %272 : vector<16x8xf32>
    %274 = arith.addf %272, %273 : vector<16x8xf32>
    %cst_116 = arith.constant 0.000000e+00 : f32
    %275 = vector.broadcast %cst_116 : f32 to vector<8x32xf32>
    %276 = arith.maximumf %107, %275 : vector<8x32xf32>
    %277 = arith.truncf %276 : vector<8x32xf32> to vector<8x32xbf16>
    %cst_117 = arith.constant dense<0.000000e+00> : vector<8x8xf32>
    %278 = tpu.matmul %277, %3, %cst_117 {dimension_numbers = #tpu.dot_dimension_numbers<[1], [0], [0], [1], [0, 0, 1, 1], [], []>} : vector<8x32xbf16>, vector<32x8xbf16>, vector<8x8xf32> -> vector<8x8xf32>
    %cst_118 = arith.constant dense<0.000000e+00> : vector<8x8xf32>
    %279 = tpu.matmul %277, %4, %cst_118 {dimension_numbers = #tpu.dot_dimension_numbers<[1], [0], [0], [1], [0, 0, 1, 1], [], []>} : vector<8x32xbf16>, vector<32x8xbf16>, vector<8x8xf32> -> vector<8x8xf32>
    %c408 = arith.constant 408 : index
    %c0_119 = arith.constant 0 : index
    %280 = vector.load %arg2[%c408, %c0_119] : memref<664x72xf32, #tpu.memory_space<vmem>>, vector<16x8xf32>
    %281 = arith.truncf %280 : vector<16x8xf32> to vector<16x8xbf16>
    %282 = arith.truncf %278 : vector<8x8xf32> to vector<8x8xbf16>
    %cst_120 = arith.constant dense<0.000000e+00> : vector<16x8xf32>
    %283 = tpu.matmul %281, %282, %cst_120 {dimension_numbers = #tpu.dot_dimension_numbers<[1], [0], [0], [1], [0, 0, 1, 1], [], []>} : vector<16x8xbf16>, vector<8x8xbf16>, vector<16x8xf32> -> vector<16x8xf32>
    %c424 = arith.constant 424 : index
    %c0_121 = arith.constant 0 : index
    %284 = vector.load %arg2[%c424, %c0_121] : memref<664x72xf32, #tpu.memory_space<vmem>>, vector<16x8xf32>
    %285 = arith.truncf %284 : vector<16x8xf32> to vector<16x8xbf16>
    %286 = arith.truncf %279 : vector<8x8xf32> to vector<8x8xbf16>
    %cst_122 = arith.constant dense<0.000000e+00> : vector<16x8xf32>
    %287 = tpu.matmul %285, %286, %cst_122 {dimension_numbers = #tpu.dot_dimension_numbers<[1], [0], [0], [1], [0, 0, 1, 1], [], []>} : vector<16x8xbf16>, vector<8x8xbf16>, vector<16x8xf32> -> vector<16x8xf32>
    %288 = arith.addf %283, %287 : vector<16x8xf32>
    %cst_123 = arith.constant 0.000000e+00 : f32
    %289 = vector.broadcast %cst_123 : f32 to vector<8x32xf32>
    %290 = arith.maximumf %125, %289 : vector<8x32xf32>
    %291 = arith.truncf %290 : vector<8x32xf32> to vector<8x32xbf16>
    %cst_124 = arith.constant dense<0.000000e+00> : vector<8x8xf32>
    %292 = tpu.matmul %291, %3, %cst_124 {dimension_numbers = #tpu.dot_dimension_numbers<[1], [0], [0], [1], [0, 0, 1, 1], [], []>} : vector<8x32xbf16>, vector<32x8xbf16>, vector<8x8xf32> -> vector<8x8xf32>
    %cst_125 = arith.constant dense<0.000000e+00> : vector<8x8xf32>
    %293 = tpu.matmul %291, %4, %cst_125 {dimension_numbers = #tpu.dot_dimension_numbers<[1], [0], [0], [1], [0, 0, 1, 1], [], []>} : vector<8x32xbf16>, vector<32x8xbf16>, vector<8x8xf32> -> vector<8x8xf32>
    %c440 = arith.constant 440 : index
    %c0_126 = arith.constant 0 : index
    %294 = vector.load %arg2[%c440, %c0_126] : memref<664x72xf32, #tpu.memory_space<vmem>>, vector<16x8xf32>
    %295 = arith.truncf %294 : vector<16x8xf32> to vector<16x8xbf16>
    %296 = arith.truncf %292 : vector<8x8xf32> to vector<8x8xbf16>
    %cst_127 = arith.constant dense<0.000000e+00> : vector<16x8xf32>
    %297 = tpu.matmul %295, %296, %cst_127 {dimension_numbers = #tpu.dot_dimension_numbers<[1], [0], [0], [1], [0, 0, 1, 1], [], []>} : vector<16x8xbf16>, vector<8x8xbf16>, vector<16x8xf32> -> vector<16x8xf32>
    %c456 = arith.constant 456 : index
    %c0_128 = arith.constant 0 : index
    %298 = vector.load %arg2[%c456, %c0_128] : memref<664x72xf32, #tpu.memory_space<vmem>>, vector<16x8xf32>
    %299 = arith.truncf %298 : vector<16x8xf32> to vector<16x8xbf16>
    %300 = arith.truncf %293 : vector<8x8xf32> to vector<8x8xbf16>
    %cst_129 = arith.constant dense<0.000000e+00> : vector<16x8xf32>
    %301 = tpu.matmul %299, %300, %cst_129 {dimension_numbers = #tpu.dot_dimension_numbers<[1], [0], [0], [1], [0, 0, 1, 1], [], []>} : vector<16x8xbf16>, vector<8x8xbf16>, vector<16x8xf32> -> vector<16x8xf32>
    %302 = arith.addf %297, %301 : vector<16x8xf32>
    %303 = arith.addf %288, %302 : vector<16x8xf32>
    %cst_130 = arith.constant 0.000000e+00 : f32
    %304 = vector.broadcast %cst_130 : f32 to vector<8x32xf32>
    %305 = arith.maximumf %126, %304 : vector<8x32xf32>
    %306 = arith.truncf %305 : vector<8x32xf32> to vector<8x32xbf16>
    %cst_131 = arith.constant dense<0.000000e+00> : vector<8x8xf32>
    %307 = tpu.matmul %306, %3, %cst_131 {dimension_numbers = #tpu.dot_dimension_numbers<[1], [0], [0], [1], [0, 0, 1, 1], [], []>} : vector<8x32xbf16>, vector<32x8xbf16>, vector<8x8xf32> -> vector<8x8xf32>
    %cst_132 = arith.constant dense<0.000000e+00> : vector<8x8xf32>
    %308 = tpu.matmul %306, %4, %cst_132 {dimension_numbers = #tpu.dot_dimension_numbers<[1], [0], [0], [1], [0, 0, 1, 1], [], []>} : vector<8x32xbf16>, vector<32x8xbf16>, vector<8x8xf32> -> vector<8x8xf32>
    %c472 = arith.constant 472 : index
    %c0_133 = arith.constant 0 : index
    %309 = vector.load %arg2[%c472, %c0_133] : memref<664x72xf32, #tpu.memory_space<vmem>>, vector<16x8xf32>
    %310 = arith.truncf %309 : vector<16x8xf32> to vector<16x8xbf16>
    %311 = arith.truncf %307 : vector<8x8xf32> to vector<8x8xbf16>
    %cst_134 = arith.constant dense<0.000000e+00> : vector<16x8xf32>
    %312 = tpu.matmul %310, %311, %cst_134 {dimension_numbers = #tpu.dot_dimension_numbers<[1], [0], [0], [1], [0, 0, 1, 1], [], []>} : vector<16x8xbf16>, vector<8x8xbf16>, vector<16x8xf32> -> vector<16x8xf32>
    %c488 = arith.constant 488 : index
    %c0_135 = arith.constant 0 : index
    %313 = vector.load %arg2[%c488, %c0_135] : memref<664x72xf32, #tpu.memory_space<vmem>>, vector<16x8xf32>
    %314 = arith.truncf %313 : vector<16x8xf32> to vector<16x8xbf16>
    %315 = arith.truncf %308 : vector<8x8xf32> to vector<8x8xbf16>
    %cst_136 = arith.constant dense<0.000000e+00> : vector<16x8xf32>
    %316 = tpu.matmul %314, %315, %cst_136 {dimension_numbers = #tpu.dot_dimension_numbers<[1], [0], [0], [1], [0, 0, 1, 1], [], []>} : vector<16x8xbf16>, vector<8x8xbf16>, vector<16x8xf32> -> vector<16x8xf32>
    %317 = arith.addf %312, %316 : vector<16x8xf32>
    %318 = arith.addf %303, %317 : vector<16x8xf32>
    %cst_137 = arith.constant 0.000000e+00 : f32
    %319 = vector.broadcast %cst_137 : f32 to vector<8x32xf32>
    %320 = arith.maximumf %127, %319 : vector<8x32xf32>
    %321 = arith.truncf %320 : vector<8x32xf32> to vector<8x32xbf16>
    %cst_138 = arith.constant dense<0.000000e+00> : vector<8x8xf32>
    %322 = tpu.matmul %321, %3, %cst_138 {dimension_numbers = #tpu.dot_dimension_numbers<[1], [0], [0], [1], [0, 0, 1, 1], [], []>} : vector<8x32xbf16>, vector<32x8xbf16>, vector<8x8xf32> -> vector<8x8xf32>
    %cst_139 = arith.constant dense<0.000000e+00> : vector<8x8xf32>
    %323 = tpu.matmul %321, %4, %cst_139 {dimension_numbers = #tpu.dot_dimension_numbers<[1], [0], [0], [1], [0, 0, 1, 1], [], []>} : vector<8x32xbf16>, vector<32x8xbf16>, vector<8x8xf32> -> vector<8x8xf32>
    %c504 = arith.constant 504 : index
    %c0_140 = arith.constant 0 : index
    %324 = vector.load %arg2[%c504, %c0_140] : memref<664x72xf32, #tpu.memory_space<vmem>>, vector<16x8xf32>
    %325 = arith.truncf %324 : vector<16x8xf32> to vector<16x8xbf16>
    %326 = arith.truncf %322 : vector<8x8xf32> to vector<8x8xbf16>
    %cst_141 = arith.constant dense<0.000000e+00> : vector<16x8xf32>
    %327 = tpu.matmul %325, %326, %cst_141 {dimension_numbers = #tpu.dot_dimension_numbers<[1], [0], [0], [1], [0, 0, 1, 1], [], []>} : vector<16x8xbf16>, vector<8x8xbf16>, vector<16x8xf32> -> vector<16x8xf32>
    %c520 = arith.constant 520 : index
    %c0_142 = arith.constant 0 : index
    %328 = vector.load %arg2[%c520, %c0_142] : memref<664x72xf32, #tpu.memory_space<vmem>>, vector<16x8xf32>
    %329 = arith.truncf %328 : vector<16x8xf32> to vector<16x8xbf16>
    %330 = arith.truncf %323 : vector<8x8xf32> to vector<8x8xbf16>
    %cst_143 = arith.constant dense<0.000000e+00> : vector<16x8xf32>
    %331 = tpu.matmul %329, %330, %cst_143 {dimension_numbers = #tpu.dot_dimension_numbers<[1], [0], [0], [1], [0, 0, 1, 1], [], []>} : vector<16x8xbf16>, vector<8x8xbf16>, vector<16x8xf32> -> vector<16x8xf32>
    %332 = arith.addf %327, %331 : vector<16x8xf32>
    %333 = arith.addf %318, %332 : vector<16x8xf32>
    %334 = vector.extract_strided_slice %0 {offsets = [0, 13], sizes = [16, 1], strides = [1, 1]} : vector<16x16xf32> to vector<16x1xf32>
    %335 = vector.broadcast %334 : vector<16x1xf32> to vector<16x8xf32>
    %336 = arith.addf %333, %335 : vector<16x8xf32>
    %c536 = arith.constant 536 : index
    %c0_144 = arith.constant 0 : index
    %337 = vector.load %arg2[%c536, %c0_144] : memref<664x72xf32, #tpu.memory_space<vmem>>, vector<16x16xf32>
    %338 = arith.truncf %337 : vector<16x16xf32> to vector<16x16xbf16>
    %cst_145 = arith.constant 0.000000e+00 : f32
    %339 = vector.broadcast %cst_145 : f32 to vector<16x8xf32>
    %340 = arith.maximumf %254, %339 : vector<16x8xf32>
    %341 = arith.truncf %340 : vector<16x8xf32> to vector<16x8xbf16>
    %cst_146 = arith.constant dense<0.000000e+00> : vector<16x8xf32>
    %342 = tpu.matmul %338, %341, %cst_146 {dimension_numbers = #tpu.dot_dimension_numbers<[1], [0], [0], [1], [0, 0, 1, 1], [], []>} : vector<16x16xbf16>, vector<16x8xbf16>, vector<16x8xf32> -> vector<16x8xf32>
    %c552 = arith.constant 552 : index
    %c0_147 = arith.constant 0 : index
    %343 = vector.load %arg2[%c552, %c0_147] : memref<664x72xf32, #tpu.memory_space<vmem>>, vector<16x16xf32>
    %344 = arith.truncf %343 : vector<16x16xf32> to vector<16x16xbf16>
    %cst_148 = arith.constant 0.000000e+00 : f32
    %345 = vector.broadcast %cst_148 : f32 to vector<16x8xf32>
    %346 = arith.maximumf %272, %345 : vector<16x8xf32>
    %347 = arith.truncf %346 : vector<16x8xf32> to vector<16x8xbf16>
    %cst_149 = arith.constant dense<0.000000e+00> : vector<16x8xf32>
    %348 = tpu.matmul %344, %347, %cst_149 {dimension_numbers = #tpu.dot_dimension_numbers<[1], [0], [0], [1], [0, 0, 1, 1], [], []>} : vector<16x16xbf16>, vector<16x8xbf16>, vector<16x8xf32> -> vector<16x8xf32>
    %349 = arith.addf %342, %348 : vector<16x8xf32>
    %c568 = arith.constant 568 : index
    %c0_150 = arith.constant 0 : index
    %350 = vector.load %arg2[%c568, %c0_150] : memref<664x72xf32, #tpu.memory_space<vmem>>, vector<16x16xf32>
    %351 = arith.truncf %350 : vector<16x16xf32> to vector<16x16xbf16>
    %cst_151 = arith.constant 0.000000e+00 : f32
    %352 = vector.broadcast %cst_151 : f32 to vector<16x8xf32>
    %353 = arith.maximumf %273, %352 : vector<16x8xf32>
    %354 = arith.truncf %353 : vector<16x8xf32> to vector<16x8xbf16>
    %cst_152 = arith.constant dense<0.000000e+00> : vector<16x8xf32>
    %355 = tpu.matmul %351, %354, %cst_152 {dimension_numbers = #tpu.dot_dimension_numbers<[1], [0], [0], [1], [0, 0, 1, 1], [], []>} : vector<16x16xbf16>, vector<16x8xbf16>, vector<16x8xf32> -> vector<16x8xf32>
    %356 = arith.addf %349, %355 : vector<16x8xf32>
    %c584 = arith.constant 584 : index
    %c0_153 = arith.constant 0 : index
    %357 = vector.load %arg2[%c584, %c0_153] : memref<664x72xf32, #tpu.memory_space<vmem>>, vector<16x16xf32>
    %358 = arith.truncf %357 : vector<16x16xf32> to vector<16x16xbf16>
    %cst_154 = arith.constant 0.000000e+00 : f32
    %359 = vector.broadcast %cst_154 : f32 to vector<16x8xf32>
    %360 = arith.maximumf %274, %359 : vector<16x8xf32>
    %361 = arith.truncf %360 : vector<16x8xf32> to vector<16x8xbf16>
    %cst_155 = arith.constant dense<0.000000e+00> : vector<16x8xf32>
    %362 = tpu.matmul %358, %361, %cst_155 {dimension_numbers = #tpu.dot_dimension_numbers<[1], [0], [0], [1], [0, 0, 1, 1], [], []>} : vector<16x16xbf16>, vector<16x8xbf16>, vector<16x8xf32> -> vector<16x8xf32>
    %363 = arith.addf %356, %362 : vector<16x8xf32>
    %364 = vector.extract_strided_slice %0 {offsets = [0, 14], sizes = [16, 1], strides = [1, 1]} : vector<16x16xf32> to vector<16x1xf32>
    %365 = vector.broadcast %364 : vector<16x1xf32> to vector<16x8xf32>
    %366 = arith.addf %363, %365 : vector<16x8xf32>
    %367 = arith.addf %336, %366 : vector<16x8xf32>
    %368 = arith.addf %336, %367 : vector<16x8xf32>
    %369 = arith.addf %366, %368 : vector<16x8xf32>
    %370 = arith.addf %367, %369 : vector<16x8xf32>
    %c0_156 = arith.constant 0 : index
    %c0_157 = arith.constant 0 : index
    %371 = vector.load %arg8[%c0_156, %c0_157] : memref<8x2xf32, #tpu.memory_space<vmem>>, vector<8x2xf32>
    %cst_158 = arith.constant dense<0.000000e+00> : vector<16x2xf32>
    %372 = tpu.matmul %367, %371, %cst_158 {dimension_numbers = #tpu.dot_dimension_numbers<[1], [0], [0], [1], [0, 0, 1, 1], [], []>} : vector<16x8xf32>, vector<8x2xf32>, vector<16x2xf32> -> vector<16x2xf32>
    %c600 = arith.constant 600 : index
    %c0_159 = arith.constant 0 : index
    %373 = vector.load %arg2[%c600, %c0_159] : memref<664x72xf32, #tpu.memory_space<vmem>>, vector<10x16xf32>
    %374 = arith.truncf %373 : vector<10x16xf32> to vector<10x16xbf16>
    %375 = arith.truncf %372 : vector<16x2xf32> to vector<16x2xbf16>
    %cst_160 = arith.constant dense<0.000000e+00> : vector<10x2xf32>
    %376 = tpu.matmul %374, %375, %cst_160 {dimension_numbers = #tpu.dot_dimension_numbers<[1], [0], [0], [1], [0, 0, 1, 1], [], []>} : vector<10x16xbf16>, vector<16x2xbf16>, vector<10x2xf32> -> vector<10x2xf32>
    %cst_161 = arith.constant dense<0.000000e+00> : vector<16x2xf32>
    %377 = tpu.matmul %368, %371, %cst_161 {dimension_numbers = #tpu.dot_dimension_numbers<[1], [0], [0], [1], [0, 0, 1, 1], [], []>} : vector<16x8xf32>, vector<8x2xf32>, vector<16x2xf32> -> vector<16x2xf32>
    %c616 = arith.constant 616 : index
    %c0_162 = arith.constant 0 : index
    %378 = vector.load %arg2[%c616, %c0_162] : memref<664x72xf32, #tpu.memory_space<vmem>>, vector<10x16xf32>
    %379 = arith.truncf %378 : vector<10x16xf32> to vector<10x16xbf16>
    %380 = arith.truncf %377 : vector<16x2xf32> to vector<16x2xbf16>
    %cst_163 = arith.constant dense<0.000000e+00> : vector<10x2xf32>
    %381 = tpu.matmul %379, %380, %cst_163 {dimension_numbers = #tpu.dot_dimension_numbers<[1], [0], [0], [1], [0, 0, 1, 1], [], []>} : vector<10x16xbf16>, vector<16x2xbf16>, vector<10x2xf32> -> vector<10x2xf32>
    %382 = arith.addf %376, %381 : vector<10x2xf32>
    %cst_164 = arith.constant dense<0.000000e+00> : vector<16x2xf32>
    %383 = tpu.matmul %369, %371, %cst_164 {dimension_numbers = #tpu.dot_dimension_numbers<[1], [0], [0], [1], [0, 0, 1, 1], [], []>} : vector<16x8xf32>, vector<8x2xf32>, vector<16x2xf32> -> vector<16x2xf32>
    %c632 = arith.constant 632 : index
    %c0_165 = arith.constant 0 : index
    %384 = vector.load %arg2[%c632, %c0_165] : memref<664x72xf32, #tpu.memory_space<vmem>>, vector<10x16xf32>
    %385 = arith.truncf %384 : vector<10x16xf32> to vector<10x16xbf16>
    %386 = arith.truncf %383 : vector<16x2xf32> to vector<16x2xbf16>
    %cst_166 = arith.constant dense<0.000000e+00> : vector<10x2xf32>
    %387 = tpu.matmul %385, %386, %cst_166 {dimension_numbers = #tpu.dot_dimension_numbers<[1], [0], [0], [1], [0, 0, 1, 1], [], []>} : vector<10x16xbf16>, vector<16x2xbf16>, vector<10x2xf32> -> vector<10x2xf32>
    %388 = arith.addf %382, %387 : vector<10x2xf32>
    %cst_167 = arith.constant dense<0.000000e+00> : vector<16x2xf32>
    %389 = tpu.matmul %370, %371, %cst_167 {dimension_numbers = #tpu.dot_dimension_numbers<[1], [0], [0], [1], [0, 0, 1, 1], [], []>} : vector<16x8xf32>, vector<8x2xf32>, vector<16x2xf32> -> vector<16x2xf32>
    %c648 = arith.constant 648 : index
    %c0_168 = arith.constant 0 : index
    %390 = vector.load %arg2[%c648, %c0_168] : memref<664x72xf32, #tpu.memory_space<vmem>>, vector<10x16xf32>
    %391 = arith.truncf %390 : vector<10x16xf32> to vector<10x16xbf16>
    %392 = arith.truncf %389 : vector<16x2xf32> to vector<16x2xbf16>
    %cst_169 = arith.constant dense<0.000000e+00> : vector<10x2xf32>
    %393 = tpu.matmul %391, %392, %cst_169 {dimension_numbers = #tpu.dot_dimension_numbers<[1], [0], [0], [1], [0, 0, 1, 1], [], []>} : vector<10x16xbf16>, vector<16x2xbf16>, vector<10x2xf32> -> vector<10x2xf32>
    %394 = arith.addf %388, %393 : vector<10x2xf32>
    %395 = vector.extract_strided_slice %0 {offsets = [0, 15], sizes = [10, 1], strides = [1, 1]} : vector<16x16xf32> to vector<10x1xf32>
    %396 = vector.broadcast %395 : vector<10x1xf32> to vector<10x2xf32>
    %397 = arith.addf %394, %396 : vector<10x2xf32>
    %c0_170 = arith.constant 0 : index
    %c0_171 = arith.constant 0 : index
    %398 = vector.load %arg9[%c0_170, %c0_171] : memref<10x2xf32, #tpu.memory_space<vmem>>, vector<10x2xf32>
    tpu.vector_store %arg9[%c0_170, %c0_171], %397 {strides = array<i32>} : memref<10x2xf32, #tpu.memory_space<vmem>>, vector<10x2xf32>,
    return
  }
  func.func @transform_0(%arg0: i32) -> (i32, i32) {
    %c0_i32 = arith.constant 0 : i32
    %c0_i32_0 = arith.constant 0 : i32
    %c0_i32_1 = arith.constant 0 : i32
    return %c0_i32, %c0_i32_0 : i32, i32
  }
  func.func @transform_1(%arg0: i32) -> (i32, i32) {
    %c0_i32 = arith.constant 0 : i32
    %c0_i32_0 = arith.constant 0 : i32
    %c0_i32_1 = arith.constant 0 : i32
    return %c0_i32, %c0_i32_0 : i32, i32
  }
  func.func @transform_2(%arg0: i32) -> (i32, i32) {
    %c0_i32 = arith.constant 0 : i32
    %c0_i32_0 = arith.constant 0 : i32
    %c0_i32_1 = arith.constant 0 : i32
    return %c0_i32, %c0_i32_0 : i32, i32
  }
  func.func @transform_3(%arg0: i32) -> (i32, i32) {
    %c0_i32 = arith.constant 0 : i32
    %c0_i32_0 = arith.constant 0 : i32
    %c0_i32_1 = arith.constant 0 : i32
    return %c0_i32, %c0_i32_0 : i32, i32
  }
  func.func @transform_4(%arg0: i32) -> (i32, i32) {
    %c0_i32 = arith.constant 0 : i32
    %c0_i32_0 = arith.constant 0 : i32
    %c0_i32_1 = arith.constant 0 : i32
    return %c0_i32, %c0_i32_0 : i32, i32
  }
  func.func @transform_5(%arg0: i32) -> (i32, i32) {
    %c0_i32 = arith.constant 0 : i32
    %c0_i32_0 = arith.constant 0 : i32
    %c0_i32_1 = arith.constant 0 : i32
    return %c0_i32, %c0_i32_0 : i32, i32
  }
  func.func @transform_6(%arg0: i32) -> (i32, i32) {
    %c0_i32 = arith.constant 0 : i32
    %c0_i32_0 = arith.constant 0 : i32
    %c0_i32_1 = arith.constant 0 : i32
    return %c0_i32, %c0_i32_0 : i32, i32
  }
  func.func @transform_7(%arg0: i32) -> (i32, i32) {
    %c0_i32 = arith.constant 0 : i32
    %c0_i32_0 = arith.constant 0 : i32
    %c0_i32_1 = arith.constant 0 : i32
    return %c0_i32, %c0_i32_0 : i32, i32
  }
  func.func @transform_8(%arg0: i32) -> (i32, i32) {
    %c0_i32 = arith.constant 0 : i32
    %c0_i32_0 = arith.constant 0 : i32
    %c0_i32_1 = arith.constant 0 : i32
    return %c0_i32, %c0_i32_0 : i32, i32
  }
}

</mosaic_0001>

<bundles_post_ra>
// kernel: forward.1
= control target key start
LH: loop header
LB: loop body
LE: loop exit
PB: predicated region body
PF: predicated region fallthrough
CT: control target
= control target key end

     0   :  { %v5209_v0 = vmov 0.0   ;;  %vm5210_vm0 = vmmov 0   ;;  %v5211_v2 = vmov 0   ;;  %vm125_vm1 = vcmask 1043456   ;;  %s6343_s0 = inlined_call_operand.vmem [shape: bf16[72,128], index: 0, kind: input, shape index: {}]   ;;  %s6344_s2 = inlined_call_operand.vmem [shape: f32[16,16], index: 2, kind: input, shape index: {}]   ;;  %s6345_s1 = inlined_call_operand.vmem [shape: f32[664,72], index: 1, kind: input, shape index: {}]   ;;  %s6346_s4 = inlined_call_operand.vmem [shape: bf16[128,32], index: 4, kind: input, shape index: {}]   ;;  %s6347_s3 = inlined_call_operand.vmem [shape: bf16[128,32], index: 3, kind: input, shape index: {}]   ;;  %s6348_s5 = inlined_call_operand.vmem [shape: bf16[32,8], index: 5, kind: input, shape index: {}]   ;;  %s6349_s6 = inlined_call_operand.vmem [shape: bf16[32,8], index: 6, kind: input, shape index: {}]   ;;  %s6350_s7 = inlined_call_operand.vmem [shape: f32[8,2], index: 7, kind: input, shape index: {}]   ;;  %s6351_s8 = inlined_call_operand.vmem [shape: f32[10,2], index: 8, kind: output, shape index: {}]  }
   0x1   :  { %4458 = vmatprep.subr.bf16.mxu0 %v5209_v0  ;;  %v5180_v1 = vld [vmem:[%s6343_s0] sm:$0xff]   ;;  %4468 = vmatprep.mubr.msk.bf16.mxu0 %vm5210_vm0, %v5209_v0  ;;  %v5181_v3 = vld [vmem:[%s6343_s0 + $0x8] sm:$0xff]   ;;  %v5182_v5 = vld [vmem:[%s6343_s0 + $0x10] sm:$0xff]   ;;  %vm121_vm2 = vcmask 588800   ;;  %v5212_v13 = vmov 1   ;;  %v5213_v14 = vmov 3  }
   0x2   :  { %5158 = vset.pattern.permute.xlu0 %v5211_v2  ;;  %4472 = vmatprep.subr.bf16.mxu1 %v5209_v0  ;;  %v5288_v4 = vld [vmem:[%s6344_s2] sm:$0xff]  ;;  %v31_v6 = vld [vmem:[%s6344_s2 + $0x8] sm:$0xff]  ;;  %v5183_v7 = vld [vmem:[%s6343_s0 + $0x18] sm:$0xff]   ;;  %v5214_v15 = vmov 2   ;;  %vm183_vm3 = vcmask 1045504   ;;  %vm179_vm4 = vcmask 97280  }
   0x3   :  { %4459 = vmatpush3.bf16.msra.mxu0 %v5180_v1  ;;  %4474 = vmatprep.mubr.msk.bf16.mxu1 %vm5210_vm0, %v5209_v0  ;;  %v5184_v8 = vld [vmem:[%s6343_s0 + $0x20] ss:$0 sps:$4 sm:$0xff]   ;;  %v73_v10 = vld [vmem:[%s6345_s1 + $0x8] sm:$0xf]  ;;  %v170_v26 = vld [vmem:[%s6345_s1 + $0x10] sm:$0xf] }
   0x4   :  { %4460 = vmatprep.subr.bf16.mxu0 %v5209_v0  ;;  %86 = vperm.xlu0 %5158, %v5288_v4   ;;  %v72_v9 = vld [vmem:[%s6345_s1] sm:$0xff]  ;;  %v127_v11 = vsel %vm125_vm1, %v5184_v8, 0  ;;  %v171_v29 = vpack.c.bf16 %v170_v26, %v170_v26  ;;  %v227_v30 = vld [vmem:[%s6345_s1 + $0x18] sm:$0xf]  ;;  %v5215_v34 = vmov 4   ;;  %v329_v50 = vld [vmem:[%s6345_s1 + $0x28] sm:$0xff] }
   0x5   :  { %v74_v12 = vpack.c.bf16 %v73_v10, %v72_v9  ;;  %5159 = vset.pattern.permute.xlu1 %v5212_v13  ;;  %v228_v31 = vpack.c.bf16 %v227_v30, %v227_v30  ;;  %v280_v32 = vld [vmem:[%s6345_s1 + $0x20] sm:$0xff]  ;;  %vm341_vm5 = vcmask 1041408   ;;  %v330_v54 = vpack.c.bf16 %v329_v50, %v329_v50  ;;  %v333_v55 = vld [vmem:[%s6345_s1 + $0x30] sm:$0xff]  ;;  %v431_v10 = vld [vmem:[%s6345_s1 + $0x38] sm:$0xff] }
   0x6   :  { %176 = vperm.xlu1 %5159, %v5288_v4   ;;  %v281_v33 = vpack.c.bf16 %v280_v32, %v280_v32  ;;  %vm337_vm6 = vcmask 31744   ;;  %v432_v13 = vpack.c.bf16 %v431_v10, %v431_v10  ;;  %v5483_v30 = vld [vmem:[%s6346_s4 + $0x38] sm:$0xff]   ;;  %vm722_vm7 = vcmask 64512  }
   0x7   :  { %4461 = vmatpush3.bf16.msra.mxu0 %v5181_v3  ;;  %v334_v3 = vpack.c.bf16 %v333_v55, %v333_v55  ;;  %vm2085_vm8 = vcmask 261120   ;;  %vm2191_vm9 = vcmask 130048   ;;  %vm4101_vm10 = vcmask 15360  }
   0x8   :  { %4462 = vmatprep.subr.bf16.mxu0 %v5209_v0  ;;  %91 = vperm.xlu0 %5158, %v31_v6   ;;  %vm4103_vm11 = vcmask 9216  }
   0xa   :  { %5160 = vset.pattern.permute.xlu1 %v5214_v15  ;;  %v5393_v15 = vld [vmem:[%s6346_s4 + $0x8] sm:$0xff]  }
   0xb   :  { %4463 = vmatpush3.bf16.msra.mxu0 %v5182_v5  ;;  %230 = vperm.xlu1 %5160, %v5288_v4  }
   0xc   :  { %4464 = vmatprep.subr.bf16.mxu0 %v5209_v0  ;;  %5161 = vset.pattern.permute.xlu0 %v5213_v14  ;;  %v5386_v14 = vld [vmem:[%s6347_s3] sm:$0xff]  }
   0xd   :  { %283 = vperm.xlu0 %5161, %v5288_v4  }
   0xf   :  { %4465 = vmatpush3.bf16.msra.mxu0 %v5183_v7  ;;  %5162 = vset.pattern.permute.xlu1 %v5215_v34  ;;  %v482_v7 = vld [vmem:[%s6345_s1 + $0x40] sm:$0xff] }
  0x10   :  { %4466 = vmatprep.subr.bf16.mxu0 %v5209_v0  ;;  %534 = vperm.xlu1 %5162, %v5288_v4  }
  0x13   :  { %4467 = vmatpush3.bf16.msra.mxu0 %v127_v11  ;;  %v483_v11 = vpack.c.bf16 %v482_v7, %v482_v7 }
  0x14   :  { %4490 = vmatprep.subr.bf16.mxu0 %v5209_v0 }
  0x16   :  { %4469 = vmatmul.mubr.msk.bf16.vlgmr.msra.gmra.mrb[0].mxu0 %vm121_vm2, %v74_v12  ;;  %v5380_v12 = vld [vmem:[%s6346_s4] sm:$0xff]  }
  0x17   :  { %4492 = vmatprep.mubr.msk.bf16.mxu0 %vm5210_vm0, %v5209_v0 }
  0x83   :  { %v87_v16 = vpop.permute.xlu0 %86 }
  0x85   :  { %v177_v37 = vpop.permute.xlu1 %176 }
  0x87   :  { %v92_v20 = vpop.permute.xlu0 %91 }
  0x8a   :  { %v231_v40 = vpop.permute.xlu1 %230 }
  0xe9   :  { %v163_v17 = vpop.f32.mrb[0].mxu0 }
  0xea   :  { %v164_v18 = vadd.f32 %v163_v17, %v87_v16  ;;  %v4470_v19 = vpop.f32.mrb[1].mxu0  ;;  %v5403_v16 = vld [vmem:[%s6347_s3 + $0x8] sm:$0xff]   ;;  %v5412_v17 = vld [vmem:[%s6346_s4 + $0x10] sm:$0xff]  }
  0xeb   :  { %v166_v21 = vpop.f32.mrb[2].mxu0  ;;  %v5426_v19 = vld [vmem:[%s6346_s4 + $0x18] sm:$0xff]  }
  0xec   :  { %v167_v22 = vadd.f32 %v166_v21, %v92_v20  ;;  %v4471_v23 = vpop.f32.mrb[3].mxu0  ;;  %v172_v24 = vmax.f32 %v164_v18, 0.0  ;;  %v5419_v18 = vld [vmem:[%s6347_s3 + $0x10] sm:$0xff]   ;;  %v5433_v20 = vld [vmem:[%s6347_s3 + $0x18] sm:$0xff]   ;;  %v5440_v21 = vld [vmem:[%s6346_s4 + $0x20] sm:$0xff]  }
  0xed   :  { %v5454_v23 = vld [vmem:[%s6346_s4 + $0x28] sm:$0xff]  }
  0xee   :  { %v173_v25 = vmax.f32 %v167_v22, 0.0  ;;  %v5447_v22 = vld [vmem:[%s6347_s3 + $0x20] sm:$0xff]  }
  0xf0   :  { %v174_v27 = vpack.c.bf16 %v173_v25, %v172_v24  ;;  %v284_v24 = vpop.permute.xlu0 %283  ;;  %v5461_v25 = vld [vmem:[%s6347_s3 + $0x28] sm:$0xff]  }
  0xf2   :  { %v185_v28 = vsel %vm183_vm3, %v174_v27, 0  ;;  %v5469_v27 = vld [vmem:[%s6346_s4 + $0x30] sm:$0xff]  }
  0xf3   :  { %4473 = vmatpush3.bf16.msra.mxu1 %v185_v28 }
  0xf4   :  { %4478 = vmatprep.subr.bf16.mxu1 %v5209_v0 }
  0xf6   :  { %4475 = vmatmul.mubr.msk.bf16.vlgmr.msra.gmra.mrb[0].mxu1 %vm179_vm4, %v171_v29 }
  0xf7   :  { %4479 = vmatpush3.bf16.msra.mxu1 %v185_v28  ;;  %4480 = vmatprep.mubr.msk.bf16.mxu1 %vm5210_vm0, %v5209_v0 }
  0xf8   :  { %4484 = vmatprep.subr.bf16.mxu1 %v5209_v0 }
  0xfe   :  { %4481 = vmatmul.mubr.msk.bf16.vlgmr.msra.gmra.mrb[4].mxu1 %vm179_vm4, %v228_v31  ;;  %v5490_v31 = vld [vmem:[%s6347_s3 + $0x38] sm:$0xff]  }
  0xff   :  { %4485 = vmatpush3.bf16.msra.mxu1 %v185_v28  ;;  %4486 = vmatprep.mubr.msk.bf16.mxu1 %vm5210_vm0, %v5209_v0  ;;  %v5476_v28 = vld [vmem:[%s6347_s3 + $0x30] sm:$0xff]  }
 0x100   :  { %4496 = vmatprep.subr.bf16.mxu1 %v5209_v0 }
 0x106   :  { %4487 = vmatmul.mubr.msk.bf16.vlgmr.msra.gmra.mrb[8].mxu1 %vm179_vm4, %v281_v33 }
 0x107   :  { %4498 = vmatprep.mubr.msk.bf16.mxu1 %vm5210_vm0, %v5209_v0 }
 0x1c9   :  { %v221_v35 = vpop.f32.mrb[0].mxu1 }
 0x1ca   :  { %v4476_v36 = vpop.f32.mrb[1].mxu1  ;;  %v222_v42 = vadd.f32 %v221_v35, %v177_v37 }
 0x1cb   :  { %v224_v38 = vpop.f32.mrb[2].mxu1 }
 0x1cc   :  { %v4477_v39 = vpop.f32.mrb[3].mxu1 }
 0x1d1   :  { %v270_v41 = vpop.f32.mrb[4].mxu1 }
 0x1d2   :  { %v271_v43 = vadd.f32 %v270_v41, %v231_v40  ;;  %v4482_v44 = vpop.f32.mrb[5].mxu1 }
 0x1d3   :  { %v273_v45 = vpop.f32.mrb[6].mxu1 }
 0x1d4   :  { %v276_v46 = vadd.f32 %v271_v43, %v222_v42  ;;  %v4483_v47 = vpop.f32.mrb[7].mxu1 }
 0x1d6   :  { %v277_v48 = vadd.f32 %v276_v46, %v222_v42  ;;  %v331_v49 = vmax.f32 %v276_v46, 0.0 }
 0x1d8   :  { %v278_v51 = vadd.f32 %v277_v48, %v271_v43  ;;  %v5341_v52 = vpack.c.bf16 %v331_v49, %v331_v49  ;;  %v335_v53 = vmax.f32 %v277_v48, 0.0  ;;  %v535_v49 = vpop.permute.xlu1 %534 }
 0x1d9   :  { %v5346_v56 = vpop.f32.mrb[8].mxu1 }
 0x1da   :  { %v279_v57 = vadd.f32 %v278_v51, %v276_v46  ;;  %v5348_v58 = vpack.c.bf16 %v335_v53, %v335_v53  ;;  %v433_v59 = vmax.f32 %v278_v51, 0.0  ;;  %v389_v60 = vsel %vm341_vm5, %v5341_v52, 0  ;;  %v4488_v61 = vpop.f32.mrb[9].mxu1 }
 0x1db   :  { %4497 = vmatpush3.bf16.msra.mxu1 %v389_v60  ;;  %v326_v62 = vpop.f32.mrb[10].mxu1  ;;  %v324_v26 = vadd.f32 %v5346_v56, %v284_v24  ;;  %v1008_v60 = vld [vmem:[%s6345_s1 + $0x70] sm:$0xff] }
 0x1dc   :  { %v5352_v63 = vpack.c.bf16 %v433_v59, %v433_v59  ;;  %v484_v1 = vmax.f32 %v279_v57, 0.0  ;;  %v343_v2 = vsel %vm341_vm5, %v5348_v58, 0  ;;  %4508 = vmatprep.subr.bf16.mxu1 %v5209_v0  ;;  %v4489_v5 = vpop.f32.mrb[11].mxu1  ;;  %v719_v59 = vld [vmem:[%s6345_s1 + $0x50] sm:$0xff]  ;;  %v1009_v10 = vpack.c.bf16 %v1008_v60, %v1008_v60 }
 0x1dd   :  { %4491 = vmatpush3.bf16.msra.mxu0 %v343_v2  ;;  %v538_v29 = vmax.f32 %v324_v26, 0.0  ;;  %v1006_v26 = vld [vmem:[%s6345_s1 + $0x68] sm:$0xff] }
 0x1de   :  { %v5357_v6 = vpack.c.bf16 %v484_v1, %v484_v1  ;;  %4499 = vmatmul.mubr.msk.bf16.vlgmr.msra.gmra.mrb[12].mxu1 %vm337_vm6, %v330_v54  ;;  %4502 = vmatprep.subr.bf16.mxu0 %v5209_v0  ;;  %v439_v8 = vsel %vm341_vm5, %v5352_v63, 0 }
 0x1df   :  { %4510 = vmatprep.mubr.msk.bf16.mxu1 %vm5210_vm0, %v5209_v0  ;;  %v539_v32 = vpack.c.bf16 %v538_v29, %v538_v29  ;;  %v1007_v29 = vpack.c.bf16 %v1006_v26, %v1006_v26 }
 0x1e0   :  { %4493 = vmatmul.mubr.msk.bf16.vlgmr.msra.gmra.mrb[4].mxu0 %vm337_vm6, %v334_v3  ;;  %v490_v9 = vsel %vm341_vm5, %v5357_v6, 0 }
 0x1e1   :  { %4503 = vmatpush3.bf16.msra.mxu0 %v439_v8  ;;  %4509 = vmatpush3.bf16.msra.mxu1 %v490_v9  ;;  %v720_v9 = vpack.c.bf16 %v719_v59, %v719_v59 }
 0x1e2   :  { %4534 = vmatprep.subr.bf16.mxu1 %v5209_v0  ;;  %4504 = vmatprep.mubr.msk.bf16.mxu0 %vm5210_vm0, %v5209_v0 }
 0x1e3   :  { %4514 = vmatprep.subr.bf16.mxu0 %v5209_v0 }
 0x1e6   :  { %4511 = vmatmul.mubr.msk.bf16.vlgmr.msra.gmra.mrb[16].mxu1 %vm337_vm6, %v483_v11 }
 0x1e7   :  { %4535 = vmatpush3.bf16.msra.mxu1 %v5380_v12  ;;  %4550 = vmatprep.mubr.msk.bf16.mxu1 %vm5210_vm0, %v5209_v0 }
 0x1e8   :  { %4505 = vmatmul.mubr.msk.bf16.vlgmr.msra.gmra.mrb[8].mxu0 %vm337_vm6, %v432_v13  ;;  %4536 = vmatprep.subr.bf16.mxu1 %v5209_v0 }
 0x1e9   :  { %4515 = vmatpush3.bf16.msra.mxu0 %v5386_v14  ;;  %4530 = vmatprep.mubr.msk.bf16.mxu0 %vm5210_vm0, %v5209_v0 }
 0x1ea   :  { %4516 = vmatprep.subr.bf16.mxu0 %v5209_v0 }
 0x1eb   :  { %4537 = vmatpush3.bf16.msra.mxu1 %v5393_v15 }
 0x1ec   :  { %4538 = vmatprep.subr.bf16.mxu1 %v5209_v0 }
 0x1ed   :  { %4517 = vmatpush3.bf16.msra.mxu0 %v5403_v16 }
 0x1ee   :  { %4518 = vmatprep.subr.bf16.mxu0 %v5209_v0 }
 0x1ef   :  { %4539 = vmatpush3.bf16.msra.mxu1 %v5412_v17 }
 0x1f0   :  { %4540 = vmatprep.subr.bf16.mxu1 %v5209_v0 }
 0x1f1   :  { %4519 = vmatpush3.bf16.msra.mxu0 %v5419_v18 }
 0x1f2   :  { %4520 = vmatprep.subr.bf16.mxu0 %v5209_v0 }
 0x1f3   :  { %4541 = vmatpush3.bf16.msra.mxu1 %v5426_v19 }
 0x1f4   :  { %4542 = vmatprep.subr.bf16.mxu1 %v5209_v0 }
 0x1f5   :  { %4521 = vmatpush3.bf16.msra.mxu0 %v5433_v20 }
 0x1f6   :  { %4522 = vmatprep.subr.bf16.mxu0 %v5209_v0 }
 0x1f7   :  { %4543 = vmatpush3.bf16.msra.mxu1 %v5440_v21 }
 0x1f8   :  { %4544 = vmatprep.subr.bf16.mxu1 %v5209_v0 }
 0x1f9   :  { %4523 = vmatpush3.bf16.msra.mxu0 %v5447_v22 }
 0x1fa   :  { %4524 = vmatprep.subr.bf16.mxu0 %v5209_v0 }
 0x1fb   :  { %4545 = vmatpush3.bf16.msra.mxu1 %v5454_v23 }
 0x1fc   :  { %4546 = vmatprep.subr.bf16.mxu1 %v5209_v0 }
 0x1fd   :  { %4525 = vmatpush3.bf16.msra.mxu0 %v5461_v25 }
 0x1fe   :  { %4526 = vmatprep.subr.bf16.mxu0 %v5209_v0 }
 0x1ff   :  { %4547 = vmatpush3.bf16.msra.mxu1 %v5469_v27 }
 0x200   :  { %4548 = vmatprep.subr.bf16.mxu1 %v5209_v0 }
 0x201   :  { %4527 = vmatpush3.bf16.msra.mxu0 %v5476_v28 }
 0x202   :  { %4528 = vmatprep.subr.bf16.mxu0 %v5209_v0 }
 0x203   :  { %4549 = vmatpush3.bf16.msra.mxu1 %v5483_v30 }
 0x204   :  { %4566 = vmatprep.subr.bf16.mxu1 %v5209_v0 }
 0x205   :  { %4529 = vmatpush3.bf16.msra.mxu0 %v5490_v31 }
 0x206   :  { %4551 = vmatmul.mubr.bf16.vlgmr.msra.gmra.mrb[20].mxu1 %v539_v32  ;;  %4554 = vmatprep.subr.bf16.mxu0 %v5209_v0 }
 0x207   :  { %4567 = vmatpush3.bf16.msra.mxu1 %v5386_v14  ;;  %4582 = vmatprep.mubr.msk.bf16.mxu1 %vm5210_vm0, %v5209_v0 }
 0x208   :  { %4531 = vmatmul.mubr.bf16.vlgmr.msra.gmra.mrb[12].mxu0 %v539_v32  ;;  %4568 = vmatprep.subr.bf16.mxu1 %v5209_v0  ;;  %v716_v32 = vld [vmem:[%s6345_s1 + $0x48] sm:$0xff] }
 0x209   :  { %4556 = vmatprep.mubr.msk.bf16.mxu0 %vm5210_vm0, %v5209_v0 }
 0x20b   :  { %4569 = vmatpush3.bf16.msra.mxu1 %v5403_v16 }
 0x20c   :  { %4570 = vmatprep.subr.bf16.mxu1 %v5209_v0 }
 0x20f   :  { %4571 = vmatpush3.bf16.msra.mxu1 %v5419_v18 }
 0x210   :  { %4572 = vmatprep.subr.bf16.mxu1 %v5209_v0 }
 0x213   :  { %4573 = vmatpush3.bf16.msra.mxu1 %v5433_v20 }
 0x214   :  { %4574 = vmatprep.subr.bf16.mxu1 %v5209_v0 }
 0x217   :  { %4575 = vmatpush3.bf16.msra.mxu1 %v5447_v22 }
 0x218   :  { %4576 = vmatprep.subr.bf16.mxu1 %v5209_v0 }
 0x21b   :  { %4577 = vmatpush3.bf16.msra.mxu1 %v5461_v25 }
 0x21c   :  { %4578 = vmatprep.subr.bf16.mxu1 %v5209_v0 }
 0x21f   :  { %4579 = vmatpush3.bf16.msra.mxu1 %v5476_v28 }
 0x220   :  { %4580 = vmatprep.subr.bf16.mxu1 %v5209_v0 }
 0x223   :  { %4581 = vmatpush3.bf16.msra.mxu1 %v5490_v31 }
 0x224   :  { %4618 = vmatprep.subr.bf16.mxu1 %v5209_v0 }
 0x2b1   :  { %v425_v33 = vpop.f32.mrb[12].mxu1 }
 0x2b2   :  { %v4500_v34 = vpop.f32.mrb[13].mxu1 }
 0x2b3   :  { %v379_v35 = vpop.f32.mrb[4].mxu0  ;;  %v428_v36 = vpop.f32.mrb[14].mxu1 }
 0x2b4   :  { %v426_v37 = vadd.f32 %v425_v33, %v379_v35  ;;  %v4501_v38 = vpop.f32.mrb[15].mxu1  ;;  %v4494_v39 = vpop.f32.mrb[5].mxu0  ;;  %v717_v33 = vpack.c.bf16 %v716_v32, %v716_v32 }
 0x2b5   :  { %v382_v40 = vpop.f32.mrb[6].mxu0  ;;  %v5216_v39 = vmov 5  }
 0x2b6   :  { %v4495_v41 = vpop.f32.mrb[7].mxu0  ;;  %5163 = vset.pattern.permute.xlu1 %v5216_v39  ;;  %v5217_v40 = vmov 6  }
 0x2b7   :  { %5164 = vset.pattern.permute.xlu0 %v5217_v40  ;;  %816 = vperm.xlu1 %5163, %v5288_v4  }
 0x2b8   :  { %1001 = vperm.xlu0 %5164, %v5288_v4  }
 0x2b9   :  { %v526_v42 = vpop.f32.mrb[16].mxu1 }
 0x2ba   :  { %v4512_v43 = vpop.f32.mrb[17].mxu1 }
 0x2bb   :  { %v475_v44 = vpop.f32.mrb[8].mxu0  ;;  %v529_v45 = vpop.f32.mrb[18].mxu1 }
 0x2bc   :  { %v481_v46 = vadd.f32 %v475_v44, %v426_v37  ;;  %v4513_v47 = vpop.f32.mrb[19].mxu1  ;;  %v4506_v48 = vpop.f32.mrb[9].mxu0  ;;  %v5218_v44 = vmov 7  }
 0x2bd   :  { %v478_v50 = vpop.f32.mrb[10].mxu0  ;;  %5165 = vset.pattern.permute.xlu1 %v5218_v44 }
 0x2be   :  { %v532_v51 = vadd.f32 %v526_v42, %v481_v46  ;;  %v4507_v53 = vpop.f32.mrb[11].mxu0  ;;  %1097 = vperm.xlu1 %5165, %v5288_v4  }
 0x2c0   :  { %v537_v54 = vadd.f32 %v535_v49, %v532_v51 }
 0x2c2   :  { %v820_v55 = vmax.f32 %v537_v54, 0.0 }
 0x2c4   :  { %v5517_v56 = vpack.c.bf16 %v820_v55, %v820_v55 }
 0x2c6   :  { %4583 = vmatmul.mubr.bf16.vlgmr.msra.gmra.mrb[24].mxu1 %v5517_v56 }
 0x2c7   :  { %4620 = vmatprep.mubr.msk.bf16.mxu1 %vm5210_vm0, %v5209_v0 }
 0x2d9   :  { %v710_v57 = vpop.f32.mrb[20].mxu1 }
 0x2da   :  { %v721_v61 = vpack.c.bf16 %v710_v57, %v710_v57  ;;  %v4552_v62 = vpop.f32.mrb[21].mxu1 }
 0x2db   :  { %v622_v1 = vpop.f32.mrb[12].mxu0  ;;  %v713_v2 = vpop.f32.mrb[22].mxu1 }
 0x2dc   :  { %v727_v3 = vsel %vm125_vm1, %v721_v61, 0  ;;  %v718_v5 = vpack.c.bf16 %v622_v1, %v622_v1  ;;  %v4532_v7 = vpop.f32.mrb[13].mxu0  ;;  %v4553_v8 = vpop.f32.mrb[23].mxu1 }
 0x2dd   :  { %v625_v11 = vpop.f32.mrb[14].mxu0  ;;  %4555 = vmatpush3.bf16.msra.mxu0 %v727_v3  ;;  %4619 = vmatpush3.bf16.msra.mxu1 %v727_v3  ;;  %v902_v3 = vld [vmem:[%s6345_s1 + $0x58] sm:$0xff] }
 0x2de   :  { %v4533_v13 = vpop.f32.mrb[15].mxu0  ;;  %4560 = vmatprep.subr.bf16.mxu0 %v5209_v0  ;;  %4624 = vmatprep.subr.bf16.mxu1 %v5209_v0  ;;  %v773_v24 = vsel %vm125_vm1, %v718_v5, 0  ;;  %v903_v5 = vpack.c.bf16 %v902_v3, %v902_v3 }
 0x2e0   :  { %4557 = vmatmul.mubr.msk.bf16.vlgmr.msra.gmra.mrb[16].mxu0 %vm722_vm7, %v720_v9  ;;  %4621 = vmatmul.mubr.msk.bf16.vlgmr.msra.gmra.mrb[28].mxu1 %vm722_vm7, %v1009_v10 }
 0x2e1   :  { %4561 = vmatpush3.bf16.msra.mxu0 %v773_v24  ;;  %4625 = vmatpush3.bf16.msra.mxu1 %v773_v24 }
 0x2e2   :  { %4626 = vmatprep.mubr.msk.bf16.mxu1 %vm5210_vm0, %v5209_v0  ;;  %4630 = vmatprep.subr.bf16.mxu1 %v5209_v0 }
 0x2e3   :  { %4562 = vmatprep.mubr.msk.bf16.mxu0 %vm5210_vm0, %v5209_v0  ;;  %4586 = vmatprep.subr.bf16.mxu0 %v5209_v0 }
 0x2e8   :  { %4627 = vmatmul.mubr.msk.bf16.vlgmr.msra.gmra.mrb[32].mxu1 %vm722_vm7, %v1007_v29 }
 0x2e9   :  { %4631 = vmatpush3.bf16.msra.mxu1 %v5386_v14  ;;  %4646 = vmatprep.mubr.msk.bf16.mxu1 %vm5210_vm0, %v5209_v0 }
 0x2ea   :  { %4632 = vmatprep.subr.bf16.mxu1 %v5209_v0 }
 0x2ec   :  { %4563 = vmatmul.mubr.msk.bf16.vlgmr.msra.gmra.mrb[16].mxu0 %vm722_vm7, %v717_v33 }
 0x2ed   :  { %4587 = vmatpush3.bf16.msra.mxu0 %v5380_v12  ;;  %4633 = vmatpush3.bf16.msra.mxu1 %v5403_v16 }
 0x2ee   :  { %4588 = vmatprep.subr.bf16.mxu0 %v5209_v0  ;;  %4634 = vmatprep.subr.bf16.mxu1 %v5209_v0 }
 0x2ef   :  { %4602 = vmatprep.mubr.msk.bf16.mxu0 %vm5210_vm0, %v5209_v0 }
 0x2f1   :  { %4589 = vmatpush3.bf16.msra.mxu0 %v5393_v15  ;;  %4635 = vmatpush3.bf16.msra.mxu1 %v5419_v18 }
 0x2f2   :  { %4590 = vmatprep.subr.bf16.mxu0 %v5209_v0  ;;  %4636 = vmatprep.subr.bf16.mxu1 %v5209_v0 }
 0x2f5   :  { %4591 = vmatpush3.bf16.msra.mxu0 %v5412_v17  ;;  %4637 = vmatpush3.bf16.msra.mxu1 %v5433_v20 }
 0x2f6   :  { %4592 = vmatprep.subr.bf16.mxu0 %v5209_v0  ;;  %4638 = vmatprep.subr.bf16.mxu1 %v5209_v0 }
 0x2f9   :  { %4593 = vmatpush3.bf16.msra.mxu0 %v5426_v19  ;;  %4639 = vmatpush3.bf16.msra.mxu1 %v5447_v22 }
 0x2fa   :  { %4594 = vmatprep.subr.bf16.mxu0 %v5209_v0  ;;  %4640 = vmatprep.subr.bf16.mxu1 %v5209_v0 }
 0x2fd   :  { %4595 = vmatpush3.bf16.msra.mxu0 %v5440_v21  ;;  %4641 = vmatpush3.bf16.msra.mxu1 %v5461_v25 }
 0x2fe   :  { %4596 = vmatprep.subr.bf16.mxu0 %v5209_v0  ;;  %4642 = vmatprep.subr.bf16.mxu1 %v5209_v0 }
 0x301   :  { %4597 = vmatpush3.bf16.msra.mxu0 %v5454_v23  ;;  %4643 = vmatpush3.bf16.msra.mxu1 %v5476_v28 }
 0x302   :  { %4598 = vmatprep.subr.bf16.mxu0 %v5209_v0  ;;  %4644 = vmatprep.subr.bf16.mxu1 %v5209_v0 }
 0x305   :  { %4599 = vmatpush3.bf16.msra.mxu0 %v5469_v27  ;;  %4645 = vmatpush3.bf16.msra.mxu1 %v5490_v31 }
 0x306   :  { %4600 = vmatprep.subr.bf16.mxu0 %v5209_v0  ;;  %4670 = vmatprep.subr.bf16.mxu1 %v5209_v0 }
 0x308   :  { %4647 = vmatmul.mubr.bf16.vlgmr.msra.gmra.mrb[36].mxu1 %v5341_v52 }
 0x309   :  { %4601 = vmatpush3.bf16.msra.mxu0 %v5483_v30  ;;  %4672 = vmatprep.mubr.msk.bf16.mxu1 %vm5210_vm0, %v5209_v0 }
 0x30a   :  { %4606 = vmatprep.subr.bf16.mxu0 %v5209_v0 }
 0x30c   :  { %4603 = vmatmul.mubr.bf16.vlgmr.msra.gmra.mrb[20].mxu0 %v5517_v56  ;;  %v905_v56 = vld [vmem:[%s6345_s1 + $0x60] sm:$0xff] }
 0x30d   :  { %4608 = vmatprep.mubr.msk.bf16.mxu0 %vm5210_vm0, %v5209_v0  ;;  %v906_v1 = vpack.c.bf16 %v905_v56, %v905_v56  ;;  %v1366_v56 = vld [vmem:[%s6345_s1 + $0x98] sm:$0xff] }
 0x337   :  { %v1002_v9 = vpop.permute.xlu0 %1001 }
 0x399   :  { %v856_v34 = vpop.f32.mrb[24].mxu1 }
 0x39a   :  { %v4584_v35 = vpop.f32.mrb[25].mxu1  ;;  %v904_v4 = vpack.c.bf16 %v856_v34, %v856_v34 }
 0x39b   :  { %v859_v36 = vpop.f32.mrb[26].mxu1 }
 0x39c   :  { %v4585_v37 = vpop.f32.mrb[27].mxu1  ;;  %v958_v2 = vsel %vm125_vm1, %v904_v4, 0  ;;  %v1188_v36 = vld [vmem:[%s6345_s1 + $0x88] sm:$0xff] }
 0x39d   :  { %v1189_v37 = vld [vmem:[%s6345_s1 + $0x90] sm:$0xff] }
 0x39e   :  { %v1190_v44 = vpack.c.bf16 %v1189_v37, %v1188_v36 }
 0x3b3   :  { %v1047_v38 = vpop.f32.mrb[28].mxu1 }
 0x3b4   :  { %v4622_v41 = vpop.f32.mrb[29].mxu1 }
 0x3b5   :  { %v1050_v42 = vpop.f32.mrb[30].mxu1 }
 0x3b6   :  { %v4623_v43 = vpop.f32.mrb[31].mxu1 }
 0x3bb   :  { %v1090_v45 = vpop.f32.mrb[32].mxu1 }
 0x3bc   :  { %v5593_v46 = vadd.f32 %v1090_v45, %v1047_v38  ;;  %v4628_v47 = vpop.f32.mrb[33].mxu1 }
 0x3bd   :  { %v1093_v48 = vpop.f32.mrb[34].mxu1  ;;  %v1185_v47 = vld [vmem:[%s6345_s1 + $0x80] sm:$0xff] }
 0x3be   :  { %v4629_v49 = vpop.f32.mrb[35].mxu1 }
 0x3db   :  { %v5595_v50 = vpop.f32.mrb[36].mxu1 }
 0x3dc   :  { %v4648_v51 = vpop.f32.mrb[37].mxu1  ;;  %v1187_v41 = vpack.c.bf16 %v5595_v50, %v5595_v50 }
 0x3dd   :  { %v1141_v53 = vpop.f32.mrb[38].mxu1 }
 0x3de   :  { %v4649_v54 = vpop.f32.mrb[39].mxu1  ;;  %v1243_v45 = vsel %vm341_vm5, %v1187_v41, 0  ;;  %v1554_v41 = vld [vmem:[%s6345_s1 + $0xc8] sm:$0xff] }
 0x3df   :  { %v896_v55 = vpop.f32.mrb[20].mxu0 }
 0x3e0   :  { %v907_v57 = vpack.c.bf16 %v896_v55, %v896_v55  ;;  %v4604_v59 = vpop.f32.mrb[21].mxu0 }
 0x3e1   :  { %v899_v60 = vpop.f32.mrb[22].mxu0 }
 0x3e2   :  { %v912_v61 = vsel %vm125_vm1, %v907_v57, 0  ;;  %v4605_v62 = vpop.f32.mrb[23].mxu0  ;;  %v1367_v57 = vld [vmem:[%s6345_s1 + $0xa0] sm:$0xff] }
 0x3e3   :  { %4607 = vmatpush3.bf16.msra.mxu0 %v912_v61  ;;  %v1368_v59 = vpack.c.bf16 %v1367_v57, %v1366_v56 }
 0x3e4   :  { %4612 = vmatprep.subr.bf16.mxu0 %v5209_v0 }
 0x3e6   :  { %4609 = vmatmul.mubr.msk.bf16.vlgmr.msra.gmra.mrb[16].mxu0 %vm722_vm7, %v906_v1 }
 0x3e7   :  { %4613 = vmatpush3.bf16.msra.mxu0 %v958_v2  ;;  %4614 = vmatprep.mubr.msk.bf16.mxu0 %vm5210_vm0, %v5209_v0 }
 0x3e8   :  { %4650 = vmatprep.subr.bf16.mxu0 %v5209_v0 }
 0x3f2   :  { %4615 = vmatmul.mubr.msk.bf16.vlgmr.msra.gmra.mrb[16].mxu0 %vm722_vm7, %v903_v5 }
 0x3f3   :  { %4651 = vmatpush3.bf16.msra.mxu0 %v5380_v12  ;;  %4666 = vmatprep.mubr.msk.bf16.mxu0 %vm5210_vm0, %v5209_v0 }
 0x3f4   :  { %4652 = vmatprep.subr.bf16.mxu0 %v5209_v0 }
 0x3f7   :  { %4653 = vmatpush3.bf16.msra.mxu0 %v5393_v15 }
 0x3f8   :  { %4654 = vmatprep.subr.bf16.mxu0 %v5209_v0 }
 0x3fb   :  { %4655 = vmatpush3.bf16.msra.mxu0 %v5412_v17 }
 0x3fc   :  { %4656 = vmatprep.subr.bf16.mxu0 %v5209_v0 }
 0x3ff   :  { %4657 = vmatpush3.bf16.msra.mxu0 %v5426_v19 }
 0x400   :  { %4658 = vmatprep.subr.bf16.mxu0 %v5209_v0 }
 0x403   :  { %4659 = vmatpush3.bf16.msra.mxu0 %v5440_v21 }
 0x404   :  { %4660 = vmatprep.subr.bf16.mxu0 %v5209_v0 }
 0x407   :  { %4661 = vmatpush3.bf16.msra.mxu0 %v5454_v23 }
 0x408   :  { %4662 = vmatprep.subr.bf16.mxu0 %v5209_v0 }
 0x40b   :  { %4663 = vmatpush3.bf16.msra.mxu0 %v5469_v27 }
 0x40c   :  { %4664 = vmatprep.subr.bf16.mxu0 %v5209_v0 }
 0x40f   :  { %4665 = vmatpush3.bf16.msra.mxu0 %v5483_v30 }
 0x410   :  { %4682 = vmatprep.subr.bf16.mxu0 %v5209_v0 }
 0x412   :  { %4667 = vmatmul.mubr.bf16.vlgmr.msra.gmra.mrb[24].mxu0 %v5341_v52  ;;  %v817_v52 = vpop.permute.xlu1 %816 }
 0x413   :  { %4683 = vmatpush3.bf16.msra.mxu0 %v5386_v14  ;;  %4698 = vmatprep.mubr.msk.bf16.mxu0 %vm5210_vm0, %v5209_v0 }
 0x414   :  { %4684 = vmatprep.subr.bf16.mxu0 %v5209_v0 }
 0x416   :  { %v1098_v7 = vpop.permute.xlu1 %1097 }
 0x417   :  { %4685 = vmatpush3.bf16.msra.mxu0 %v5403_v16  ;;  %v1100_v11 = vadd.f32 %v1098_v7, %v5593_v46  ;;  %v1184_v46 = vld [vmem:[%s6345_s1 + $0x78] sm:$0xff] }
 0x418   :  { %4686 = vmatprep.subr.bf16.mxu0 %v5209_v0  ;;  %v1186_v48 = vpack.c.bf16 %v1185_v47, %v1184_v46 }
 0x41b   :  { %4687 = vmatpush3.bf16.msra.mxu0 %v5419_v18 }
 0x41c   :  { %4688 = vmatprep.subr.bf16.mxu0 %v5209_v0 }
 0x41f   :  { %4689 = vmatpush3.bf16.msra.mxu0 %v5433_v20 }
 0x420   :  { %4690 = vmatprep.subr.bf16.mxu0 %v5209_v0 }
 0x423   :  { %4691 = vmatpush3.bf16.msra.mxu0 %v5447_v22 }
 0x424   :  { %4692 = vmatprep.subr.bf16.mxu0 %v5209_v0 }
 0x427   :  { %4693 = vmatpush3.bf16.msra.mxu0 %v5461_v25 }
 0x428   :  { %4694 = vmatprep.subr.bf16.mxu0 %v5209_v0 }
 0x42b   :  { %4695 = vmatpush3.bf16.msra.mxu0 %v5476_v28 }
 0x42c   :  { %4696 = vmatprep.subr.bf16.mxu0 %v5209_v0 }
 0x42f   :  { %4697 = vmatpush3.bf16.msra.mxu0 %v5490_v31 }
 0x430   :  { %4722 = vmatprep.subr.bf16.mxu0 %v5209_v0 }
 0x432   :  { %4699 = vmatmul.mubr.bf16.vlgmr.msra.gmra.mrb[28].mxu0 %v5348_v58 }
 0x433   :  { %4724 = vmatprep.mubr.msk.bf16.mxu0 %vm5210_vm0, %v5209_v0 }
 0x4c5   :  { %v994_v8 = vpop.f32.mrb[16].mxu0 }
 0x4c6   :  { %v5110_v10 = vadd.f32 %v994_v8, %v817_v52  ;;  %v4616_v13 = vpop.f32.mrb[17].mxu0  ;;  %v1370_v8 = vld [vmem:[%s6345_s1 + $0xa8] sm:$0xff] }
 0x4c7   :  { %v997_v24 = vpop.f32.mrb[18].mxu0 }
 0x4c8   :  { %v5652_v26 = vadd.f32 %v5110_v10, %v1002_v9  ;;  %v4617_v29 = vpop.f32.mrb[19].mxu0  ;;  %v1371_v9 = vld [vmem:[%s6345_s1 + $0xb0] sm:$0xff] }
 0x4ca   :  { %v5655_v32 = vadd.f32 %v5652_v26, %v1100_v11 }
 0x4cc   :  { %v5659_v33 = vadd.f32 %v5652_v26, %v5655_v32 }
 0x4ce   :  { %v5663_v34 = vadd.f32 %v5659_v33, %v5655_v32 }
 0x4e5   :  { %v1178_v35 = vpop.f32.mrb[24].mxu0 }
 0x4e6   :  { %v1191_v38 = vpack.c.bf16 %v1178_v35, %v1178_v35  ;;  %v4668_v39 = vpop.f32.mrb[25].mxu0  ;;  %v1372_v35 = vpack.c.bf16 %v1371_v9, %v1370_v8  ;;  %v2007_v8 = vld [vmem:[%s6345_s1 + $0x130] sm:$0xff] }
 0x4e7   :  { %v1181_v40 = vpop.f32.mrb[26].mxu0 }
 0x4e8   :  { %v1196_v42 = vsel %vm341_vm5, %v1191_v38, 0  ;;  %v4669_v43 = vpop.f32.mrb[27].mxu0 }
 0x4e9   :  { %4671 = vmatpush3.bf16.msra.mxu1 %v1196_v42  ;;  %v1555_v42 = vld [vmem:[%s6345_s1 + $0xd0] sm:$0xff] }
 0x4ea   :  { %4676 = vmatprep.subr.bf16.mxu1 %v5209_v0 }
 0x4ec   :  { %4673 = vmatmul.mubr.msk.bf16.vlgmr.msra.gmra.mrb[40].mxu1 %vm337_vm6, %v1190_v44 }
 0x4ed   :  { %4677 = vmatpush3.bf16.msra.mxu1 %v1243_v45  ;;  %4678 = vmatprep.mubr.msk.bf16.mxu1 %vm5210_vm0, %v5209_v0 }
 0x4ee   :  { %4702 = vmatprep.subr.bf16.mxu1 %v5209_v0 }
 0x4f4   :  { %4679 = vmatmul.mubr.msk.bf16.vlgmr.msra.gmra.mrb[44].mxu1 %vm337_vm6, %v1186_v48  ;;  %v1556_v48 = vpack.c.bf16 %v1555_v42, %v1554_v41  ;;  %v1856_v42 = vmax.f32 %v5655_v32, 0.0  ;;  %v1955_v32 = vmax.f32 %v5659_v33, 0.0 }
 0x4f5   :  { %4703 = vmatpush3.bf16.msra.mxu1 %v5380_v12  ;;  %4718 = vmatprep.mubr.msk.bf16.mxu1 %vm5210_vm0, %v5209_v0 }
 0x4f6   :  { %4704 = vmatprep.subr.bf16.mxu1 %v5209_v0 }
 0x4f9   :  { %4705 = vmatpush3.bf16.msra.mxu1 %v5393_v15 }
 0x4fa   :  { %4706 = vmatprep.subr.bf16.mxu1 %v5209_v0 }
 0x4fd   :  { %4707 = vmatpush3.bf16.msra.mxu1 %v5412_v17 }
 0x4fe   :  { %4708 = vmatprep.subr.bf16.mxu1 %v5209_v0 }
 0x501   :  { %4709 = vmatpush3.bf16.msra.mxu1 %v5426_v19 }
 0x502   :  { %4710 = vmatprep.subr.bf16.mxu1 %v5209_v0 }
 0x505   :  { %4711 = vmatpush3.bf16.msra.mxu1 %v5440_v21  ;;  %v1320_v49 = vpop.f32.mrb[28].mxu0 }
 0x506   :  { %v4700_v50 = vpop.f32.mrb[29].mxu0  ;;  %4712 = vmatprep.subr.bf16.mxu1 %v5209_v0  ;;  %v1369_v54 = vpack.c.bf16 %v1320_v49, %v1320_v49  ;;  %v1550_v49 = vld [vmem:[%s6345_s1 + $0xb8] sm:$0xff] }
 0x507   :  { %v1323_v51 = vpop.f32.mrb[30].mxu0  ;;  %v1551_v50 = vld [vmem:[%s6345_s1 + $0xc0] sm:$0xff] }
 0x508   :  { %v4701_v53 = vpop.f32.mrb[31].mxu0  ;;  %v1425_v55 = vsel %vm341_vm5, %v1369_v54, 0  ;;  %v1552_v57 = vpack.c.bf16 %v1551_v50, %v1550_v49 }
 0x509   :  { %4713 = vmatpush3.bf16.msra.mxu1 %v5454_v23 }
 0x50a   :  { %4714 = vmatprep.subr.bf16.mxu1 %v5209_v0 }
 0x50d   :  { %4715 = vmatpush3.bf16.msra.mxu1 %v5469_v27 }
 0x50e   :  { %4716 = vmatprep.subr.bf16.mxu1 %v5209_v0 }
 0x511   :  { %4717 = vmatpush3.bf16.msra.mxu1 %v5483_v30 }
 0x512   :  { %4728 = vmatprep.subr.bf16.mxu1 %v5209_v0 }
 0x514   :  { %4719 = vmatmul.mubr.bf16.vlgmr.msra.gmra.mrb[48].mxu1 %v5348_v58 }
 0x515   :  { %4729 = vmatpush3.bf16.msra.mxu1 %v1425_v55  ;;  %4730 = vmatprep.mubr.msk.bf16.mxu1 %vm5210_vm0, %v5209_v0 }
 0x516   :  { %4754 = vmatprep.subr.bf16.mxu1 %v5209_v0 }
 0x51c   :  { %4731 = vmatmul.mubr.msk.bf16.vlgmr.msra.gmra.mrb[52].mxu1 %vm337_vm6, %v1368_v59 }
 0x51d   :  { %4755 = vmatpush3.bf16.msra.mxu1 %v5380_v12  ;;  %4770 = vmatprep.mubr.msk.bf16.mxu1 %vm5210_vm0, %v5209_v0 }
 0x51e   :  { %4756 = vmatprep.subr.bf16.mxu1 %v5209_v0 }
 0x521   :  { %4757 = vmatpush3.bf16.msra.mxu1 %v5393_v15 }
 0x522   :  { %4758 = vmatprep.subr.bf16.mxu1 %v5209_v0 }
 0x525   :  { %4759 = vmatpush3.bf16.msra.mxu1 %v5412_v17 }
 0x526   :  { %4760 = vmatprep.subr.bf16.mxu1 %v5209_v0 }
 0x529   :  { %4761 = vmatpush3.bf16.msra.mxu1 %v5426_v19 }
 0x52a   :  { %4762 = vmatprep.subr.bf16.mxu1 %v5209_v0 }
 0x52d   :  { %4763 = vmatpush3.bf16.msra.mxu1 %v5440_v21 }
 0x52e   :  { %4764 = vmatprep.subr.bf16.mxu1 %v5209_v0 }
 0x531   :  { %4765 = vmatpush3.bf16.msra.mxu1 %v5454_v23 }
 0x532   :  { %4766 = vmatprep.subr.bf16.mxu1 %v5209_v0 }
 0x535   :  { %4767 = vmatpush3.bf16.msra.mxu1 %v5469_v27 }
 0x536   :  { %4768 = vmatprep.subr.bf16.mxu1 %v5209_v0 }
 0x539   :  { %4769 = vmatpush3.bf16.msra.mxu1 %v5483_v30 }
 0x53a   :  { %4780 = vmatprep.subr.bf16.mxu1 %v5209_v0 }
 0x53c   :  { %4771 = vmatmul.mubr.bf16.vlgmr.msra.gmra.mrb[56].mxu1 %v5352_v63 }
 0x53d   :  { %4782 = vmatprep.mubr.msk.bf16.mxu1 %vm5210_vm0, %v5209_v0 }
 0x5bf   :  { %v1232_v58 = vpop.f32.mrb[40].mxu1 }
 0x5c0   :  { %v4674_v60 = vpop.f32.mrb[41].mxu1 }
 0x5c1   :  { %v1235_v4 = vpop.f32.mrb[42].mxu1 }
 0x5c2   :  { %v4675_v61 = vpop.f32.mrb[43].mxu1 }
 0x5c7   :  { %v1279_v62 = vpop.f32.mrb[44].mxu1 }
 0x5c8   :  { %v5738_v1 = vadd.f32 %v1279_v62, %v1232_v58  ;;  %v4680_v2 = vpop.f32.mrb[45].mxu1  ;;  %v2009_v62 = vmax.f32 %v5663_v34, 0.0 }
 0x5c9   :  { %v1282_v3 = vpop.f32.mrb[46].mxu1  ;;  %v1848_v2 = vld [vmem:[%s6345_s1 + $0xf8] sm:$0xff] }
 0x5ca   :  { %v5740_v5 = vadd.f32 %v1282_v3, %v1235_v4  ;;  %v4681_v52 = vpop.f32.mrb[47].mxu1  ;;  %v1849_v3 = vld [vmem:[%s6345_s1 + $0x100] sm:$0xff] }
 0x5cb   :  { %v1850_v34 = vpack.c.bf16 %v1849_v3, %v1848_v2 }
 0x5e7   :  { %v1360_v7 = vpop.f32.mrb[48].mxu1 }
 0x5e8   :  { %v1373_v10 = vpack.c.bf16 %v1360_v7, %v1360_v7  ;;  %v4720_v11 = vpop.f32.mrb[49].mxu1  ;;  %v2006_v7 = vld [vmem:[%s6345_s1 + $0x128] sm:$0xff] }
 0x5e9   :  { %v1363_v13 = vpop.f32.mrb[50].mxu1  ;;  %v2008_v9 = vpack.c.bf16 %v2007_v8, %v2006_v7  ;;  %v5886_v11 = vld [vmem:[%s6344_s2] sm:$0xff] }
 0x5ea   :  { %v1378_v24 = vsel %vm341_vm5, %v1373_v10, 0  ;;  %v4721_v29 = vpop.f32.mrb[51].mxu1  ;;  %v5219_v10 = vmov 8   ;;  %v5892_v13 = vld [vmem:[%s6344_s2 + $0x8] sm:$0xff] }
 0x5eb   :  { %4723 = vmatpush3.bf16.msra.mxu0 %v1378_v24  ;;  %5166 = vset.pattern.permute.xlu1 %v5219_v10  ;;  %v5220_v24 = vmov 9  }
 0x5ec   :  { %4734 = vmatprep.subr.bf16.mxu0 %v5209_v0  ;;  %5167 = vset.pattern.permute.xlu0 %v5219_v10 }
 0x5ed   :  { %1839 = vperm.xlu1 %5166, %v5886_v11   ;;  %1843 = vperm.xlu0 %5167, %v5892_v13  }
 0x5ee   :  { %4725 = vmatmul.mubr.msk.bf16.vlgmr.msra.gmra.mrb[32].mxu0 %vm337_vm6, %v1372_v35 }
 0x5ef   :  { %4735 = vmatpush3.bf16.msra.mxu0 %v5386_v14  ;;  %v1461_v36 = vpop.f32.mrb[52].mxu1  ;;  %4750 = vmatprep.mubr.msk.bf16.mxu0 %vm5210_vm0, %v5209_v0 }
 0x5f0   :  { %4736 = vmatprep.subr.bf16.mxu0 %v5209_v0  ;;  %v4732_v37 = vpop.f32.mrb[53].mxu1 }
 0x5f1   :  { %v1464_v38 = vpop.f32.mrb[54].mxu1  ;;  %5168 = vset.pattern.permute.xlu1 %v5220_v24 }
 0x5f2   :  { %v4733_v39 = vpop.f32.mrb[55].mxu1  ;;  %2061 = vperm.xlu1 %5168, %v5886_v11  }
 0x5f3   :  { %4737 = vmatpush3.bf16.msra.mxu0 %v5403_v16 }
 0x5f4   :  { %4738 = vmatprep.subr.bf16.mxu0 %v5209_v0 }
 0x5f6   :  { %2065 = vperm.xlu1 %5168, %v5892_v13  }
 0x5f7   :  { %4739 = vmatpush3.bf16.msra.mxu0 %v5419_v18 }
 0x5f8   :  { %4740 = vmatprep.subr.bf16.mxu0 %v5209_v0 }
 0x5fb   :  { %4741 = vmatpush3.bf16.msra.mxu0 %v5433_v20 }
 0x5fc   :  { %4742 = vmatprep.subr.bf16.mxu0 %v5209_v0 }
 0x5ff   :  { %4743 = vmatpush3.bf16.msra.mxu0 %v5447_v22 }
 0x600   :  { %4744 = vmatprep.subr.bf16.mxu0 %v5209_v0 }
 0x603   :  { %4745 = vmatpush3.bf16.msra.mxu0 %v5461_v25 }
 0x604   :  { %4746 = vmatprep.subr.bf16.mxu0 %v5209_v0 }
 0x607   :  { %4747 = vmatpush3.bf16.msra.mxu0 %v5476_v28 }
 0x608   :  { %4748 = vmatprep.subr.bf16.mxu0 %v5209_v0 }
 0x60b   :  { %4749 = vmatpush3.bf16.msra.mxu0 %v5490_v31 }
 0x60c   :  { %4774 = vmatprep.subr.bf16.mxu0 %v5209_v0 }
 0x60e   :  { %4751 = vmatmul.mubr.bf16.vlgmr.msra.gmra.mrb[36].mxu0 %v5352_v63 }
 0x60f   :  { %v1544_v40 = vpop.f32.mrb[56].mxu1  ;;  %4776 = vmatprep.mubr.msk.bf16.mxu0 %vm5210_vm0, %v5209_v0 }
 0x610   :  { %v1557_v43 = vpack.c.bf16 %v1544_v40, %v1544_v40  ;;  %v4772_v44 = vpop.f32.mrb[57].mxu1 }
 0x611   :  { %v1547_v45 = vpop.f32.mrb[58].mxu1  ;;  %v1738_v44 = vld [vmem:[%s6345_s1 + $0xe8] sm:$0xff] }
 0x612   :  { %v1562_v46 = vsel %vm341_vm5, %v1557_v43, 0  ;;  %v4773_v47 = vpop.f32.mrb[59].mxu1  ;;  %v1739_v45 = vld [vmem:[%s6345_s1 + $0xf0] sm:$0xff] }
 0x613   :  { %4775 = vmatpush3.bf16.msra.mxu0 %v1562_v46 }
 0x614   :  { %4786 = vmatprep.subr.bf16.mxu0 %v5209_v0 }
 0x616   :  { %4777 = vmatmul.mubr.msk.bf16.vlgmr.msra.gmra.mrb[40].mxu0 %vm337_vm6, %v1556_v48 }
 0x617   :  { %4787 = vmatpush3.bf16.msra.mxu0 %v5386_v14  ;;  %4802 = vmatprep.mubr.msk.bf16.mxu0 %vm5210_vm0, %v5209_v0 }
 0x618   :  { %4788 = vmatprep.subr.bf16.mxu0 %v5209_v0 }
 0x61b   :  { %4789 = vmatpush3.bf16.msra.mxu0 %v5403_v16 }
 0x61c   :  { %4790 = vmatprep.subr.bf16.mxu0 %v5209_v0 }
 0x61f   :  { %4791 = vmatpush3.bf16.msra.mxu0 %v5419_v18 }
 0x620   :  { %4792 = vmatprep.subr.bf16.mxu0 %v5209_v0 }
 0x623   :  { %4793 = vmatpush3.bf16.msra.mxu0 %v5433_v20 }
 0x624   :  { %4794 = vmatprep.subr.bf16.mxu0 %v5209_v0 }
 0x627   :  { %4795 = vmatpush3.bf16.msra.mxu0 %v5447_v22 }
 0x628   :  { %4796 = vmatprep.subr.bf16.mxu0 %v5209_v0 }
 0x62b   :  { %4797 = vmatpush3.bf16.msra.mxu0 %v5461_v25 }
 0x62c   :  { %4798 = vmatprep.subr.bf16.mxu0 %v5209_v0 }
 0x62f   :  { %4799 = vmatpush3.bf16.msra.mxu0 %v5476_v28 }
 0x630   :  { %4800 = vmatprep.subr.bf16.mxu0 %v5209_v0 }
 0x633   :  { %4801 = vmatpush3.bf16.msra.mxu0 %v5490_v31 }
 0x634   :  { %4826 = vmatprep.subr.bf16.mxu0 %v5209_v0 }
 0x636   :  { %4803 = vmatmul.mubr.bf16.vlgmr.msra.gmra.mrb[44].mxu0 %v5357_v6 }
 0x637   :  { %4828 = vmatprep.mubr.msk.bf16.mxu0 %vm5210_vm0, %v5209_v0 }
 0x6c1   :  { %v1414_v63 = vpop.f32.mrb[32].mxu0 }
 0x6c2   :  { %v1462_v14 = vadd.f32 %v1461_v36, %v1414_v63  ;;  %v4726_v16 = vpop.f32.mrb[33].mxu0 }
 0x6c3   :  { %v1417_v18 = vpop.f32.mrb[34].mxu0  ;;  %v1740_v16 = vpack.c.bf16 %v1739_v45, %v1738_v44 }
 0x6c4   :  { %v5803_v20 = vadd.f32 %v1462_v14, %v5738_v1  ;;  %v1465_v22 = vadd.f32 %v1464_v38, %v1417_v18  ;;  %v4727_v25 = vpop.f32.mrb[35].mxu0  ;;  %v5913_v18 = vpack.c.bf16 %v1856_v42, %v1856_v42 }
 0x6c5   :  { %v1854_v25 = vld [vmem:[%s6345_s1 + $0x110] sm:$0xff] }
 0x6c6   :  { %v5806_v28 = vadd.f32 %v1465_v22, %v5740_v5  ;;  %v5866_v5 = vpack.c.bf16 %v2009_v62, %v2009_v62  ;;  %v1853_v22 = vld [vmem:[%s6345_s1 + $0x108] sm:$0xff] }
 0x6c7   :  { %v1855_v49 = vpack.c.bf16 %v1854_v25, %v1853_v22 }
 0x6c8   :  { %v2015_v52 = vsel %vm125_vm1, %v5866_v5, 0 }
 0x6e1   :  { %v1504_v31 = vpop.f32.mrb[36].mxu0 }
 0x6e2   :  { %v1553_v51 = vpack.c.bf16 %v1504_v31, %v1504_v31  ;;  %v4752_v53 = vpop.f32.mrb[37].mxu0  ;;  %v5929_v31 = vpack.c.bf16 %v1955_v32, %v1955_v32 }
 0x6e3   :  { %v1507_v54 = vpop.f32.mrb[38].mxu0  ;;  %v1953_v53 = vld [vmem:[%s6345_s1 + $0x120] sm:$0xff] }
 0x6e4   :  { %v1609_v55 = vsel %vm341_vm5, %v1553_v51, 0  ;;  %v4753_v56 = vpop.f32.mrb[39].mxu0  ;;  %v1961_v50 = vsel %vm125_vm1, %v5929_v31, 0  ;;  %v1952_v51 = vld [vmem:[%s6345_s1 + $0x118] sm:$0xff] }
 0x6e5   :  { %4781 = vmatpush3.bf16.msra.mxu1 %v1609_v55  ;;  %v1954_v54 = vpack.c.bf16 %v1953_v53, %v1952_v51  ;;  %v2187_v53 = vld [vmem:[%s6345_s1 + $0x148] sm:$0xff] }
 0x6e6   :  { %4806 = vmatprep.subr.bf16.mxu1 %v5209_v0 }
 0x6e8   :  { %4783 = vmatmul.mubr.msk.bf16.vlgmr.msra.gmra.mrb[60].mxu1 %vm337_vm6, %v1552_v57  ;;  %v5949_v57 = vld [vmem:[%s6348_s5] sm:$0xff]  }
 0x6e9   :  { %4807 = vmatpush3.bf16.msra.mxu1 %v5380_v12  ;;  %v5818_v59 = vpop.f32.mrb[40].mxu0  ;;  %4822 = vmatprep.mubr.msk.bf16.mxu1 %vm5210_vm0, %v5209_v0  ;;  %v1851_v12 = vmax.f32 %v5652_v26, 0.0 }
 0x6ea   :  { %4808 = vmatprep.subr.bf16.mxu1 %v5209_v0  ;;  %v4778_v58 = vpop.f32.mrb[41].mxu0 }
 0x6eb   :  { %v5823_v60 = vpop.f32.mrb[42].mxu0 }
 0x6ec   :  { %v4779_v4 = vpop.f32.mrb[43].mxu0 }
 0x6ed   :  { %4809 = vmatpush3.bf16.msra.mxu1 %v5393_v15  ;;  %v5963_v4 = vld [vmem:[%s6348_s5 + $0x8] sm:$0xff]  }
 0x6ee   :  { %4810 = vmatprep.subr.bf16.mxu1 %v5209_v0 }
 0x6f1   :  { %4811 = vmatpush3.bf16.msra.mxu1 %v5412_v17  ;;  %v1734_v17 = vld [vmem:[%s6345_s1 + $0xd8] sm:$0xff] }
 0x6f2   :  { %4812 = vmatprep.subr.bf16.mxu1 %v5209_v0 }
 0x6f5   :  { %4813 = vmatpush3.bf16.msra.mxu1 %v5426_v19  ;;  %v1735_v19 = vld [vmem:[%s6345_s1 + $0xe0] sm:$0xff] }
 0x6f6   :  { %4814 = vmatprep.subr.bf16.mxu1 %v5209_v0  ;;  %v1736_v61 = vpack.c.bf16 %v1735_v19, %v1734_v17 }
 0x6f9   :  { %4815 = vmatpush3.bf16.msra.mxu1 %v5440_v21 }
 0x6fa   :  { %4816 = vmatprep.subr.bf16.mxu1 %v5209_v0 }
 0x6fd   :  { %4817 = vmatpush3.bf16.msra.mxu1 %v5454_v23 }
 0x6fe   :  { %4818 = vmatprep.subr.bf16.mxu1 %v5209_v0 }
 0x701   :  { %4819 = vmatpush3.bf16.msra.mxu1 %v5469_v27 }
 0x702   :  { %4820 = vmatprep.subr.bf16.mxu1 %v5209_v0 }
 0x705   :  { %4821 = vmatpush3.bf16.msra.mxu1 %v5483_v30  ;;  %v5849_v30 = vpack.c.bf16 %v1851_v12, %v1851_v12  ;;  %v5968_v12 = vld [vmem:[%s6349_s6 + $0x8] sm:$0xff]  }
 0x706   :  { %4832 = vmatprep.subr.bf16.mxu1 %v5209_v0 }
 0x707   :  { %v1909_v1 = vsel %vm125_vm1, %v5849_v30, 0 }
 0x708   :  { %4823 = vmatmul.mubr.bf16.vlgmr.msra.gmra.mrb[64].mxu1 %v5357_v6 }
 0x709   :  { %v1688_v15 = vpop.f32.mrb[44].mxu0  ;;  %4834 = vmatprep.mubr.msk.bf16.mxu1 %vm5210_vm0, %v5209_v0 }
 0x70a   :  { %v1737_v21 = vpack.c.bf16 %v1688_v15, %v1688_v15  ;;  %v4804_v23 = vpop.f32.mrb[45].mxu0 }
 0x70b   :  { %v1691_v27 = vpop.f32.mrb[46].mxu0 }
 0x70c   :  { %v1793_v26 = vsel %vm341_vm5, %v1737_v21, 0  ;;  %v4805_v6 = vpop.f32.mrb[47].mxu0 }
 0x70d   :  { %4833 = vmatpush3.bf16.msra.mxu1 %v1793_v26 }
 0x70e   :  { %4844 = vmatprep.subr.bf16.mxu1 %v5209_v0 }
 0x710   :  { %4835 = vmatmul.mubr.msk.bf16.vlgmr.msra.gmra.mrb[68].mxu1 %vm337_vm6, %v1736_v61 }
 0x711   :  { %4845 = vmatpush3.bf16.msra.mxu1 %v1909_v1  ;;  %4846 = vmatprep.mubr.msk.bf16.mxu1 %vm5210_vm0, %v5209_v0  ;;  %v1840_v1 = vpop.permute.xlu1 %1839 }
 0x712   :  { %4856 = vmatprep.subr.bf16.mxu1 %v5209_v0 }
 0x718   :  { %4847 = vmatmul.mubr.msk.bf16.vlgmr.msra.gmra.mrb[72].mxu1 %vm722_vm7, %v1850_v34 }
 0x719   :  { %4857 = vmatpush3.bf16.msra.mxu1 %v2015_v52  ;;  %4858 = vmatprep.mubr.msk.bf16.mxu1 %vm5210_vm0, %v5209_v0  ;;  %v1844_v52 = vpop.permute.xlu0 %1843 }
 0x71a   :  { %4870 = vmatprep.subr.bf16.mxu1 %v5209_v0 }
 0x720   :  { %4859 = vmatmul.mubr.msk.bf16.vlgmr.msra.gmra.mrb[76].mxu1 %vm722_vm7, %v2008_v9 }
 0x721   :  { %4874 = vmatprep.mubr.msk.bf16.mxu1 %vm5210_vm0, %v5209_v0 }
 0x7bb   :  { %v1645_v29 = vpop.f32.mrb[60].mxu1 }
 0x7bc   :  { %v1646_v35 = vadd.f32 %v1645_v29, %v5818_v59  ;;  %v4784_v36 = vpop.f32.mrb[61].mxu1  ;;  %v5954_v59 = vld [vmem:[%s6349_s6] sm:$0xff]  }
 0x7bd   :  { %v1648_v37 = vpop.f32.mrb[62].mxu1  ;;  %4871 = vmatpush3.bf16.msra.mxu1 %v5954_v59 }
 0x7be   :  { %v5899_v38 = vadd.f32 %v1646_v35, %v5803_v20  ;;  %v1649_v39 = vadd.f32 %v1648_v37, %v5823_v60  ;;  %v4785_v40 = vpop.f32.mrb[63].mxu1  ;;  %v1862_v20 = vsel %vm125_vm1, %v5913_v18, 0  ;;  %4872 = vmatprep.subr.bf16.mxu1 %v5209_v0 }
 0x7c0   :  { %v5903_v41 = vadd.f32 %v1649_v39, %v5806_v28 }
 0x7c1   :  { %4873 = vmatpush3.bf16.msra.mxu1 %v5968_v12 }
 0x7c2   :  { %4890 = vmatprep.subr.bf16.mxu1 %v5209_v0 }
 0x7db   :  { %v1728_v43 = vpop.f32.mrb[64].mxu1 }
 0x7dc   :  { %v1741_v46 = vpack.c.bf16 %v1728_v43, %v1728_v43  ;;  %v4824_v47 = vpop.f32.mrb[65].mxu1 }
 0x7dd   :  { %v1731_v48 = vpop.f32.mrb[66].mxu1 }
 0x7de   :  { %v1746_v63 = vsel %vm341_vm5, %v1741_v46, 0  ;;  %v4825_v14 = vpop.f32.mrb[67].mxu1 }
 0x7df   :  { %4827 = vmatpush3.bf16.msra.mxu0 %v1746_v63 }
 0x7e0   :  { %4838 = vmatprep.subr.bf16.mxu0 %v5209_v0 }
 0x7e2   :  { %4829 = vmatmul.mubr.msk.bf16.vlgmr.msra.gmra.mrb[48].mxu0 %vm337_vm6, %v1740_v16 }
 0x7e3   :  { %4839 = vmatpush3.bf16.msra.mxu0 %v1862_v20  ;;  %4840 = vmatprep.mubr.msk.bf16.mxu0 %vm5210_vm0, %v5209_v0  ;;  %v1829_v28 = vpop.f32.mrb[68].mxu1 }
 0x7e4   :  { %4850 = vmatprep.subr.bf16.mxu0 %v5209_v0  ;;  %v4836_v33 = vpop.f32.mrb[69].mxu1 }
 0x7e5   :  { %v1832_v55 = vpop.f32.mrb[70].mxu1  ;;  %v5222_v33 = vmov 11  }
 0x7e6   :  { %v4837_v56 = vpop.f32.mrb[71].mxu1 }
 0x7e7   :  { %v2188_v56 = vld [vmem:[%s6345_s1 + $0x150] sm:$0xff] }
 0x7ea   :  { %4841 = vmatmul.mubr.msk.bf16.vlgmr.msra.gmra.mrb[52].mxu0 %vm722_vm7, %v1855_v49  ;;  %v5223_v49 = vmov 12  }
 0x7eb   :  { %4851 = vmatpush3.bf16.msra.mxu0 %v1961_v50  ;;  %4852 = vmatprep.mubr.msk.bf16.mxu0 %vm5210_vm0, %v5209_v0  ;;  %v1945_v58 = vpop.f32.mrb[72].mxu1 }
 0x7ec   :  { %4862 = vmatprep.subr.bf16.mxu0 %v5209_v0  ;;  %v4848_v60 = vpop.f32.mrb[73].mxu1 }
 0x7ed   :  { %v1948_v15 = vpop.f32.mrb[74].mxu1  ;;  %v2490_v60 = vld [vmem:[%s6345_s1 + $0x190] sm:$0xff] }
 0x7ee   :  { %v4849_v17 = vpop.f32.mrb[75].mxu1 }
 0x7f2   :  { %4853 = vmatmul.mubr.msk.bf16.vlgmr.msra.gmra.mrb[56].mxu0 %vm722_vm7, %v1954_v54 }
 0x7f3   :  { %4866 = vmatprep.mubr.msk.bf16.mxu0 %vm5210_vm0, %v5209_v0  ;;  %4863 = vmatpush3.bf16.msra.mxu0 %v5949_v57  ;;  %v2051_v19 = vpop.f32.mrb[76].mxu1 }
 0x7f4   :  { %4864 = vmatprep.subr.bf16.mxu0 %v5209_v0  ;;  %v4860_v21 = vpop.f32.mrb[77].mxu1 }
 0x7f5   :  { %v2054_v23 = vpop.f32.mrb[78].mxu1 }
 0x7f6   :  { %v4861_v27 = vpop.f32.mrb[79].mxu1 }
 0x7f7   :  { %4865 = vmatpush3.bf16.msra.mxu0 %v5963_v4 }
 0x7f8   :  { %4878 = vmatprep.subr.bf16.mxu0 %v5209_v0 }
 0x8b5   :  { %v1782_v26 = vpop.f32.mrb[48].mxu0 }
 0x8b6   :  { %v1830_v6 = vadd.f32 %v1829_v28, %v1782_v26  ;;  %v4830_v61 = vpop.f32.mrb[49].mxu0  ;;  %v5221_v28 = vmov 10   ;;  %v2189_v26 = vpack.c.bf16 %v2188_v56, %v2187_v53 }
 0x8b7   :  { %v1785_v62 = vpop.f32.mrb[50].mxu0  ;;  %5170 = vset.pattern.permute.xlu1 %v5221_v28  ;;  %5169 = vset.pattern.permute.xlu0 %v5221_v28  ;;  %v2486_v61 = vld [vmem:[%s6345_s1 + $0x178] sm:$0xff] }
 0x8b8   :  { %v1833_v2 = vadd.f32 %v1832_v55, %v1785_v62  ;;  %v4831_v3 = vpop.f32.mrb[51].mxu0  ;;  %v1836_v34 = vadd.f32 %v1830_v6, %v5899_v38  ;;  %v2062_v38 = vpop.permute.xlu1 %2061  ;;  %2285 = vperm.xlu1 %5170, %v5892_v13   ;;  %2281 = vperm.xlu0 %5169, %v5886_v11   ;;  %v2487_v62 = vld [vmem:[%s6345_s1 + $0x180] sm:$0xff] }
 0x8b9   :  { %v2184_v3 = vld [vmem:[%s6345_s1 + $0x140] sm:$0xff] }
 0x8ba   :  { %v1846_v7 = vadd.f32 %v1840_v1, %v1836_v34  ;;  %v1837_v8 = vadd.f32 %v1833_v2, %v5903_v41  ;;  %v2488_v1 = vpack.c.bf16 %v2487_v62, %v2486_v61  ;;  %v2183_v2 = vld [vmem:[%s6345_s1 + $0x138] sm:$0xff] }
 0x8bc   :  { %v1847_v9 = vadd.f32 %v1844_v52, %v1837_v8  ;;  %v2070_v24 = vmax.f32 %v1846_v7, 0.0  ;;  %v2066_v16 = vpop.permute.xlu1 %2065  ;;  %5171 = vset.pattern.permute.xlu1 %v5222_v33  ;;  %5172 = vset.pattern.permute.xlu0 %v5222_v33  ;;  %v2185_v52 = vpack.c.bf16 %v2184_v3, %v2183_v2 }
 0x8bd   :  { %v1898_v10 = vpop.f32.mrb[52].mxu0  ;;  %2475 = vperm.xlu1 %5171, %v5886_v11   ;;  %2479 = vperm.xlu0 %5172, %v5892_v13  }
 0x8be   :  { %v2071_v29 = vmax.f32 %v1847_v9, 0.0  ;;  %v1946_v35 = vadd.f32 %v1945_v58, %v1898_v10  ;;  %v4842_v36 = vpop.f32.mrb[53].mxu0  ;;  %v2489_v58 = vld [vmem:[%s6345_s1 + $0x188] sm:$0xff] }
 0x8bf   :  { %v1901_v37 = vpop.f32.mrb[54].mxu0  ;;  %v2491_v6 = vpack.c.bf16 %v2490_v60, %v2489_v58  ;;  %v2383_v36 = vld [vmem:[%s6345_s1 + $0x170] sm:$0xff] }
 0x8c0   :  { %v2072_v39 = vpack.c.bf16 %v2071_v29, %v2070_v24  ;;  %v1949_v40 = vadd.f32 %v1948_v15, %v1901_v37  ;;  %v4843_v42 = vpop.f32.mrb[55].mxu0 }
 0x8c1   :  { %5173 = vset.pattern.permute.xlu1 %v5223_v49 }
 0x8c2   :  { %4867 = vmatmul.mubr.msk.bf16.vlgmr.msra.gmra.mrb[60].mxu0 %vm2085_vm8, %v2072_v39  ;;  %4875 = vmatmul.mubr.msk.bf16.vlgmr.msra.gmra.mrb[80].mxu1 %vm2085_vm8, %v2072_v39 }
 0x8c3   :  { %4891 = vmatpush3.bf16.msra.mxu1 %v5949_v57  ;;  %4894 = vmatprep.mubr.msk.bf16.mxu1 %vm5210_vm0, %v5209_v0 }
 0x8c4   :  { %4892 = vmatprep.subr.bf16.mxu1 %v5209_v0  ;;  %4880 = vmatprep.mubr.msk.bf16.mxu0 %vm5210_vm0, %v5209_v0 }
 0x8c5   :  { %v1997_v41 = vpop.f32.mrb[56].mxu0  ;;  %2581 = vperm.xlu1 %5173, %v5886_v11  }
 0x8c6   :  { %v2004_v43 = vadd.f32 %v1997_v41, %v1946_v35  ;;  %v4854_v44 = vpop.f32.mrb[57].mxu0  ;;  %v2382_v35 = vld [vmem:[%s6345_s1 + $0x168] sm:$0xff]  ;;  %v2379_v41 = vld [vmem:[%s6345_s1 + $0x160] sm:$0xff] }
 0x8c7   :  { %v2000_v45 = vpop.f32.mrb[58].mxu0  ;;  %4893 = vmatpush3.bf16.msra.mxu1 %v5963_v4  ;;  %v2384_v42 = vpack.c.bf16 %v2383_v36, %v2382_v35  ;;  %v2678_v35 = vld [vmem:[%s6345_s1 + $0x198] sm:$0xff]  ;;  %v2679_v36 = vld [vmem:[%s6345_s1 + $0x1a0] sm:$0xff] }
 0x8c8   :  { %v2058_v46 = vadd.f32 %v2051_v19, %v2004_v43  ;;  %v2005_v47 = vadd.f32 %v2000_v45, %v1949_v40  ;;  %v4855_v48 = vpop.f32.mrb[59].mxu0  ;;  %4898 = vmatprep.subr.bf16.mxu1 %v5209_v0 }
 0x8c9   :  { %2585 = vperm.xlu1 %5173, %v5892_v13  }
 0x8ca   :  { %v2068_v63 = vadd.f32 %v2062_v38, %v2058_v46  ;;  %v2059_v14 = vadd.f32 %v2054_v23, %v2005_v47  ;;  %v2378_v38 = vld [vmem:[%s6345_s1 + $0x158] sm:$0xff] }
 0x8cb   :  { %v2380_v43 = vpack.c.bf16 %v2379_v41, %v2378_v38 }
 0x8cc   :  { %v2069_v32 = vadd.f32 %v2066_v16, %v2059_v14  ;;  %v2290_v20 = vmax.f32 %v2068_v63, 0.0 }
 0x8ce   :  { %v2291_v22 = vmax.f32 %v2069_v32, 0.0 }
 0x8d0   :  { %v2292_v25 = vpack.c.bf16 %v2291_v22, %v2290_v20 }
 0x8d2   :  { %4895 = vmatmul.mubr.msk.bf16.vlgmr.msra.gmra.mrb[84].mxu1 %vm2085_vm8, %v2292_v25 }
 0x8d3   :  { %4899 = vmatpush3.bf16.msra.mxu1 %v5954_v59  ;;  %4902 = vmatprep.mubr.msk.bf16.mxu1 %vm5210_vm0, %v5209_v0 }
 0x8d4   :  { %4900 = vmatprep.subr.bf16.mxu1 %v5209_v0 }
 0x8d7   :  { %4901 = vmatpush3.bf16.msra.mxu1 %v5968_v12 }
 0x8d8   :  { %4918 = vmatprep.subr.bf16.mxu1 %v5209_v0 }
 0x8da   :  { %4903 = vmatmul.mubr.msk.bf16.vlgmr.msra.gmra.mrb[88].mxu1 %vm2085_vm8, %v2292_v25  ;;  %v2682_v25 = vld [vmem:[%s6345_s1 + $0x1a8] sm:$0xff] }
 0x8db   :  { %4920 = vmatprep.mubr.msk.bf16.mxu1 %vm5210_vm0, %v5209_v0 }
 0x937   :  { %v2282_v58 = vpop.permute.xlu0 %2281 }
 0x995   :  { %v2123_v50 = vpop.f32.mrb[60].mxu0  ;;  %v2176_v51 = vpop.f32.mrb[80].mxu1 }
 0x996   :  { %v4868_v54 = vpop.f32.mrb[61].mxu0  ;;  %v4876_v55 = vpop.f32.mrb[81].mxu1 }
 0x997   :  { %v2126_v15 = vpop.f32.mrb[62].mxu0  ;;  %v2179_v17 = vpop.f32.mrb[82].mxu1 }
 0x998   :  { %v2186_v19 = vpack.c.bf16 %v2126_v15, %v2123_v50  ;;  %v2190_v21 = vpack.c.bf16 %v2179_v17, %v2176_v51  ;;  %v4869_v23 = vpop.f32.mrb[63].mxu0  ;;  %v4877_v27 = vpop.f32.mrb[83].mxu1 }
 0x999   :  { %v2286_v54 = vpop.permute.xlu1 %2285  ;;  %v2480_v23 = vpop.permute.xlu0 %2479 }
 0x99a   :  { %4879 = vmatpush3.bf16.msra.mxu0 %v2190_v21  ;;  %4919 = vmatpush3.bf16.msra.mxu1 %v2190_v21 }
 0x99b   :  { %4884 = vmatprep.subr.bf16.mxu0 %v5209_v0  ;;  %4924 = vmatprep.subr.bf16.mxu1 %v5209_v0 }
 0x99d   :  { %4881 = vmatmul.mubr.msk.bf16.vlgmr.msra.gmra.mrb[64].mxu0 %vm2191_vm9, %v2189_v26  ;;  %4921 = vmatmul.mubr.msk.bf16.vlgmr.msra.gmra.mrb[92].mxu1 %vm2191_vm9, %v2491_v6  ;;  %v2476_v55 = vpop.permute.xlu1 %2475 }
 0x99e   :  { %4885 = vmatpush3.bf16.msra.mxu0 %v2186_v19  ;;  %4925 = vmatpush3.bf16.msra.mxu1 %v2186_v19 }
 0x99f   :  { %4926 = vmatprep.mubr.msk.bf16.mxu1 %vm5210_vm0, %v5209_v0  ;;  %4938 = vmatprep.subr.bf16.mxu1 %v5209_v0 }
 0x9a0   :  { %4886 = vmatprep.mubr.msk.bf16.mxu0 %vm5210_vm0, %v5209_v0  ;;  %4906 = vmatprep.subr.bf16.mxu0 %v5209_v0 }
 0x9a1   :  { %v2582_v56 = vpop.permute.xlu1 %2581 }
 0x9a5   :  { %v2330_v34 = vpop.f32.mrb[84].mxu1  ;;  %4927 = vmatmul.mubr.msk.bf16.vlgmr.msra.gmra.mrb[96].mxu1 %vm2191_vm9, %v2488_v1  ;;  %v2586_v15 = vpop.permute.xlu1 %2585 }
 0x9a6   :  { %v4896_v7 = vpop.f32.mrb[85].mxu1  ;;  %4939 = vmatpush3.bf16.msra.mxu1 %v5954_v59  ;;  %4942 = vmatprep.mubr.msk.bf16.mxu1 %vm5210_vm0, %v5209_v0 }
 0x9a7   :  { %v2333_v8 = vpop.f32.mrb[86].mxu1  ;;  %4940 = vmatprep.subr.bf16.mxu1 %v5209_v0 }
 0x9a8   :  { %v2381_v9 = vpack.c.bf16 %v2333_v8, %v2330_v34  ;;  %v4897_v10 = vpop.f32.mrb[87].mxu1 }
 0x9a9   :  { %4887 = vmatmul.mubr.msk.bf16.vlgmr.msra.gmra.mrb[64].mxu0 %vm2191_vm9, %v2185_v52 }
 0x9aa   :  { %4941 = vmatpush3.bf16.msra.mxu1 %v5968_v12  ;;  %4908 = vmatprep.mubr.msk.bf16.mxu0 %vm5210_vm0, %v5209_v0 }
 0x9ab   :  { %4952 = vmatprep.subr.bf16.mxu1 %v5209_v0 }
 0x9ad   :  { %v2371_v24 = vpop.f32.mrb[88].mxu1  ;;  %4943 = vmatmul.mubr.msk.bf16.vlgmr.msra.gmra.mrb[100].mxu1 %vm2085_vm8, %v5849_v30 }
 0x9ae   :  { %v4904_v29 = vpop.f32.mrb[89].mxu1  ;;  %4954 = vmatprep.mubr.msk.bf16.mxu1 %vm5210_vm0, %v5209_v0 }
 0x9af   :  { %v2374_v37 = vpop.f32.mrb[90].mxu1 }
 0x9b0   :  { %v2385_v39 = vpack.c.bf16 %v2374_v37, %v2371_v24  ;;  %v4905_v40 = vpop.f32.mrb[91].mxu1 }
 0x9b2   :  { %4907 = vmatpush3.bf16.msra.mxu0 %v2385_v39 }
 0x9b3   :  { %4912 = vmatprep.subr.bf16.mxu0 %v5209_v0 }
 0x9b5   :  { %4909 = vmatmul.mubr.msk.bf16.vlgmr.msra.gmra.mrb[64].mxu0 %vm2191_vm9, %v2384_v42 }
 0x9b6   :  { %4913 = vmatpush3.bf16.msra.mxu0 %v2381_v9  ;;  %4914 = vmatprep.mubr.msk.bf16.mxu0 %vm5210_vm0, %v5209_v0 }
 0x9b7   :  { %4930 = vmatprep.subr.bf16.mxu0 %v5209_v0 }
 0x9c1   :  { %4915 = vmatmul.mubr.msk.bf16.vlgmr.msra.gmra.mrb[64].mxu0 %vm2191_vm9, %v2380_v43 }
 0x9c2   :  { %4931 = vmatpush3.bf16.msra.mxu0 %v5949_v57  ;;  %4934 = vmatprep.mubr.msk.bf16.mxu0 %vm5210_vm0, %v5209_v0 }
 0x9c3   :  { %4932 = vmatprep.subr.bf16.mxu0 %v5209_v0 }
 0x9c6   :  { %4933 = vmatpush3.bf16.msra.mxu0 %v5963_v4 }
 0x9c7   :  { %4946 = vmatprep.subr.bf16.mxu0 %v5209_v0 }
 0x9c9   :  { %4935 = vmatmul.mubr.msk.bf16.vlgmr.msra.gmra.mrb[68].mxu0 %vm2085_vm8, %v5849_v30  ;;  %v2683_v30 = vld [vmem:[%s6345_s1 + $0x1b0] sm:$0xff] }
 0x9ca   :  { %4948 = vmatprep.mubr.msk.bf16.mxu0 %vm5210_vm0, %v5209_v0  ;;  %v2684_v53 = vpack.c.bf16 %v2683_v30, %v2682_v25 }
 0xa70   :  { %v2529_v44 = vpop.f32.mrb[92].mxu1 }
 0xa71   :  { %v4922_v45 = vpop.f32.mrb[93].mxu1 }
 0xa72   :  { %v2532_v46 = vpop.f32.mrb[94].mxu1 }
 0xa73   :  { %v4923_v47 = vpop.f32.mrb[95].mxu1 }
 0xa78   :  { %v2573_v48 = vpop.f32.mrb[96].mxu1 }
 0xa79   :  { %v2574_v63 = vadd.f32 %v2573_v48, %v2529_v44  ;;  %v4928_v14 = vpop.f32.mrb[97].mxu1 }
 0xa7a   :  { %v2576_v16 = vpop.f32.mrb[98].mxu1 }
 0xa7b   :  { %v2577_v32 = vadd.f32 %v2576_v16, %v2532_v46  ;;  %v4929_v20 = vpop.f32.mrb[99].mxu1  ;;  %v2588_v27 = vadd.f32 %v2582_v56, %v2574_v63  ;;  %v2680_v46 = vpack.c.bf16 %v2679_v36, %v2678_v35 }
 0xa7d   :  { %v2589_v62 = vadd.f32 %v2586_v15, %v2577_v32 }
 0xa80   :  { %v2672_v22 = vpop.f32.mrb[100].mxu1 }
 0xa81   :  { %v2685_v28 = vpack.c.bf16 %v2672_v22, %v2672_v22  ;;  %v4944_v33 = vpop.f32.mrb[101].mxu1 }
 0xa82   :  { %v2675_v49 = vpop.f32.mrb[102].mxu1  ;;  %v2863_v33 = vld [vmem:[%s6345_s1 + $0x1c0] sm:$0xff] }
 0xa83   :  { %v2690_v50 = vsel %vm125_vm1, %v2685_v28, 0  ;;  %v4945_v51 = vpop.f32.mrb[103].mxu1  ;;  %v2862_v28 = vld [vmem:[%s6345_s1 + $0x1b8] sm:$0xff] }
 0xa84   :  { %4947 = vmatpush3.bf16.msra.mxu0 %v2690_v50 }
 0xa85   :  { %4958 = vmatprep.subr.bf16.mxu0 %v5209_v0 }
 0xa87   :  { %4949 = vmatmul.mubr.msk.bf16.vlgmr.msra.gmra.mrb[72].mxu0 %vm722_vm7, %v2684_v53 }
 0xa88   :  { %4959 = vmatpush3.bf16.msra.mxu0 %v5949_v57  ;;  %4962 = vmatprep.mubr.msk.bf16.mxu0 %vm5210_vm0, %v5209_v0 }
 0xa89   :  { %4960 = vmatprep.subr.bf16.mxu0 %v5209_v0 }
 0xa8c   :  { %4961 = vmatpush3.bf16.msra.mxu0 %v5963_v4 }
 0xa8d   :  { %4974 = vmatprep.subr.bf16.mxu0 %v5209_v0 }
 0xa8f   :  { %4963 = vmatmul.mubr.msk.bf16.vlgmr.msra.gmra.mrb[76].mxu0 %vm2085_vm8, %v5913_v18 }
 0xa90   :  { %4976 = vmatprep.mubr.msk.bf16.mxu0 %vm5210_vm0, %v5209_v0 }
 0xa94   :  { %v2467_v60 = vpop.f32.mrb[64].mxu0 }
 0xa95   :  { %v5112_v17 = vadd.f32 %v2467_v60, %v2282_v58  ;;  %v4916_v19 = vpop.f32.mrb[65].mxu0 }
 0xa96   :  { %v2470_v21 = vpop.f32.mrb[66].mxu0 }
 0xa97   :  { %v5113_v26 = vadd.f32 %v5112_v17, %v2476_v55  ;;  %v5114_v6 = vadd.f32 %v2470_v21, %v2286_v54  ;;  %v4917_v61 = vpop.f32.mrb[67].mxu0  ;;  %v2864_v54 = vpack.c.bf16 %v2863_v33, %v2862_v28  ;;  %v2866_v21 = vld [vmem:[%s6345_s1 + $0x1c8] sm:$0xff]  ;;  %v5225_v28 = vmov 13  }
 0xa98   :  { %5174 = vset.pattern.permute.xlu0 %v5225_v28 }
 0xa99   :  { %v2590_v1 = vadd.f32 %v5113_v26, %v2588_v27  ;;  %v5115_v2 = vadd.f32 %v5114_v6, %v2480_v23  ;;  %v3351_v34 = vmax.f32 %v5113_v26, 0.0  ;;  %v2867_v23 = vld [vmem:[%s6345_s1 + $0x1d0] sm:$0xff]  ;;  %3339 = vperm.xlu0 %5174, %v5886_v11  }
 0xa9b   :  { %v2592_v3 = vadd.f32 %v5113_v26, %v2590_v1  ;;  %v2591_v52 = vadd.f32 %v5115_v2, %v2589_v62  ;;  %v3352_v7 = vmax.f32 %v5115_v2, 0.0  ;;  %v3357_v40 = vmax.f32 %v2590_v1, 0.0 }
 0xa9c   :  { %v2632_v8 = vpop.f32.mrb[68].mxu0 }
 0xa9d   :  { %v2594_v9 = vadd.f32 %v2592_v3, %v2590_v1  ;;  %v2593_v10 = vadd.f32 %v5115_v2, %v2591_v52  ;;  %v6097_v24 = vpack.c.bf16 %v3352_v7, %v3351_v34  ;;  %v4936_v29 = vpop.f32.mrb[69].mxu0  ;;  %v2681_v37 = vpack.c.bf16 %v2632_v8, %v2632_v8  ;;  %v3052_v8 = vld [vmem:[%s6345_s1 + $0x1e8] sm:$0xff] }
 0xa9e   :  { %v2635_v39 = vpop.f32.mrb[70].mxu0  ;;  %v3358_v42 = vmax.f32 %v2591_v52, 0.0  ;;  %v3451_v38 = vmax.f32 %v2592_v3, 0.0  ;;  %v2868_v1 = vpack.c.bf16 %v2867_v23, %v2866_v21 }
 0xa9f   :  { %v2595_v41 = vadd.f32 %v2593_v10, %v2591_v52  ;;  %v3452_v43 = vmax.f32 %v2593_v10, 0.0  ;;  %v4937_v44 = vpop.f32.mrb[71].mxu0  ;;  %v2737_v45 = vsel %vm125_vm1, %v2681_v37, 0  ;;  %v3503_v63 = vmax.f32 %v2594_v9, 0.0  ;;  %v3053_v9 = vld [vmem:[%s6345_s1 + $0x1f0] sm:$0xff] }
 0xaa0   :  { %v6106_v47 = vpack.c.bf16 %v3358_v42, %v3357_v40  ;;  %4953 = vmatpush3.bf16.msra.mxu1 %v2737_v45  ;;  %v3054_v37 = vpack.c.bf16 %v3053_v9, %v3052_v8 }
 0xaa1   :  { %v3504_v48 = vmax.f32 %v2595_v41, 0.0  ;;  %v6108_v14 = vpack.c.bf16 %v3452_v43, %v3451_v38  ;;  %4966 = vmatprep.subr.bf16.mxu1 %v5209_v0 }
 0xaa3   :  { %v6111_v16 = vpack.c.bf16 %v3504_v48, %v3503_v63  ;;  %4955 = vmatmul.mubr.msk.bf16.vlgmr.msra.gmra.mrb[104].mxu1 %vm722_vm7, %v2680_v46  ;;  %v3049_v46 = vld [vmem:[%s6345_s1 + $0x1e0] sm:$0xff] }
 0xaa4   :  { %4967 = vmatpush3.bf16.msra.mxu1 %v5954_v59  ;;  %4970 = vmatprep.mubr.msk.bf16.mxu1 %vm5210_vm0, %v5209_v0 }
 0xaa5   :  { %4968 = vmatprep.subr.bf16.mxu1 %v5209_v0 }
 0xaa8   :  { %4969 = vmatpush3.bf16.msra.mxu1 %v5968_v12 }
 0xaa9   :  { %4980 = vmatprep.subr.bf16.mxu1 %v5209_v0 }
 0xaab   :  { %4971 = vmatmul.mubr.msk.bf16.vlgmr.msra.gmra.mrb[108].mxu1 %vm2085_vm8, %v5913_v18 }
 0xaac   :  { %4982 = vmatprep.mubr.msk.bf16.mxu1 %vm5210_vm0, %v5209_v0 }
 0xb5a   :  { %v2726_v32 = vpop.f32.mrb[72].mxu0 }
 0xb5b   :  { %v4950_v20 = vpop.f32.mrb[73].mxu0 }
 0xb5c   :  { %v2729_v22 = vpop.f32.mrb[74].mxu0 }
 0xb5d   :  { %v4951_v25 = vpop.f32.mrb[75].mxu0 }
 0xb62   :  { %v2816_v30 = vpop.f32.mrb[76].mxu0 }
 0xb63   :  { %v2865_v49 = vpack.c.bf16 %v2816_v30, %v2816_v30  ;;  %v4964_v50 = vpop.f32.mrb[77].mxu0  ;;  %v5224_v30 = vmov 14  }
 0xb64   :  { %v2819_v51 = vpop.f32.mrb[78].mxu0  ;;  %5175 = vset.pattern.permute.xlu1 %v5224_v30  ;;  %5177 = vset.pattern.permute.xlu0 %v5224_v30  ;;  %v3234_v50 = vld [vmem:[%s6345_s1 + $0x1f8] sm:$0xff] }
 0xb65   :  { %v2921_v18 = vsel %vm125_vm1, %v2865_v49, 0  ;;  %v4965_v53 = vpop.f32.mrb[79].mxu0  ;;  %3553 = vperm.xlu1 %5175, %v5886_v11   ;;  %3557 = vperm.xlu0 %5177, %v5892_v13   ;;  %v3235_v51 = vld [vmem:[%s6345_s1 + $0x200] sm:$0xff] }
 0xb66   :  { %4981 = vmatpush3.bf16.msra.mxu1 %v2921_v18 }
 0xb67   :  { %4994 = vmatprep.subr.bf16.mxu1 %v5209_v0 }
 0xb69   :  { %4983 = vmatmul.mubr.msk.bf16.vlgmr.msra.gmra.mrb[112].mxu1 %vm722_vm7, %v2864_v54  ;;  %5176 = vset.pattern.permute.xlu1 %v5225_v28 }
 0xb6a   :  { %4995 = vmatpush3.bf16.msra.mxu1 %v5954_v59  ;;  %4998 = vmatprep.mubr.msk.bf16.mxu1 %vm5210_vm0, %v5209_v0 }
 0xb6b   :  { %4996 = vmatprep.subr.bf16.mxu1 %v5209_v0  ;;  %3343 = vperm.xlu1 %5176, %v5892_v13   ;;  %v3236_v13 = vpack.c.bf16 %v3235_v51, %v3234_v50 }
 0xb6e   :  { %4997 = vmatpush3.bf16.msra.mxu1 %v5968_v12 }
 0xb6f   :  { %5008 = vmatprep.subr.bf16.mxu1 %v5209_v0 }
 0xb71   :  { %4999 = vmatmul.mubr.msk.bf16.vlgmr.msra.gmra.mrb[116].mxu1 %vm2085_vm8, %v5929_v31 }
 0xb72   :  { %5010 = vmatprep.mubr.msk.bf16.mxu1 %vm5210_vm0, %v5209_v0 }
 0xb76   :  { %v2773_v55 = vpop.f32.mrb[104].mxu1 }
 0xb77   :  { %v2774_v56 = vadd.f32 %v2773_v55, %v2726_v32  ;;  %v4956_v58 = vpop.f32.mrb[105].mxu1 }
 0xb78   :  { %v2776_v60 = vpop.f32.mrb[106].mxu1  ;;  %v3349_v58 = vld [vmem:[%s6345_s1 + $0x220] sm:$0xff] }
 0xb79   :  { %v2777_v15 = vadd.f32 %v2776_v60, %v2729_v22  ;;  %v4957_v17 = vpop.f32.mrb[107].mxu1 }
 0xb7e   :  { %v2856_v19 = vpop.f32.mrb[108].mxu1 }
 0xb7f   :  { %v2869_v27 = vpack.c.bf16 %v2856_v19, %v2856_v19  ;;  %v4972_v26 = vpop.f32.mrb[109].mxu1 }
 0xb80   :  { %v2859_v6 = vpop.f32.mrb[110].mxu1 }
 0xb81   :  { %v2874_v61 = vsel %vm125_vm1, %v2869_v27, 0  ;;  %v4973_v62 = vpop.f32.mrb[111].mxu1 }
 0xb82   :  { %4975 = vmatpush3.bf16.msra.mxu0 %v2874_v61 }
 0xb83   :  { %4986 = vmatprep.subr.bf16.mxu0 %v5209_v0 }
 0xb85   :  { %4977 = vmatmul.mubr.msk.bf16.vlgmr.msra.gmra.mrb[80].mxu0 %vm722_vm7, %v2868_v1  ;;  %v3238_v1 = vld [vmem:[%s6345_s1 + $0x208] sm:$0xff] }
 0xb86   :  { %4987 = vmatpush3.bf16.msra.mxu0 %v5949_v57  ;;  %4990 = vmatprep.mubr.msk.bf16.mxu0 %vm5210_vm0, %v5209_v0 }
 0xb87   :  { %4988 = vmatprep.subr.bf16.mxu0 %v5209_v0 }
 0xb8a   :  { %4989 = vmatpush3.bf16.msra.mxu0 %v5963_v4 }
 0xb8b   :  { %5002 = vmatprep.subr.bf16.mxu0 %v5209_v0 }
 0xb8d   :  { %4991 = vmatmul.mubr.msk.bf16.vlgmr.msra.gmra.mrb[84].mxu0 %vm2085_vm8, %v5929_v31 }
 0xb8e   :  { %5004 = vmatprep.mubr.msk.bf16.mxu0 %vm5210_vm0, %v5209_v0 }
 0xbe4   :  { %v3554_v51 = vpop.permute.xlu1 %3553 }
 0xc3c   :  { %v2957_v2 = vpop.f32.mrb[112].mxu1 }
 0xc3d   :  { %v4984_v3 = vpop.f32.mrb[113].mxu1 }
 0xc3e   :  { %v2960_v34 = vpop.f32.mrb[114].mxu1 }
 0xc3f   :  { %v4985_v52 = vpop.f32.mrb[115].mxu1 }
 0xc44   :  { %v3042_v7 = vpop.f32.mrb[116].mxu1 }
 0xc45   :  { %v3055_v10 = vpack.c.bf16 %v3042_v7, %v3042_v7  ;;  %v5000_v29 = vpop.f32.mrb[117].mxu1 }
 0xc46   :  { %v3045_v35 = vpop.f32.mrb[118].mxu1  ;;  %v3355_v29 = vld [vmem:[%s6345_s1 + $0x230] sm:$0xff] }
 0xc47   :  { %v3060_v31 = vsel %vm125_vm1, %v3055_v10, 0  ;;  %v5001_v36 = vpop.f32.mrb[119].mxu1  ;;  %v3354_v10 = vld [vmem:[%s6345_s1 + $0x228] sm:$0xff] }
 0xc48   :  { %5003 = vmatpush3.bf16.msra.mxu0 %v3060_v31  ;;  %v3356_v35 = vpack.c.bf16 %v3355_v29, %v3354_v10  ;;  %v3449_v31 = vld [vmem:[%s6345_s1 + $0x240] sm:$0xff]  ;;  %v3737_v29 = vld [vmem:[%s6345_s1 + $0x268] sm:$0xff] }
 0xc49   :  { %5014 = vmatprep.subr.bf16.mxu0 %v5209_v0 }
 0xc4b   :  { %5005 = vmatmul.mubr.msk.bf16.vlgmr.msra.gmra.mrb[88].mxu0 %vm722_vm7, %v3054_v37 }
 0xc4c   :  { %5015 = vmatpush3.bf16.msra.mxu0 %v5949_v57  ;;  %5018 = vmatprep.mubr.msk.bf16.mxu0 %vm5210_vm0, %v5209_v0 }
 0xc4d   :  { %5016 = vmatprep.subr.bf16.mxu0 %v5209_v0 }
 0xc50   :  { %5017 = vmatpush3.bf16.msra.mxu0 %v5963_v4  ;;  %v3048_v4 = vld [vmem:[%s6345_s1 + $0x1d8] sm:$0xff] }
 0xc51   :  { %5030 = vmatprep.subr.bf16.mxu0 %v5209_v0  ;;  %v3050_v25 = vpack.c.bf16 %v3049_v46, %v3048_v4 }
 0xc53   :  { %5019 = vmatmul.mubr.msk.bf16.vlgmr.msra.gmra.mrb[92].mxu0 %vm2085_vm8, %v5866_v5 }
 0xc54   :  { %5032 = vmatprep.mubr.msk.bf16.mxu0 %vm5210_vm0, %v5209_v0 }
 0xc58   :  { %v2910_v39 = vpop.f32.mrb[80].mxu0 }
 0xc59   :  { %v2958_v40 = vadd.f32 %v2957_v2, %v2910_v39  ;;  %v4978_v42 = vpop.f32.mrb[81].mxu0  ;;  %v3239_v2 = vld [vmem:[%s6345_s1 + $0x210] sm:$0xff] }
 0xc5a   :  { %v2913_v38 = vpop.f32.mrb[82].mxu0  ;;  %v3240_v9 = vpack.c.bf16 %v3239_v2, %v3238_v1 }
 0xc5b   :  { %v6181_v57 = vadd.f32 %v2958_v40, %v2774_v56  ;;  %v2961_v41 = vadd.f32 %v2960_v34, %v2913_v38  ;;  %v4979_v43 = vpop.f32.mrb[83].mxu0  ;;  %v3348_v56 = vld [vmem:[%s6345_s1 + $0x218] sm:$0xff] }
 0xc5c   :  { %v3350_v60 = vpack.c.bf16 %v3349_v58, %v3348_v56 }
 0xc5d   :  { %v6183_v44 = vadd.f32 %v2961_v41, %v2777_v15  ;;  %v3501_v15 = vld [vmem:[%s6345_s1 + $0x250] sm:$0xff] }
 0xc60   :  { %v3002_v45 = vpop.f32.mrb[84].mxu0 }
 0xc61   :  { %v3051_v48 = vpack.c.bf16 %v3002_v45, %v3002_v45  ;;  %v4992_v63 = vpop.f32.mrb[85].mxu0 }
 0xc62   :  { %v3005_v32 = vpop.f32.mrb[86].mxu0 }
 0xc63   :  { %v3107_v20 = vsel %vm125_vm1, %v3051_v48, 0  ;;  %v4993_v22 = vpop.f32.mrb[87].mxu0 }
 0xc64   :  { %5009 = vmatpush3.bf16.msra.mxu1 %v3107_v20 }
 0xc65   :  { %5022 = vmatprep.subr.bf16.mxu1 %v5209_v0 }
 0xc67   :  { %5011 = vmatmul.mubr.msk.bf16.vlgmr.msra.gmra.mrb[120].mxu1 %vm722_vm7, %v3050_v25 }
 0xc68   :  { %5023 = vmatpush3.bf16.msra.mxu1 %v5954_v59  ;;  %5026 = vmatprep.mubr.msk.bf16.mxu1 %vm5210_vm0, %v5209_v0 }
 0xc69   :  { %5024 = vmatprep.subr.bf16.mxu1 %v5209_v0 }
 0xc6c   :  { %5025 = vmatpush3.bf16.msra.mxu1 %v5968_v12 }
 0xc6d   :  { %5036 = vmatprep.subr.bf16.mxu1 %v5209_v0 }
 0xc6f   :  { %5027 = vmatmul.mubr.msk.bf16.vlgmr.msra.gmra.mrb[124].mxu1 %vm2085_vm8, %v5866_v5 }
 0xc70   :  { %5038 = vmatprep.mubr.msk.bf16.mxu1 %vm5210_vm0, %v5209_v0 }
 0xd1e   :  { %v3096_v59 = vpop.f32.mrb[88].mxu0 }
 0xd1f   :  { %v5006_v12 = vpop.f32.mrb[89].mxu0 }
 0xd20   :  { %v3099_v5 = vpop.f32.mrb[90].mxu0 }
 0xd21   :  { %v5007_v33 = vpop.f32.mrb[91].mxu0 }
 0xd26   :  { %v3188_v49 = vpop.f32.mrb[92].mxu0 }
 0xd27   :  { %v3237_v11 = vpack.c.bf16 %v3188_v49, %v3188_v49  ;;  %v5020_v18 = vpop.f32.mrb[93].mxu0 }
 0xd28   :  { %v3191_v53 = vpop.f32.mrb[94].mxu0 }
 0xd29   :  { %v3293_v54 = vsel %vm125_vm1, %v3237_v11, 0  ;;  %v5021_v55 = vpop.f32.mrb[95].mxu0  ;;  %v3340_v11 = vpop.permute.xlu0 %3339 }
 0xd2a   :  { %5037 = vmatpush3.bf16.msra.mxu1 %v3293_v54 }
 0xd2b   :  { %5048 = vmatprep.subr.bf16.mxu1 %v5209_v0 }
 0xd2d   :  { %5039 = vmatmul.mubr.msk.bf16.vlgmr.msra.gmra.mrb[128].mxu1 %vm722_vm7, %v3236_v13 }
 0xd2e   :  { %5049 = vmatpush3.bf16.msra.mxu1 %v6097_v24  ;;  %5050 = vmatprep.mubr.msk.bf16.mxu1 %vm5210_vm0, %v5209_v0  ;;  %v3500_v24 = vld [vmem:[%s6345_s1 + $0x248] sm:$0xff] }
 0xd2f   :  { %5060 = vmatprep.subr.bf16.mxu1 %v5209_v0  ;;  %v3502_v17 = vpack.c.bf16 %v3501_v15, %v3500_v24  ;;  %v3558_v24 = vpop.permute.xlu0 %3557 }
 0xd35   :  { %5051 = vmatmul.mubr.msk.bf16.vlgmr.msra.gmra.mrb[132].mxu1 %vm2191_vm9, %v3350_v60  ;;  %v3344_v60 = vpop.permute.xlu1 %3343 }
 0xd36   :  { %5061 = vmatpush3.bf16.msra.mxu1 %v6111_v16  ;;  %5062 = vmatprep.mubr.msk.bf16.mxu1 %vm5210_vm0, %v5209_v0 }
 0xd3a   :  { %v3143_v19 = vpop.f32.mrb[120].mxu1 }
 0xd3b   :  { %v3144_v21 = vadd.f32 %v3143_v19, %v3096_v59  ;;  %v5012_v23 = vpop.f32.mrb[121].mxu1 }
 0xd3c   :  { %v3146_v27 = vpop.f32.mrb[122].mxu1 }
 0xd3d   :  { %5063 = vmatmul.mubr.msk.bf16.vlgmr.msra.gmra.mrb[136].mxu1 %vm2191_vm9, %v3502_v17  ;;  %v3150_v16 = vadd.f32 %v3144_v21, %v6181_v57  ;;  %v3147_v26 = vadd.f32 %v3146_v27, %v3099_v5  ;;  %v5013_v6 = vpop.f32.mrb[123].mxu1 }
 0xd3f   :  { %v3151_v61 = vadd.f32 %v3147_v26, %v6183_v44 }
 0xd42   :  { %v3228_v62 = vpop.f32.mrb[124].mxu1 }
 0xd43   :  { %v3241_v3 = vpack.c.bf16 %v3228_v62, %v3228_v62  ;;  %v5028_v34 = vpop.f32.mrb[125].mxu1 }
 0xd44   :  { %v3231_v52 = vpop.f32.mrb[126].mxu1  ;;  %v3652_v34 = vld [vmem:[%s6345_s1 + $0x258] sm:$0xff] }
 0xd45   :  { %v3246_v7 = vsel %vm125_vm1, %v3241_v3, 0  ;;  %v5029_v8 = vpop.f32.mrb[127].mxu1  ;;  %v3653_v52 = vld [vmem:[%s6345_s1 + $0x260] sm:$0x3] }
 0xd46   :  { %5031 = vmatpush3.bf16.msra.mxu0 %v3246_v7 }
 0xd47   :  { %5042 = vmatprep.subr.bf16.mxu0 %v5209_v0 }
 0xd49   :  { %5033 = vmatmul.mubr.msk.bf16.vlgmr.msra.gmra.mrb[96].mxu0 %vm722_vm7, %v3240_v9  ;;  %v3654_v9 = vpack.c.bf16 %v3653_v52, %v3652_v34 }
 0xd4a   :  { %5043 = vmatpush3.bf16.msra.mxu0 %v6106_v47  ;;  %5044 = vmatprep.mubr.msk.bf16.mxu0 %vm5210_vm0, %v5209_v0  ;;  %v3448_v47 = vld [vmem:[%s6345_s1 + $0x238] sm:$0xff] }
 0xd4b   :  { %5054 = vmatprep.subr.bf16.mxu0 %v5209_v0  ;;  %v3450_v36 = vpack.c.bf16 %v3449_v31, %v3448_v47 }
 0xd51   :  { %5045 = vmatmul.mubr.msk.bf16.vlgmr.msra.gmra.mrb[100].mxu0 %vm2191_vm9, %v3356_v35  ;;  %v3738_v35 = vld [vmem:[%s6345_s1 + $0x270] sm:$0x3] }
 0xd52   :  { %5055 = vmatpush3.bf16.msra.mxu0 %v6108_v14  ;;  %5056 = vmatprep.mubr.msk.bf16.mxu0 %vm5210_vm0, %v5209_v0  ;;  %v6276_v14 = vld [vmem:[%s6350_s7] sm:$0xff] }
 0xd53   :  { %5076 = vmatprep.subr.bf16.mxu0 %v5209_v0  ;;  %5066 = vmatprep.subr.mxu1 %v6276_v14 }
 0xd54   :  { %5067 = vmatpush3.msra.mxu1 %v6276_v14 }
 0xd55   :  { %5071 = vmatprep.subr.mxu1 %v6276_v14 }
 0xd59   :  { %5057 = vmatmul.mubr.msk.bf16.vlgmr.msra.gmra.mrb[104].mxu0 %vm2191_vm9, %v3450_v36  ;;  %v3739_v36 = vpack.c.bf16 %v3738_v35, %v3737_v29 }
 0xd5a   :  { %5078 = vmatprep.mubr.msk.bf16.mxu0 %vm5210_vm0, %v5209_v0 }
 0xe00   :  { %v3329_v37 = vpop.f32.mrb[128].mxu1 }
 0xe01   :  { %v5040_v39 = vpop.f32.mrb[129].mxu1 }
 0xe02   :  { %v3332_v40 = vpop.f32.mrb[130].mxu1  ;;  %v5207_v39 = vld [vmem:[%s6344_s2] sm:$0xff] }
 0xe03   :  { %v5041_v42 = vpop.f32.mrb[131].mxu1 }
 0xe08   :  { %v3441_v38 = vpop.f32.mrb[132].mxu1 }
 0xe09   :  { %v5052_v57 = vpop.f32.mrb[133].mxu1 }
 0xe0a   :  { %v3444_v41 = vpop.f32.mrb[134].mxu1 }
 0xe0b   :  { %v5053_v43 = vpop.f32.mrb[135].mxu1 }
 0xe10   :  { %v3543_v44 = vpop.f32.mrb[136].mxu1 }
 0xe11   :  { %v5064_v45 = vpop.f32.mrb[137].mxu1 }
 0xe12   :  { %v3546_v4 = vpop.f32.mrb[138].mxu1 }
 0xe13   :  { %v5065_v46 = vpop.f32.mrb[139].mxu1 }
 0xe1c   :  { %v3282_v48 = vpop.f32.mrb[96].mxu0 }
 0xe1d   :  { %v3330_v63 = vadd.f32 %v3329_v37, %v3282_v48  ;;  %v5034_v32 = vpop.f32.mrb[97].mxu0  ;;  %v5226_v37 = vmov 15   ;;  %v3910_v48 = vld [vmem:[%s6345_s1 + $0x278] sm:$0xff] }
 0xe1e   :  { %v3285_v20 = vpop.f32.mrb[98].mxu0  ;;  %5178 = vset.pattern.permute.xlu1 %v5226_v37  ;;  %5179 = vset.pattern.permute.xlu0 %v5226_v37 }
 0xe1f   :  { %v3333_v22 = vadd.f32 %v3332_v40, %v3285_v20  ;;  %v3336_v25 = vadd.f32 %v3330_v63, %v3150_v16  ;;  %v5035_v30 = vpop.f32.mrb[99].mxu0  ;;  %4092 = vperm.xlu1 %5178, %v5207_v39   ;;  %v5208_v40 = vld [vmem:[%s6344_s2 + $0x8] sm:$0xff]  ;;  %v3911_v63 = vld [vmem:[%s6345_s1 + $0x280] sm:$0x3] }
 0xe20   :  { %v4041_v30 = vld [vmem:[%s6345_s1 + $0x288] sm:$0xff] }
 0xe21   :  { %v3337_v28 = vadd.f32 %v3333_v22, %v3151_v61  ;;  %v3346_v15 = vadd.f32 %v3340_v11, %v3336_v25  ;;  %v3912_v22 = vpack.c.bf16 %v3911_v63, %v3910_v48 }
 0xe23   :  { %v3347_v21 = vadd.f32 %v3344_v60, %v3337_v28  ;;  %4096 = vperm.xlu1 %5178, %v5208_v40   ;;  %v4042_v28 = vld [vmem:[%s6345_s1 + $0x290] sm:$0x3] }
 0xe24   :  { %v3397_v59 = vpop.f32.mrb[100].mxu0 }
 0xe25   :  { %v5046_v12 = vpop.f32.mrb[101].mxu0  ;;  %v3442_v5 = vadd.f32 %v3441_v38, %v3397_v59 }
 0xe26   :  { %v3400_v33 = vpop.f32.mrb[102].mxu0 }
 0xe27   :  { %v5047_v49 = vpop.f32.mrb[103].mxu0  ;;  %v3445_v50 = vadd.f32 %v3444_v41, %v3400_v33 }
 0xe2c   :  { %v3491_v18 = vpop.f32.mrb[104].mxu0 }
 0xe2d   :  { %v3498_v53 = vadd.f32 %v3491_v18, %v3442_v5  ;;  %v5058_v54 = vpop.f32.mrb[105].mxu0  ;;  %v4043_v5 = vpack.c.bf16 %v4042_v28, %v4041_v30 }
 0xe2e   :  { %v3494_v55 = vpop.f32.mrb[106].mxu0 }
 0xe2f   :  { %v3499_v13 = vadd.f32 %v3494_v55, %v3445_v50  ;;  %v3550_v56 = vadd.f32 %v3543_v44, %v3498_v53  ;;  %v5059_v58 = vpop.f32.mrb[107].mxu0 }
 0xe31   :  { %v3560_v17 = vadd.f32 %v3554_v51, %v3550_v56  ;;  %v3551_v19 = vadd.f32 %v3546_v4, %v3499_v13 }
 0xe33   :  { %v3562_v23 = vadd.f32 %v3560_v17, %v3346_v15  ;;  %v3561_v27 = vadd.f32 %v3558_v24, %v3551_v19 }
 0xe35   :  { %v3564_v16 = vadd.f32 %v3562_v23, %v3346_v15  ;;  %v3563_v26 = vadd.f32 %v3561_v27, %v3347_v21  ;;  %5068 = vmatprep.mubr.msk.f32.mxu1 %vm722_vm7, %v3562_v23 }
 0xe37   :  { %v3566_v6 = vadd.f32 %v3564_v16, %v3560_v17  ;;  %v3565_v61 = vadd.f32 %v3563_v26, %v3347_v21  ;;  %5069 = vmatmul.mubr.msk.f32.vlgmr.msra.gmra.mrb[140].mxu1 %vm722_vm7, %v3563_v26 }
 0xe38   :  { %5073 = vmatprep.mubr.msk.f32.mxu1 %vm722_vm7, %v3564_v16  ;;  %5072 = vmatpush3.msra.mxu1 %v6276_v14 }
 0xe39   :  { %v3568_v62 = vadd.f32 %v3566_v6, %v3562_v23  ;;  %v3567_v1 = vadd.f32 %v3565_v61, %v3561_v27  ;;  %5082 = vmatprep.subr.bf16.mxu1 %v5209_v0 }
 0xe3b   :  { %v3569_v2 = vadd.f32 %v3567_v1, %v3563_v26  ;;  %5074 = vmatmul.mubr.msk.f32.vlgmr.msra.gmra.mrb[142].mxu1 %vm722_vm7, %v3565_v61 }
 0xe3c   :  { %5084 = vmatprep.mubr.msk.bf16.mxu1 %vm5210_vm0, %v5209_v0 }
 0xe9e   :  { %v4093_v11 = vpop.permute.xlu1 %4092 }
 0xea2   :  { %v4097_v15 = vpop.permute.xlu1 %4096 }
 0xf0a   :  { %v5070_v3 = vpop.f32.mrb[140].mxu1 }
 0xf0b   :  { %v3643_v7 = vpop.f32.mrb[141].mxu1 }
 0xf0c   :  { %v3655_v8 = vpack.c.bf16 %v5070_v3, %v3643_v7 }
 0xf0e   :  { %v5075_v10 = vpop.f32.mrb[142].mxu1  ;;  %5083 = vmatpush3.bf16.msra.mxu1 %v3655_v8 }
 0xf0f   :  { %v3728_v47 = vpop.f32.mrb[143].mxu1  ;;  %5093 = vmatprep.subr.bf16.mxu1 %v5209_v0 }
 0xf10   :  { %v3740_v31 = vpack.c.bf16 %v5075_v10, %v3728_v47 }
 0xf11   :  { %5085 = vmatmul.mubr.msk.bf16.vlgmr.msra.gmra.mrb[144].mxu1 %vm2191_vm9, %v3654_v9 }
 0xf12   :  { %5077 = vmatpush3.bf16.msra.mxu0 %v3740_v31  ;;  %5095 = vmatprep.mubr.msk.bf16.mxu1 %vm5210_vm0, %v5209_v0 }
 0xf13   :  { %5088 = vmatprep.subr.mxu0 %v6276_v14 }
 0xf15   :  { %5079 = vmatmul.mubr.msk.bf16.vlgmr.msra.gmra.mrb[108].mxu0 %vm2191_vm9, %v3739_v36 }
 0xf16   :  { %5090 = vmatprep.mubr.msk.f32.mxu0 %vm722_vm7, %v3566_v6  ;;  %5089 = vmatpush3.msra.mxu0 %v6276_v14 }
 0xf17   :  { %5099 = vmatprep.subr.mxu0 %v6276_v14 }
 0xf1d   :  { %5091 = vmatmul.mubr.msk.f32.vlgmr.msra.gmra.mrb[112].mxu0 %vm722_vm7, %v3567_v1 }
 0xf1e   :  { %5101 = vmatprep.mubr.msk.f32.mxu0 %vm722_vm7, %v3568_v62  ;;  %5100 = vmatpush3.msra.mxu0 %v6276_v14 }
 0xf1f   :  { %5104 = vmatprep.subr.bf16.mxu0 %v5209_v0 }
 0xf21   :  { %5102 = vmatmul.mubr.msk.f32.vlgmr.msra.gmra.mrb[114].mxu0 %vm722_vm7, %v3569_v2 }
 0xf22   :  { %5106 = vmatprep.mubr.msk.bf16.mxu0 %vm5210_vm0, %v5209_v0 }
 0xfe4   :  { %v3822_v14 = vpop.f32.mrb[144].mxu1 }
 0xfe5   :  { %v5086_v42 = vpop.f32.mrb[145].mxu1 }
 0xfe6   :  { %v3825_v38 = vpop.f32.mrb[146].mxu1 }
 0xfe7   :  { %v5087_v57 = vpop.f32.mrb[147].mxu1 }
 0xfe8   :  { %v3778_v41 = vpop.f32.mrb[108].mxu0 }
 0xfe9   :  { %v5080_v43 = vpop.f32.mrb[109].mxu0  ;;  %v3823_v0 = vadd.f32 %v3822_v14, %v3778_v41 }
 0xfea   :  { %v3781_v44 = vpop.f32.mrb[110].mxu0 }
 0xfeb   :  { %v5081_v45 = vpop.f32.mrb[111].mxu0  ;;  %v3826_v4 = vadd.f32 %v3825_v38, %v3781_v44 }
 0xff0   :  { %v5092_v46 = vpop.f32.mrb[112].mxu0 }
 0xff1   :  { %v3901_v32 = vpop.f32.mrb[113].mxu0 }
 0xff2   :  { %v3913_v20 = vpack.c.bf16 %v5092_v46, %v3901_v32 }
 0xff4   :  { %5094 = vmatpush3.bf16.msra.mxu1 %v3913_v20  ;;  %v5103_v25 = vpop.f32.mrb[114].mxu0 }
 0xff5   :  { %v4032_v59 = vpop.f32.mrb[115].mxu0 }
 0xff6   :  { %v4044_v12 = vpack.c.bf16 %v5103_v25, %v4032_v59 }
 0xff7   :  { %5096 = vmatmul.mubr.msk.bf16.vlgmr.msra.gmra.mrb[148].mxu1 %vm2191_vm9, %v3912_v22 }
 0xff8   :  { %5105 = vmatpush3.bf16.msra.mxu0 %v4044_v12 }
 0xffb   :  { %5107 = vmatmul.mubr.msk.bf16.vlgmr.msra.gmra.mrb[116].mxu0 %vm2191_vm9, %v4043_v5 }
0x10ca   :  { %v3951_v33 = vpop.f32.mrb[148].mxu1 }
0x10cb   :  { %v3958_v49 = vadd.f32 %v3951_v33, %v3823_v0  ;;  %v5097_v50 = vpop.f32.mrb[149].mxu1 }
0x10cc   :  { %v3954_v51 = vpop.f32.mrb[150].mxu1 }
0x10cd   :  { %v3959_v18 = vadd.f32 %v3954_v51, %v3826_v4  ;;  %v5098_v53 = vpop.f32.mrb[151].mxu1 }
0x10ce   :  { %v4082_v54 = vpop.f32.mrb[116].mxu0 }
0x10cf   :  { %v4089_v55 = vadd.f32 %v4082_v54, %v3958_v49  ;;  %v5108_v13 = vpop.f32.mrb[117].mxu0 }
0x10d0   :  { %v4085_v56 = vpop.f32.mrb[118].mxu0 }
0x10d1   :  { %v4099_v58 = vadd.f32 %v4093_v11, %v4089_v55  ;;  %v4090_v60 = vadd.f32 %v4085_v56, %v3959_v18  ;;  %v5109_v24 = vpop.f32.mrb[119].mxu0 }
0x10d3   :  { %4102 = vst.msk [vmem:[%s6351_s8] sm:$0xff] %vm4101_vm10, %v4099_v58  ;;  %v4100_v17 = vadd.f32 %v4097_v15, %v4090_v60 }
0x10d5   :  { %4104 = vst.msk [vmem:[%s6351_s8 + $0x8] sm:$0x3] %vm4103_vm11, %v4100_v17 }

</bundles_post_ra>
